<compile_context>
chip_gen: v5e
topology: v5e:2x2
jax: 0.10.0
libtpu: 0.0.40
codegen_flags: <defaults>
</compile_context>

<pallas_src>
import math

import numpy as np
import jax
import jax.numpy as jnp
from jax import lax
from jax.experimental import pallas as pl
from jax.experimental.pallas import tpu as pltpu

# ---------------- synthetic small-model config ----------------
VOCAB = 256      # vocab size
D     = 32       # hidden size
H     = 4        # attention heads
HD    = D // H   # head dim
F     = 64       # MLP hidden size
L     = 2        # decoder layers
R     = 4        # LoRA rank
LORA_SCALE = 2.0 # lora_alpha / r
EPS   = 1e-5
B     = 2        # batch
S     = 8        # sequence length
NEG   = -1e30

BS = B * S               # rows per model stream
M  = 2 * BS              # stacked rows: (model, batch, seq)
INV_SQRT_HD = 1.0 / math.sqrt(HD)

# lane offsets inside the packed constants slab: [cos2 | sin2 | bias | lora_mask]
C_COS   = 0
C_SIN   = 2 * D
C_BIAS  = 4 * D
C_LMASK = 4 * D + M
C_TOTAL = 4 * D + M + 4 * R          # 176 lanes


# ---------------- in-kernel math helpers ----------------
def _rmsnorm(x, w):
    var = jnp.mean(x * x, axis=-1, keepdims=True)
    return x * lax.rsqrt(var + EPS) * w[None, :]


def _mm(a, b):
    return jnp.dot(a, b, preferred_element_type=jnp.float32)


# ---------------- Pallas kernel ----------------
def combined_lm_kernel(x_ref, consts_ref, rot2_ref, norms_ref,
                       wqkv_ref, wo_ref, wgu_ref, wd_ref,
                       la_ref, lb_ref, wlm_ref, out_ref):
    x = x_ref[...]                                     # (M, D)  rows = [model0(b,s), model1(b,s)]

    # loop-invariant constants, sliced ONCE from the packed slab
    cos2  = consts_ref[:, C_COS:C_COS + 2 * D]         # (M, 2D) RoPE cos for q|k (q half * 1/sqrt(HD))
    sin2  = consts_ref[:, C_SIN:C_SIN + 2 * D]         # (M, 2D)
    bias  = consts_ref[:, C_BIAS:C_BIAS + M]           # (M, M)  block-diag causal additive mask
    lmask = consts_ref[:, C_LMASK:C_LMASK + 4 * R]     # (M, 4R) per-row LoRA adapter selector
    rot2  = rot2_ref[...]                              # (2D, 2D) blockdiag(rotate_half, rotate_half)

    for l in range(L):                                 # L=2, unrolled
        # ---------------- attention ----------------
        h = _rmsnorm(x, norms_ref[l])
        # fused base QKV projection + fused block-diagonal LoRA delta (q and v columns only)
        qkv = _mm(h, wqkv_ref[l]) + _mm(_mm(h, la_ref[l]) * lmask, lb_ref[l])   # (M, 3D)
        qk = qkv[:, :2 * D]                            # (M, 64)
        v  = qkv[:, 2 * D:3 * D]                       # (M, 32)

        # fused RoPE on q|k at 64-lane width; q half already carries the 1/sqrt(HD) scale
        qk = qk * cos2 + _mm(qk, rot2) * sin2
        q = qk[:, :D]
        k = qk[:, D:2 * D]

        # heads stay untransposed: (M, H, HD) fed straight into batched contractions
        qh = q.reshape(M, H, HD)
        kh = k.reshape(M, H, HD)
        vh = v.reshape(M, H, HD)
        scores = jnp.einsum('qhd,khd->hqk', qh, kh,
                            preferred_element_type=jnp.float32) + bias[None]
        m_ = jnp.max(scores, axis=-1, keepdims=True)
        p = jnp.exp(scores - m_)
        p = p * pl.reciprocal(jnp.sum(p, axis=-1, keepdims=True), approx=True)
        attn = jnp.einsum('hqk,khd->qhd', p, vh,
                          preferred_element_type=jnp.float32)                   # (M, H, HD)
        x = x + _mm(attn.reshape(M, D), wo_ref[l])

        # ---------------- SwiGLU MLP (fused gate|up -> 128 lanes) ----------------
        h2 = _rmsnorm(x, norms_ref[L + l])
        gu = _mm(h2, wgu_ref[l])                       # (M, 2F) = (32, 128)
        gate = gu[:, :F]
        up   = gu[:, F:2 * F]
        x = x + _mm(gate * jax.nn.sigmoid(gate) * up, wd_ref[l])

    x = _rmsnorm(x, norms_ref[2 * L])
    # average the two model streams BEFORE the shared lm_head (exact: matmul is linear)
    x_avg = 0.5 * (x[:BS] + x[BS:])
    out_ref[...] = _mm(x_avg, wlm_ref[...])            # (BS, VOCAB), lane-dense (256)


# ---------------- wrapper: glue + fused / pre-transposed params ----------------
def combined_lm_logits(input_ids, params):
    # embedding gather stays in plain JAX; both model streams see the same embeddings
    x_emb = jnp.take(params["embed"], input_ids.reshape(-1), axis=0).astype(jnp.float32)  # (B*S, D)
    x_stacked = jnp.concatenate([x_emb, x_emb], axis=0)                                   # (M, D)

    # RoPE tables, tiled to full hidden width, duplicated for q|k, q half pre-scaled
    pos = jnp.arange(S, dtype=jnp.float32)
    inv_freq = 1.0 / (10000.0 ** (jnp.arange(0, HD, 2, dtype=jnp.float32) / HD))
    freqs = pos[:, None] * inv_freq[None, :]
    emb = jnp.concatenate([freqs, freqs], axis=-1)                 # (S, HD)
    cos_full = jnp.tile(jnp.cos(emb), (2 * B, H))                  # (M, D)
    sin_full = jnp.tile(jnp.sin(emb), (2 * B, H))                  # (M, D)
    cos2 = jnp.concatenate([cos_full * INV_SQRT_HD, cos_full], axis=-1)   # (M, 2D)
    sin2 = jnp.concatenate([sin_full * INV_SQRT_HD, sin_full], axis=-1)   # (M, 2D)

    # rotate_half per head == x @ rot, rot = kron(I_H, [[0, I],[-I, 0]]); doubled for q|k
    half = HD // 2
    blk = np.block([[np.zeros((half, half)), np.eye(half)],
                    [-np.eye(half), np.zeros((half, half))]])
    rot = np.kron(np.eye(H), blk)                                   # (D, D)
    rot2 = jnp.asarray(np.kron(np.eye(2), rot), dtype=jnp.float32)  # (2D, 2D)

    # block-diagonal causal mask over the 2*B stacked sequences of length S
    rows = np.arange(M)
    grp, pos_i = rows // S, rows % S
    allowed = (grp[:, None] == grp[None, :]) & (pos_i[:, None] >= pos_i[None, :])
    attn_bias = jnp.asarray(np.where(allowed, 0.0, NEG), dtype=jnp.float32)   # (M, M)

    # LoRA selector over fused [Aq1|Aq2|Av1|Av2] columns: model-0 rows pick adapter-1 cols
    model_id = rows // BS
    col_model = (np.arange(4 * R) // R) % 2
    lmask4 = jnp.asarray((model_id[:, None] == col_model[None, :]).astype(np.float32))    # (M, 4R)

    # one packed lane-dense constants slab: [cos2 | sin2 | bias | lmask]  -> (M, 176)
    consts = jnp.concatenate([cos2, sin2, attn_bias, lmask4], axis=-1)

    # all norm vectors in one array: rows [attn_norm(L) | mlp_norm(L) | final_norm(1)]
    norms = jnp.concatenate(
        [params["attn_norm"], params["mlp_norm"], params["final_norm"]], axis=0)          # (2L+1, D)

    # pre-transpose every weight to [in, out] so the kernel never transposes, then fuse
    t = lambda w: jnp.swapaxes(w, -1, -2)
    wq_t, wk_t, wv_t, wo_t = t(params["wq"]), t(params["wk"]), t(params["wv"]), t(params["wo"])
    wg_t, wu_t, wd_t = t(params["wg"]), t(params["wu"]), t(params["wd"])
    wqkv = jnp.concatenate([wq_t, wk_t, wv_t], axis=-1)             # (L, D, 3D)
    wgu  = jnp.concatenate([wg_t, wu_t], axis=-1)                   # (L, D, 2F)
    wlm_t = params["lm_head"].T                                     # (D, VOCAB)

    # fused LoRA: A -> (L, D, 4R); B -> (L, 4R, 3D) block-diagonal into q / v column ranges
    aq_t, av_t = t(params["lora_aq"]), t(params["lora_av"])         # (2, L, D, R)
    bq_t, bv_t = t(params["lora_bq"]), t(params["lora_bv"])         # (2, L, R, D)
    la = jnp.concatenate([aq_t[0], aq_t[1], av_t[0], av_t[1]], axis=-1)          # (L, D, 4R)
    bq_cat = LORA_SCALE * jnp.concatenate([bq_t[0], bq_t[1]], axis=-2)           # (L, 2R, D)
    bv_cat = LORA_SCALE * jnp.concatenate([bv_t[0], bv_t[1]], axis=-2)           # (L, 2R, D)
    z = jnp.zeros((L, 2 * R, D), jnp.float32)
    lb = jnp.concatenate(
        [jnp.concatenate([bq_cat, z, z], axis=-1),     # rows 0:2R  -> q columns
         jnp.concatenate([z, z, bv_cat], axis=-1)],    # rows 2R:4R -> v columns
        axis=-2)                                                                  # (L, 4R, 3D)

    vmem = lambda: pl.BlockSpec(memory_space=pltpu.MemorySpace.VMEM)
    n_in = 11
    out = pl.pallas_call(
        combined_lm_kernel,
        out_shape=jax.ShapeDtypeStruct((BS, VOCAB), jnp.float32),
        in_specs=[vmem() for _ in range(n_in)],
        out_specs=vmem(),
    )(x_stacked, consts, rot2, norms, wqkv, wo_t, wgu, wd_t, la, lb, wlm_t)

    return out.reshape(B, S, VOCAB)


# ---------------- deterministic parameter init ----------------
def init_params(key):
    ks = iter(jax.random.split(key, 32))
    n = lambda shape, scale=0.02: (scale * jax.random.normal(next(ks), shape, jnp.float32))
    params = {
        "embed":      n((VOCAB, D)),
        "attn_norm":  jnp.ones((L, D), jnp.float32),
        "mlp_norm":   jnp.ones((L, D), jnp.float32),
        "final_norm": jnp.ones((1, D), jnp.float32),
        "wq": n((L, D, D)), "wk": n((L, D, D)), "wv": n((L, D, D)), "wo": n((L, D, D)),
        "wg": n((L, F, D)), "wu": n((L, F, D)), "wd": n((L, D, F)),
        "lm_head": n((VOCAB, D)),
        # LoRA adapters for model1 / model2 stacked along a leading axis of size 2.
        # TODO(synk): PEFT initializes LoRA B to zero; we use nonzero deterministic values
        # so the two adapters (and hence the two averaged models) actually differ.
        "lora_aq": n((2, L, R, D)), "lora_bq": n((2, L, D, R)),
        "lora_av": n((2, L, R, D)), "lora_bv": n((2, L, D, R)),
    }
    return params


if __name__ == "__main__":
    key = jax.random.PRNGKey(0)
    k_param, k_ids = jax.random.split(key)
    params = init_params(k_param)
    input_ids = jax.random.randint(k_ids, (B, S), 0, VOCAB, dtype=jnp.int32)

    # TODO(synk): original loads Llama-3-8B checkpoints in bfloat16; this synthetic
    # stand-in computes in float32 at toy scale with deterministic weights.
    avg_logits = combined_lm_logits(input_ids, params)
    avg_logits = jax.block_until_ready(avg_logits)

    assert avg_logits.shape == (B, S, VOCAB)
    assert bool(jnp.all(jnp.isfinite(avg_logits)))
    print("KERNEL_OK")
</pallas_src>

<mosaic_0001>
module attributes {stable_mosaic.version = 11 : i64} {
  func.func @combined_lm_kernel(%arg0: memref<32x32xf32, #tpu.memory_space<vmem>>, %arg1: memref<32x176xf32, #tpu.memory_space<vmem>>, %arg2: memref<64x64xf32, #tpu.memory_space<vmem>>, %arg3: memref<5x32xf32, #tpu.memory_space<vmem>>, %arg4: memref<2x32x96xf32, #tpu.memory_space<vmem>>, %arg5: memref<2x32x32xf32, #tpu.memory_space<vmem>>, %arg6: memref<2x32x128xf32, #tpu.memory_space<vmem>>, %arg7: memref<2x64x32xf32, #tpu.memory_space<vmem>>, %arg8: memref<2x32x16xf32, #tpu.memory_space<vmem>>, %arg9: memref<2x16x96xf32, #tpu.memory_space<vmem>>, %arg10: memref<32x256xf32, #tpu.memory_space<vmem>>, %arg11: memref<16x256xf32, #tpu.memory_space<vmem>>) attributes {dimension_semantics = [], scalar_prefetch = 0 : i64, scratch_operands = 0 : i64, tpu.core_type = #tpu.core_type<tc>} {
    %c0 = arith.constant 0 : index
    %c0_0 = arith.constant 0 : index
    %0 = vector.load %arg0[%c0, %c0_0] : memref<32x32xf32, #tpu.memory_space<vmem>>, vector<32x32xf32>
    %c0_1 = arith.constant 0 : index
    %c0_2 = arith.constant 0 : index
    %1 = vector.load %arg1[%c0_1, %c0_2] : memref<32x176xf32, #tpu.memory_space<vmem>>, vector<32x64xf32>
    %c0_3 = arith.constant 0 : index
    %c64 = arith.constant 64 : index
    %2 = vector.load %arg1[%c0_3, %c64] : memref<32x176xf32, #tpu.memory_space<vmem>>, vector<32x64xf32>
    %c0_4 = arith.constant 0 : index
    %c128 = arith.constant 128 : index
    %3 = vector.load %arg1[%c0_4, %c128] : memref<32x176xf32, #tpu.memory_space<vmem>>, vector<32x32xf32>
    %c0_5 = arith.constant 0 : index
    %c160 = arith.constant 160 : index
    %4 = vector.load %arg1[%c0_5, %c160] : memref<32x176xf32, #tpu.memory_space<vmem>>, vector<32x16xf32>
    %c0_6 = arith.constant 0 : index
    %c0_7 = arith.constant 0 : index
    %5 = vector.load %arg2[%c0_6, %c0_7] : memref<64x64xf32, #tpu.memory_space<vmem>>, vector<64x64xf32>
    %c0_8 = arith.constant 0 : index
    %c0_9 = arith.constant 0 : index
    %6 = vector.load %arg3[%c0_8, %c0_9] : memref<5x32xf32, #tpu.memory_space<vmem>>, vector<1x32xf32>
    %7 = vector.shape_cast %6 : vector<1x32xf32> to vector<32xf32>
    %8 = arith.mulf %0, %0 : vector<32x32xf32>
    %cst = arith.constant dense<0.000000e+00> : vector<32xf32>
    %9 = vector.multi_reduction <add>, %8, %cst [1] : vector<32x32xf32> to vector<32xf32>
    %10 = vector.shape_cast %9 : vector<32xf32> to vector<32x1xf32>
    %cst_10 = arith.constant 3.200000e+01 : f32
    %11 = vector.broadcast %cst_10 : f32 to vector<32x1xf32>
    %12 = arith.divf %10, %11 : vector<32x1xf32>
    %cst_11 = arith.constant 9.99999974E-6 : f32
    %13 = vector.broadcast %cst_11 : f32 to vector<32x1xf32>
    %14 = arith.addf %12, %13 : vector<32x1xf32>
    %15 = math.rsqrt %14 : vector<32x1xf32>
    %16 = vector.broadcast %15 : vector<32x1xf32> to vector<32x32xf32>
    %17 = arith.mulf %0, %16 : vector<32x32xf32>
    %18 = vector.shape_cast %7 : vector<32xf32> to vector<1x32xf32>
    %19 = vector.broadcast %18 : vector<1x32xf32> to vector<32x32xf32>
    %20 = arith.mulf %17, %19 : vector<32x32xf32>
    %c0_12 = arith.constant 0 : index
    %c0_13 = arith.constant 0 : index
    %c0_14 = arith.constant 0 : index
    %21 = vector.load %arg4[%c0_12, %c0_13, %c0_14] : memref<2x32x96xf32, #tpu.memory_space<vmem>>, vector<1x32x96xf32>
    %22 = vector.shape_cast %21 : vector<1x32x96xf32> to vector<32x96xf32>
    %cst_15 = arith.constant dense<0.000000e+00> : vector<32x96xf32>
    %23 = tpu.matmul %20, %22, %cst_15 {dimension_numbers = #tpu.dot_dimension_numbers<[1], [0], [0], [1], [0, 0, 1, 1], [], []>} : vector<32x32xf32>, vector<32x96xf32>, vector<32x96xf32> -> vector<32x96xf32>
    %c0_16 = arith.constant 0 : index
    %c0_17 = arith.constant 0 : index
    %c0_18 = arith.constant 0 : index
    %24 = vector.load %arg8[%c0_16, %c0_17, %c0_18] : memref<2x32x16xf32, #tpu.memory_space<vmem>>, vector<1x32x16xf32>
    %25 = vector.shape_cast %24 : vector<1x32x16xf32> to vector<32x16xf32>
    %cst_19 = arith.constant dense<0.000000e+00> : vector<32x16xf32>
    %26 = tpu.matmul %20, %25, %cst_19 {dimension_numbers = #tpu.dot_dimension_numbers<[1], [0], [0], [1], [0, 0, 1, 1], [], []>} : vector<32x32xf32>, vector<32x16xf32>, vector<32x16xf32> -> vector<32x16xf32>
    %27 = arith.mulf %26, %4 : vector<32x16xf32>
    %c0_20 = arith.constant 0 : index
    %c0_21 = arith.constant 0 : index
    %c0_22 = arith.constant 0 : index
    %28 = vector.load %arg9[%c0_20, %c0_21, %c0_22] : memref<2x16x96xf32, #tpu.memory_space<vmem>>, vector<1x16x96xf32>
    %29 = vector.shape_cast %28 : vector<1x16x96xf32> to vector<16x96xf32>
    %cst_23 = arith.constant dense<0.000000e+00> : vector<32x96xf32>
    %30 = tpu.matmul %27, %29, %cst_23 {dimension_numbers = #tpu.dot_dimension_numbers<[1], [0], [0], [1], [0, 0, 1, 1], [], []>} : vector<32x16xf32>, vector<16x96xf32>, vector<32x96xf32> -> vector<32x96xf32>
    %31 = arith.addf %23, %30 : vector<32x96xf32>
    %32 = vector.extract_strided_slice %31 {offsets = [0, 0], sizes = [32, 64], strides = [1, 1]} : vector<32x96xf32> to vector<32x64xf32>
    %33 = vector.extract_strided_slice %31 {offsets = [0, 64], sizes = [32, 32], strides = [1, 1]} : vector<32x96xf32> to vector<32x32xf32>
    %34 = arith.mulf %32, %1 : vector<32x64xf32>
    %cst_24 = arith.constant dense<0.000000e+00> : vector<32x64xf32>
    %35 = tpu.matmul %32, %5, %cst_24 {dimension_numbers = #tpu.dot_dimension_numbers<[1], [0], [0], [1], [0, 0, 1, 1], [], []>} : vector<32x64xf32>, vector<64x64xf32>, vector<32x64xf32> -> vector<32x64xf32>
    %36 = arith.mulf %35, %2 : vector<32x64xf32>
    %37 = arith.addf %34, %36 : vector<32x64xf32>
    %38 = vector.extract_strided_slice %37 {offsets = [0, 0], sizes = [32, 32], strides = [1, 1]} : vector<32x64xf32> to vector<32x32xf32>
    %39 = vector.extract_strided_slice %37 {offsets = [0, 32], sizes = [32, 32], strides = [1, 1]} : vector<32x64xf32> to vector<32x32xf32>
    %40 = vector.shape_cast %38 : vector<32x32xf32> to vector<32x4x8xf32>
    %41 = vector.shape_cast %39 : vector<32x32xf32> to vector<32x4x8xf32>
    %42 = vector.shape_cast %33 : vector<32x32xf32> to vector<32x4x8xf32>
    "tpu.trace_start"() <{level = 10 : i32, message = "qhd,khd->hqk"}> : () -> ()
    %cst_25 = arith.constant dense<0.000000e+00> : vector<4x32x32xf32>
    %43 = tpu.matmul %40, %41, %cst_25 {dimension_numbers = #tpu.dot_dimension_numbers<[2], [2], [0], [0], [0, 1, 0, 0, 1, 0], [1], [1]>} : vector<32x4x8xf32>, vector<32x4x8xf32>, vector<4x32x32xf32> -> vector<4x32x32xf32>
    "tpu.trace_stop"() : () -> ()
    %44 = vector.shape_cast %3 : vector<32x32xf32> to vector<1x32x32xf32>
    %45 = vector.broadcast %44 : vector<1x32x32xf32> to vector<4x32x32xf32>
    %46 = arith.addf %43, %45 : vector<4x32x32xf32>
    %cst_26 = arith.constant dense<0xFF800000> : vector<4x32xf32>
    %47 = vector.multi_reduction <maximumf>, %46, %cst_26 [2] : vector<4x32x32xf32> to vector<4x32xf32>
    %48 = vector.shape_cast %47 : vector<4x32xf32> to vector<4x32x1xf32>
    %49 = vector.broadcast %48 : vector<4x32x1xf32> to vector<4x32x32xf32>
    %50 = arith.subf %46, %49 : vector<4x32x32xf32>
    %51 = math.exp %50 : vector<4x32x32xf32>
    %cst_27 = arith.constant dense<0.000000e+00> : vector<4x32xf32>
    %52 = vector.multi_reduction <add>, %51, %cst_27 [2] : vector<4x32x32xf32> to vector<4x32xf32>
    %53 = vector.shape_cast %52 : vector<4x32xf32> to vector<4x32x1xf32>
    %54 = tpu.reciprocal %53 {approx = true} : vector<4x32x1xf32> -> vector<4x32x1xf32>
    %55 = vector.broadcast %54 : vector<4x32x1xf32> to vector<4x32x32xf32>
    %56 = arith.mulf %51, %55 : vector<4x32x32xf32>
    "tpu.trace_start"() <{level = 10 : i32, message = "hqk,khd->qhd"}> : () -> ()
    %cst_28 = arith.constant dense<0.000000e+00> : vector<4x8x32xf32>
    %57 = tpu.matmul %42, %56, %cst_28 {dimension_numbers = #tpu.dot_dimension_numbers<[0], [2], [2], [1], [0, 1, 0, 2, 1, 1], [1], [0]>} : vector<32x4x8xf32>, vector<4x32x32xf32>, vector<4x8x32xf32> -> vector<4x8x32xf32>
    %58 = tpu.transpose %57, [2, 0, 1] : vector<4x8x32xf32> -> vector<32x4x8xf32>
    "tpu.trace_stop"() : () -> ()
    %59 = vector.shape_cast %58 : vector<32x4x8xf32> to vector<32x32xf32>
    %c0_29 = arith.constant 0 : index
    %c0_30 = arith.constant 0 : index
    %c0_31 = arith.constant 0 : index
    %60 = vector.load %arg5[%c0_29, %c0_30, %c0_31] : memref<2x32x32xf32, #tpu.memory_space<vmem>>, vector<1x32x32xf32>
    %61 = vector.shape_cast %60 : vector<1x32x32xf32> to vector<32x32xf32>
    %cst_32 = arith.constant dense<0.000000e+00> : vector<32x32xf32>
    %62 = tpu.matmul %59, %61, %cst_32 {dimension_numbers = #tpu.dot_dimension_numbers<[1], [0], [0], [1], [0, 0, 1, 1], [], []>} : vector<32x32xf32>, vector<32x32xf32>, vector<32x32xf32> -> vector<32x32xf32>
    %63 = arith.addf %0, %62 : vector<32x32xf32>
    %c2 = arith.constant 2 : index
    %c0_33 = arith.constant 0 : index
    %64 = vector.load %arg3[%c2, %c0_33] : memref<5x32xf32, #tpu.memory_space<vmem>>, vector<1x32xf32>
    %65 = vector.shape_cast %64 : vector<1x32xf32> to vector<32xf32>
    %66 = arith.mulf %63, %63 : vector<32x32xf32>
    %cst_34 = arith.constant dense<0.000000e+00> : vector<32xf32>
    %67 = vector.multi_reduction <add>, %66, %cst_34 [1] : vector<32x32xf32> to vector<32xf32>
    %68 = vector.shape_cast %67 : vector<32xf32> to vector<32x1xf32>
    %cst_35 = arith.constant 3.200000e+01 : f32
    %69 = vector.broadcast %cst_35 : f32 to vector<32x1xf32>
    %70 = arith.divf %68, %69 : vector<32x1xf32>
    %cst_36 = arith.constant 9.99999974E-6 : f32
    %71 = vector.broadcast %cst_36 : f32 to vector<32x1xf32>
    %72 = arith.addf %70, %71 : vector<32x1xf32>
    %73 = math.rsqrt %72 : vector<32x1xf32>
    %74 = vector.broadcast %73 : vector<32x1xf32> to vector<32x32xf32>
    %75 = arith.mulf %63, %74 : vector<32x32xf32>
    %76 = vector.shape_cast %65 : vector<32xf32> to vector<1x32xf32>
    %77 = vector.broadcast %76 : vector<1x32xf32> to vector<32x32xf32>
    %78 = arith.mulf %75, %77 : vector<32x32xf32>
    %c0_37 = arith.constant 0 : index
    %c0_38 = arith.constant 0 : index
    %c0_39 = arith.constant 0 : index
    %79 = vector.load %arg6[%c0_37, %c0_38, %c0_39] : memref<2x32x128xf32, #tpu.memory_space<vmem>>, vector<1x32x128xf32>
    %80 = vector.shape_cast %79 : vector<1x32x128xf32> to vector<32x128xf32>
    %cst_40 = arith.constant dense<0.000000e+00> : vector<32x128xf32>
    %81 = tpu.matmul %78, %80, %cst_40 {dimension_numbers = #tpu.dot_dimension_numbers<[1], [0], [0], [1], [0, 0, 1, 1], [], []>} : vector<32x32xf32>, vector<32x128xf32>, vector<32x128xf32> -> vector<32x128xf32>
    %82 = vector.extract_strided_slice %81 {offsets = [0, 0], sizes = [32, 64], strides = [1, 1]} : vector<32x128xf32> to vector<32x64xf32>
    %83 = vector.extract_strided_slice %81 {offsets = [0, 64], sizes = [32, 64], strides = [1, 1]} : vector<32x128xf32> to vector<32x64xf32>
    %84 = arith.negf %82 : vector<32x64xf32>
    %85 = math.exp %84 : vector<32x64xf32>
    %cst_41 = arith.constant 1.000000e+00 : f32
    %86 = vector.broadcast %cst_41 : f32 to vector<32x64xf32>
    %87 = arith.addf %86, %85 : vector<32x64xf32>
    %88 = arith.divf %86, %87 : vector<32x64xf32>
    %89 = arith.mulf %82, %88 : vector<32x64xf32>
    %90 = arith.mulf %89, %83 : vector<32x64xf32>
    %c0_42 = arith.constant 0 : index
    %c0_43 = arith.constant 0 : index
    %c0_44 = arith.constant 0 : index
    %91 = vector.load %arg7[%c0_42, %c0_43, %c0_44] : memref<2x64x32xf32, #tpu.memory_space<vmem>>, vector<1x64x32xf32>
    %92 = vector.shape_cast %91 : vector<1x64x32xf32> to vector<64x32xf32>
    %cst_45 = arith.constant dense<0.000000e+00> : vector<32x32xf32>
    %93 = tpu.matmul %90, %92, %cst_45 {dimension_numbers = #tpu.dot_dimension_numbers<[1], [0], [0], [1], [0, 0, 1, 1], [], []>} : vector<32x64xf32>, vector<64x32xf32>, vector<32x32xf32> -> vector<32x32xf32>
    %94 = arith.addf %63, %93 : vector<32x32xf32>
    %c1 = arith.constant 1 : index
    %c0_46 = arith.constant 0 : index
    %95 = vector.load %arg3[%c1, %c0_46] : memref<5x32xf32, #tpu.memory_space<vmem>>, vector<1x32xf32>
    %96 = vector.shape_cast %95 : vector<1x32xf32> to vector<32xf32>
    %97 = arith.mulf %94, %94 : vector<32x32xf32>
    %cst_47 = arith.constant dense<0.000000e+00> : vector<32xf32>
    %98 = vector.multi_reduction <add>, %97, %cst_47 [1] : vector<32x32xf32> to vector<32xf32>
    %99 = vector.shape_cast %98 : vector<32xf32> to vector<32x1xf32>
    %cst_48 = arith.constant 3.200000e+01 : f32
    %100 = vector.broadcast %cst_48 : f32 to vector<32x1xf32>
    %101 = arith.divf %99, %100 : vector<32x1xf32>
    %cst_49 = arith.constant 9.99999974E-6 : f32
    %102 = vector.broadcast %cst_49 : f32 to vector<32x1xf32>
    %103 = arith.addf %101, %102 : vector<32x1xf32>
    %104 = math.rsqrt %103 : vector<32x1xf32>
    %105 = vector.broadcast %104 : vector<32x1xf32> to vector<32x32xf32>
    %106 = arith.mulf %94, %105 : vector<32x32xf32>
    %107 = vector.shape_cast %96 : vector<32xf32> to vector<1x32xf32>
    %108 = vector.broadcast %107 : vector<1x32xf32> to vector<32x32xf32>
    %109 = arith.mulf %106, %108 : vector<32x32xf32>
    %c1_50 = arith.constant 1 : index
    %c0_51 = arith.constant 0 : index
    %c0_52 = arith.constant 0 : index
    %110 = vector.load %arg4[%c1_50, %c0_51, %c0_52] : memref<2x32x96xf32, #tpu.memory_space<vmem>>, vector<1x32x96xf32>
    %111 = vector.shape_cast %110 : vector<1x32x96xf32> to vector<32x96xf32>
    %cst_53 = arith.constant dense<0.000000e+00> : vector<32x96xf32>
    %112 = tpu.matmul %109, %111, %cst_53 {dimension_numbers = #tpu.dot_dimension_numbers<[1], [0], [0], [1], [0, 0, 1, 1], [], []>} : vector<32x32xf32>, vector<32x96xf32>, vector<32x96xf32> -> vector<32x96xf32>
    %c1_54 = arith.constant 1 : index
    %c0_55 = arith.constant 0 : index
    %c0_56 = arith.constant 0 : index
    %113 = vector.load %arg8[%c1_54, %c0_55, %c0_56] : memref<2x32x16xf32, #tpu.memory_space<vmem>>, vector<1x32x16xf32>
    %114 = vector.shape_cast %113 : vector<1x32x16xf32> to vector<32x16xf32>
    %cst_57 = arith.constant dense<0.000000e+00> : vector<32x16xf32>
    %115 = tpu.matmul %109, %114, %cst_57 {dimension_numbers = #tpu.dot_dimension_numbers<[1], [0], [0], [1], [0, 0, 1, 1], [], []>} : vector<32x32xf32>, vector<32x16xf32>, vector<32x16xf32> -> vector<32x16xf32>
    %116 = arith.mulf %115, %4 : vector<32x16xf32>
    %c1_58 = arith.constant 1 : index
    %c0_59 = arith.constant 0 : index
    %c0_60 = arith.constant 0 : index
    %117 = vector.load %arg9[%c1_58, %c0_59, %c0_60] : memref<2x16x96xf32, #tpu.memory_space<vmem>>, vector<1x16x96xf32>
    %118 = vector.shape_cast %117 : vector<1x16x96xf32> to vector<16x96xf32>
    %cst_61 = arith.constant dense<0.000000e+00> : vector<32x96xf32>
    %119 = tpu.matmul %116, %118, %cst_61 {dimension_numbers = #tpu.dot_dimension_numbers<[1], [0], [0], [1], [0, 0, 1, 1], [], []>} : vector<32x16xf32>, vector<16x96xf32>, vector<32x96xf32> -> vector<32x96xf32>
    %120 = arith.addf %112, %119 : vector<32x96xf32>
    %121 = vector.extract_strided_slice %120 {offsets = [0, 0], sizes = [32, 64], strides = [1, 1]} : vector<32x96xf32> to vector<32x64xf32>
    %122 = vector.extract_strided_slice %120 {offsets = [0, 64], sizes = [32, 32], strides = [1, 1]} : vector<32x96xf32> to vector<32x32xf32>
    %123 = arith.mulf %121, %1 : vector<32x64xf32>
    %cst_62 = arith.constant dense<0.000000e+00> : vector<32x64xf32>
    %124 = tpu.matmul %121, %5, %cst_62 {dimension_numbers = #tpu.dot_dimension_numbers<[1], [0], [0], [1], [0, 0, 1, 1], [], []>} : vector<32x64xf32>, vector<64x64xf32>, vector<32x64xf32> -> vector<32x64xf32>
    %125 = arith.mulf %124, %2 : vector<32x64xf32>
    %126 = arith.addf %123, %125 : vector<32x64xf32>
    %127 = vector.extract_strided_slice %126 {offsets = [0, 0], sizes = [32, 32], strides = [1, 1]} : vector<32x64xf32> to vector<32x32xf32>
    %128 = vector.extract_strided_slice %126 {offsets = [0, 32], sizes = [32, 32], strides = [1, 1]} : vector<32x64xf32> to vector<32x32xf32>
    %129 = vector.shape_cast %127 : vector<32x32xf32> to vector<32x4x8xf32>
    %130 = vector.shape_cast %128 : vector<32x32xf32> to vector<32x4x8xf32>
    %131 = vector.shape_cast %122 : vector<32x32xf32> to vector<32x4x8xf32>
    "tpu.trace_start"() <{level = 10 : i32, message = "qhd,khd->hqk"}> : () -> ()
    %cst_63 = arith.constant dense<0.000000e+00> : vector<4x32x32xf32>
    %132 = tpu.matmul %129, %130, %cst_63 {dimension_numbers = #tpu.dot_dimension_numbers<[2], [2], [0], [0], [0, 1, 0, 0, 1, 0], [1], [1]>} : vector<32x4x8xf32>, vector<32x4x8xf32>, vector<4x32x32xf32> -> vector<4x32x32xf32>
    "tpu.trace_stop"() : () -> ()
    %133 = vector.shape_cast %3 : vector<32x32xf32> to vector<1x32x32xf32>
    %134 = vector.broadcast %133 : vector<1x32x32xf32> to vector<4x32x32xf32>
    %135 = arith.addf %132, %134 : vector<4x32x32xf32>
    %cst_64 = arith.constant dense<0xFF800000> : vector<4x32xf32>
    %136 = vector.multi_reduction <maximumf>, %135, %cst_64 [2] : vector<4x32x32xf32> to vector<4x32xf32>
    %137 = vector.shape_cast %136 : vector<4x32xf32> to vector<4x32x1xf32>
    %138 = vector.broadcast %137 : vector<4x32x1xf32> to vector<4x32x32xf32>
    %139 = arith.subf %135, %138 : vector<4x32x32xf32>
    %140 = math.exp %139 : vector<4x32x32xf32>
    %cst_65 = arith.constant dense<0.000000e+00> : vector<4x32xf32>
    %141 = vector.multi_reduction <add>, %140, %cst_65 [2] : vector<4x32x32xf32> to vector<4x32xf32>
    %142 = vector.shape_cast %141 : vector<4x32xf32> to vector<4x32x1xf32>
    %143 = tpu.reciprocal %142 {approx = true} : vector<4x32x1xf32> -> vector<4x32x1xf32>
    %144 = vector.broadcast %143 : vector<4x32x1xf32> to vector<4x32x32xf32>
    %145 = arith.mulf %140, %144 : vector<4x32x32xf32>
    "tpu.trace_start"() <{level = 10 : i32, message = "hqk,khd->qhd"}> : () -> ()
    %cst_66 = arith.constant dense<0.000000e+00> : vector<4x8x32xf32>
    %146 = tpu.matmul %131, %145, %cst_66 {dimension_numbers = #tpu.dot_dimension_numbers<[0], [2], [2], [1], [0, 1, 0, 2, 1, 1], [1], [0]>} : vector<32x4x8xf32>, vector<4x32x32xf32>, vector<4x8x32xf32> -> vector<4x8x32xf32>
    %147 = tpu.transpose %146, [2, 0, 1] : vector<4x8x32xf32> -> vector<32x4x8xf32>
    "tpu.trace_stop"() : () -> ()
    %148 = vector.shape_cast %147 : vector<32x4x8xf32> to vector<32x32xf32>
    %c1_67 = arith.constant 1 : index
    %c0_68 = arith.constant 0 : index
    %c0_69 = arith.constant 0 : index
    %149 = vector.load %arg5[%c1_67, %c0_68, %c0_69] : memref<2x32x32xf32, #tpu.memory_space<vmem>>, vector<1x32x32xf32>
    %150 = vector.shape_cast %149 : vector<1x32x32xf32> to vector<32x32xf32>
    %cst_70 = arith.constant dense<0.000000e+00> : vector<32x32xf32>
    %151 = tpu.matmul %148, %150, %cst_70 {dimension_numbers = #tpu.dot_dimension_numbers<[1], [0], [0], [1], [0, 0, 1, 1], [], []>} : vector<32x32xf32>, vector<32x32xf32>, vector<32x32xf32> -> vector<32x32xf32>
    %152 = arith.addf %94, %151 : vector<32x32xf32>
    %c3 = arith.constant 3 : index
    %c0_71 = arith.constant 0 : index
    %153 = vector.load %arg3[%c3, %c0_71] : memref<5x32xf32, #tpu.memory_space<vmem>>, vector<1x32xf32>
    %154 = vector.shape_cast %153 : vector<1x32xf32> to vector<32xf32>
    %155 = arith.mulf %152, %152 : vector<32x32xf32>
    %cst_72 = arith.constant dense<0.000000e+00> : vector<32xf32>
    %156 = vector.multi_reduction <add>, %155, %cst_72 [1] : vector<32x32xf32> to vector<32xf32>
    %157 = vector.shape_cast %156 : vector<32xf32> to vector<32x1xf32>
    %cst_73 = arith.constant 3.200000e+01 : f32
    %158 = vector.broadcast %cst_73 : f32 to vector<32x1xf32>
    %159 = arith.divf %157, %158 : vector<32x1xf32>
    %cst_74 = arith.constant 9.99999974E-6 : f32
    %160 = vector.broadcast %cst_74 : f32 to vector<32x1xf32>
    %161 = arith.addf %159, %160 : vector<32x1xf32>
    %162 = math.rsqrt %161 : vector<32x1xf32>
    %163 = vector.broadcast %162 : vector<32x1xf32> to vector<32x32xf32>
    %164 = arith.mulf %152, %163 : vector<32x32xf32>
    %165 = vector.shape_cast %154 : vector<32xf32> to vector<1x32xf32>
    %166 = vector.broadcast %165 : vector<1x32xf32> to vector<32x32xf32>
    %167 = arith.mulf %164, %166 : vector<32x32xf32>
    %c1_75 = arith.constant 1 : index
    %c0_76 = arith.constant 0 : index
    %c0_77 = arith.constant 0 : index
    %168 = vector.load %arg6[%c1_75, %c0_76, %c0_77] : memref<2x32x128xf32, #tpu.memory_space<vmem>>, vector<1x32x128xf32>
    %169 = vector.shape_cast %168 : vector<1x32x128xf32> to vector<32x128xf32>
    %cst_78 = arith.constant dense<0.000000e+00> : vector<32x128xf32>
    %170 = tpu.matmul %167, %169, %cst_78 {dimension_numbers = #tpu.dot_dimension_numbers<[1], [0], [0], [1], [0, 0, 1, 1], [], []>} : vector<32x32xf32>, vector<32x128xf32>, vector<32x128xf32> -> vector<32x128xf32>
    %171 = vector.extract_strided_slice %170 {offsets = [0, 0], sizes = [32, 64], strides = [1, 1]} : vector<32x128xf32> to vector<32x64xf32>
    %172 = vector.extract_strided_slice %170 {offsets = [0, 64], sizes = [32, 64], strides = [1, 1]} : vector<32x128xf32> to vector<32x64xf32>
    %173 = arith.negf %171 : vector<32x64xf32>
    %174 = math.exp %173 : vector<32x64xf32>
    %cst_79 = arith.constant 1.000000e+00 : f32
    %175 = vector.broadcast %cst_79 : f32 to vector<32x64xf32>
    %176 = arith.addf %175, %174 : vector<32x64xf32>
    %177 = arith.divf %175, %176 : vector<32x64xf32>
    %178 = arith.mulf %171, %177 : vector<32x64xf32>
    %179 = arith.mulf %178, %172 : vector<32x64xf32>
    %c1_80 = arith.constant 1 : index
    %c0_81 = arith.constant 0 : index
    %c0_82 = arith.constant 0 : index
    %180 = vector.load %arg7[%c1_80, %c0_81, %c0_82] : memref<2x64x32xf32, #tpu.memory_space<vmem>>, vector<1x64x32xf32>
    %181 = vector.shape_cast %180 : vector<1x64x32xf32> to vector<64x32xf32>
    %cst_83 = arith.constant dense<0.000000e+00> : vector<32x32xf32>
    %182 = tpu.matmul %179, %181, %cst_83 {dimension_numbers = #tpu.dot_dimension_numbers<[1], [0], [0], [1], [0, 0, 1, 1], [], []>} : vector<32x64xf32>, vector<64x32xf32>, vector<32x32xf32> -> vector<32x32xf32>
    %183 = arith.addf %152, %182 : vector<32x32xf32>
    %c4 = arith.constant 4 : index
    %c0_84 = arith.constant 0 : index
    %184 = vector.load %arg3[%c4, %c0_84] : memref<5x32xf32, #tpu.memory_space<vmem>>, vector<1x32xf32>
    %185 = vector.shape_cast %184 : vector<1x32xf32> to vector<32xf32>
    %186 = arith.mulf %183, %183 : vector<32x32xf32>
    %cst_85 = arith.constant dense<0.000000e+00> : vector<32xf32>
    %187 = vector.multi_reduction <add>, %186, %cst_85 [1] : vector<32x32xf32> to vector<32xf32>
    %188 = vector.shape_cast %187 : vector<32xf32> to vector<32x1xf32>
    %cst_86 = arith.constant 3.200000e+01 : f32
    %189 = vector.broadcast %cst_86 : f32 to vector<32x1xf32>
    %190 = arith.divf %188, %189 : vector<32x1xf32>
    %cst_87 = arith.constant 9.99999974E-6 : f32
    %191 = vector.broadcast %cst_87 : f32 to vector<32x1xf32>
    %192 = arith.addf %190, %191 : vector<32x1xf32>
    %193 = math.rsqrt %192 : vector<32x1xf32>
    %194 = vector.broadcast %193 : vector<32x1xf32> to vector<32x32xf32>
    %195 = arith.mulf %183, %194 : vector<32x32xf32>
    %196 = vector.shape_cast %185 : vector<32xf32> to vector<1x32xf32>
    %197 = vector.broadcast %196 : vector<1x32xf32> to vector<32x32xf32>
    %198 = arith.mulf %195, %197 : vector<32x32xf32>
    %199 = vector.extract_strided_slice %198 {offsets = [0, 0], sizes = [16, 32], strides = [1, 1]} : vector<32x32xf32> to vector<16x32xf32>
    %200 = vector.extract_strided_slice %198 {offsets = [16, 0], sizes = [16, 32], strides = [1, 1]} : vector<32x32xf32> to vector<16x32xf32>
    %201 = arith.addf %199, %200 : vector<16x32xf32>
    %cst_88 = arith.constant 5.000000e-01 : f32
    %202 = vector.broadcast %cst_88 : f32 to vector<16x32xf32>
    %203 = arith.mulf %202, %201 : vector<16x32xf32>
    %c0_89 = arith.constant 0 : index
    %c0_90 = arith.constant 0 : index
    %204 = vector.load %arg10[%c0_89, %c0_90] : memref<32x256xf32, #tpu.memory_space<vmem>>, vector<32x256xf32>
    %cst_91 = arith.constant dense<0.000000e+00> : vector<16x256xf32>
    %205 = tpu.matmul %203, %204, %cst_91 {dimension_numbers = #tpu.dot_dimension_numbers<[1], [0], [0], [1], [0, 0, 1, 1], [], []>} : vector<16x32xf32>, vector<32x256xf32>, vector<16x256xf32> -> vector<16x256xf32>
    %c0_92 = arith.constant 0 : index
    %c0_93 = arith.constant 0 : index
    %206 = vector.load %arg11[%c0_92, %c0_93] : memref<16x256xf32, #tpu.memory_space<vmem>>, vector<16x256xf32>
    tpu.vector_store %arg11[%c0_92, %c0_93], %205 {strides = array<i32>} : memref<16x256xf32, #tpu.memory_space<vmem>>, vector<16x256xf32>,
    return
  }
}

</mosaic_0001>

<bundles_post_ra>
// kernel: tpu_custom_call.1
= control target key start
LH: loop header
LB: loop body
LE: loop exit
PB: predicated region body
PF: predicated region fallthrough
CT: control target
= control target key end

     0   :  { %16 = vsyncpa [#allocation3], 0  ;;  %s7074_s0 = inlined_call_operand.vmem [shape: f32[32,32], index: 0, kind: input, shape index: {}]   ;;  %s7075_s1 = inlined_call_operand.vmem [shape: f32[32,176], index: 1, kind: input, shape index: {}]   ;;  %s7076_s2 = inlined_call_operand.vmem [shape: f32[64,64], index: 2, kind: input, shape index: {}]   ;;  %s7077_s3 = inlined_call_operand.hbm [shape: f32[5,32], index: 3, kind: input, shape index: {}]   ;;  %s7078_s4 = inlined_call_operand.vmem [shape: f32[2,32,96], index: 4, kind: input, shape index: {}]   ;;  %s7079_s5 = inlined_call_operand.hbm [shape: f32[2,32,32], index: 5, kind: input, shape index: {}]   ;;  %s7080_s6 = inlined_call_operand.hbm [shape: f32[2,32,128], index: 6, kind: input, shape index: {}]   ;;  %s7081_s7 = inlined_call_operand.vmem [shape: f32[2,64,32], index: 7, kind: input, shape index: {}]   ;;  %s7082_s8 = inlined_call_operand.vmem [shape: f32[2,32,16], index: 8, kind: input, shape index: {}]   ;;  %s7083_s9 = inlined_call_operand.hbm [shape: f32[2,16,96], index: 9, kind: input, shape index: {}]   ;;  %s7084_s10 = inlined_call_operand.hbm [shape: f32[32,256], index: 10, kind: input, shape index: {}]   ;;  %s7085_s11 = inlined_call_operand.hbm [shape: f32[16,256], index: 11, kind: output, shape index: {}]  }
   0x1   :  { %17 = vsyncpa [#allocation6], 0 }
   0x2   :  { %18 = vsyncpa [#allocation9], 0  ;;  %s43_s19 = sshll.u32 %s7079_s5, 4  ;;  %s44_s19 = int_to_ptr.hbm [resolvable:$true] %s43_s19 }
   0x3   :  { %19 = vsyncpa [#allocation4], 0  ;;  %s5174_s20 = smov [#allocation5]   ;;  %s73_s24 = sshll.u32 %s7083_s9, 4  ;;  %s74_s24 = int_to_ptr.hbm [resolvable:$true] %s73_s24 }
   0x4   :  { %s45_s21 = sshll.u32 %s5174_s20, 4  ;;  %s5175_s25 = smov 128   ;;  %s46_s21 = int_to_ptr.vmem [resolvable:$true] %s45_s21 }
   0x5   :  { %s5176_s26 = smov 8   ;;  %s5177_s27 = smov [#allocation8]  }
   0x6   :  { %51 = dma.hbm_to_vmem [thread:$0]  %s44_s19, 1024, %s46_s21, [#allocation6], %s5175_s25, %s5175_s25, %s5176_s26  }
   0x7   :  { %s75_s28 = sshll.u32 %s5177_s27, 4  ;;  %s31_s5 = sshll.u32 %s7077_s3, 4  ;;  %s76_s28 = int_to_ptr.vmem [resolvable:$true] %s75_s28  ;;  %s32_s5 = int_to_ptr.hbm [resolvable:$true] %s31_s5 }
   0x8   :  { %81 = dma.hbm_to_vmem [thread:$0]  %s74_s24, 512, %s76_s28, [#allocation9], %s5175_s25, %s5175_s25, %s5176_s26  }
   0x9   :  { %s56_s14 = sshll.u32 %s7080_s6, 4  ;;  %s5178_s9 = smov [#allocation2]   ;;  %s57_s14 = int_to_ptr.hbm [resolvable:$true] %s56_s14 }
   0xa   :  { %s33_s15 = sshll.u32 %s5178_s9, 4  ;;  %s5179_s16 = smov [#allocation7]   ;;  %s34_s15 = int_to_ptr.vmem [resolvable:$true] %s33_s15 }
   0xb   :  { %36 = dma.hbm_to_vmem [thread:$0]  %s32_s5, 128, %s34_s15, [#allocation3]  }
   0xc   :  { %s58_s17 = sshll.u32 %s5179_s16, 4  ;;  %s86_s20 = sshll.u32 %s7084_s10, 4  ;;  %s59_s17 = int_to_ptr.vmem [resolvable:$true] %s58_s17  ;;  %s87_s20 = int_to_ptr.hbm [resolvable:$true] %s86_s20 }
   0xd   :  { %64 = dma.hbm_to_vmem [thread:$0]  %s57_s14, 1024, %s59_s17, [#allocation6], %s5175_s25, %s5175_s25, %s5176_s26  }
   0xe   :  { %s5180_s3 = smov [#allocation10]   ;;  %s5181_s22 = smov 256  }
   0xf   :  { %s88_s21 = sshll.u32 %s5180_s3, 4  ;;  %s5182_s6 = smov 16   ;;  %s89_s21 = int_to_ptr.vmem [resolvable:$true] %s88_s21 }
  0x10   :  { %94 = dma.hbm_to_vmem [thread:$0]  %s87_s20, 1024, %s89_s21, [#allocation9], %s5181_s22, %s5181_s22, %s5182_s6  }
  0x11   :  { %5166 = dma.done.wait [#allocation3], 128  }
  0x12   :  { %5167 = vsyncadd [#allocation3], 4294967168 }
  0x13   :  { %5168 = dma.done.wait [#allocation6], 2048  }
  0x14   :  { %5169 = vsyncadd [#allocation6], 4294965248 }
  0x15   :  { %5170 = dma.done.wait [#allocation9], 1536  }
  0x16   :  { %5171 = vsyncadd [#allocation9], 4294965760  ;;  %v5277_v0 = vld [vmem:[%s7074_s0] sm:$0xff]  ;;  %vm140_vm0 = vcmask 261120   ;;  %v5282_v1 = vld [vmem:[%s7074_s0 + $0x8] sm:$0xff]  ;;  %v5183_v12 = vmov 32.0  }
  0x17   :  { %v5287_v2 = vld [vmem:[%s7074_s0 + $0x10] sm:$0xff]  ;;  %v136_v3 = vmul.f32 %v5277_v0, %v5277_v0  ;;  %v5296_v5 = vld [vmem:[%s7074_s0 + $0x18] sm:$0xff]  ;;  %v137_v8 = vmul.f32 %v5282_v1, %v5282_v1  ;;  %4800 = vrcp.f32 %v5183_v12  ;;  %v222_v21 = vld [vmem:[%s7082_s8 + $0x8] sm:$0xff]  ;;  %s5184_s12 = smov 96   ;;  %s5185_s20 = smov 64   ;;  %vm288_vm14 = vcmask 130048  }
  0x18   :  { %v138_v4 = vmul.f32 %v5287_v2, %v5287_v2  ;;  %v139_v9 = vmul.f32 %v5296_v5, %v5296_v5  ;;  %v224_v16 = vld [vmem:[%s7082_s8 + $0x18] sm:$0xff]  ;;  %v223_v18 = vld [vmem:[%s7082_s8 + $0x10] sm:$0xff]  ;;  %v218_v22 = vld [vmem:[%s7078_s4 + $0x8] sm:$0xff]  ;;  %vm363_vm15 = vcmask 523264   ;;  %s5186_s19 = smov 104   ;;  %s5187_s3 = smov 112  }
  0x19   :  { %v141_v6 = vsel %vm140_vm0, %v136_v3, 0.0  ;;  %v144_v10 = vsel %vm140_vm0, %v137_v8, 0.0  ;;  %v220_v17 = vld [vmem:[%s7078_s4 + $0x18] sm:$0xff]  ;;  %249 = vmatpush.msra.mxu0 %v224_v16  ;;  %v219_v19 = vld [vmem:[%s7078_s4 + $0x10] sm:$0xff]  ;;  %v221_v23 = vld [vmem:[%s7082_s8] sm:$0xff]  ;;  %s5188_s21 = smov 120  }
  0x1a   :  { %v147_v7 = vsel %vm140_vm0, %v138_v4, 0.0  ;;  %142 = vadd.xlane.f32.xlu0 %v141_v6  ;;  %v150_v11 = vsel %vm140_vm0, %v139_v9, 0.0  ;;  %342 = vmatpush.msra.mxu2 %v220_v17  ;;  %v217_v24 = vld [vmem:[%s7078_s4] sm:$0xff]  ;;  %v5339_v48 = vld [vmem:[%s7075_s1 + $0x28] sm:$0xff]  ;;  %v5349_v50 = vld [vmem:[%s7075_s1 + $0x38] sm:$0xff]  ;;  %s5191_s10 = smov 24  }
  0x1b   :  { %148 = vadd.xlane.f32.xlu1 %v147_v7  ;;  %250 = vmatpush.msra.mxu0 %v223_v18  ;;  %v5344_v49 = vld [vmem:[%s7075_s1 + $0x8] sm:$0xff]  ;;  %v287_v55 = vld [vmem:[#allocation8 + $0x8] sm:$0xff]  ;;  %v4795_v57 = vld [vmem:[#allocation2] ss:$0 sm:$0xff] }
  0x1c   :  { %343 = vmatpush.msra.mxu2 %v219_v19  ;;  %270 = vrot.lane.b32.xlu2 %v5344_v49, %s5184_s12  ;;  %v5361_v4 = vld [vmem:[%s7075_s1 + $0x18] sm:$0xff]  ;;  %v286_v19 = vld [vmem:[#allocation8] sm:$0xff] }
  0x1d   :  { %v4801_v13 = vpop.eup %4800  ;;  %251 = vmatpush.msra.mxu0 %v222_v21  ;;  %315 = vmatpush.msra.mxu1 %v287_v55  ;;  %v134_v21 = vld [vmem:[%s7076_s2 + $0x38] sm:$0xff] }
  0x1e   :  { %v154_v14 = vmul.f32 32.0, %v4801_v13  ;;  %344 = vmatpush.msra.mxu2 %v218_v22  ;;  %vm158_vm1 = vweird.f32 %v4801_v13  ;;  %384 = vmatpush.msra.mxu3 %v134_v21 }
  0x1f   :  { %252 = vmatpush.msra.mxu0 %v221_v23  ;;  %316 = vmatpush.msra.mxu1 %v286_v19  ;;  %v132_v23 = vld [vmem:[%s7076_s2 + $0x28] sm:$0xff] }
  0x20   :  { %v155_v15 = vsub.f32 1.0, %v154_v14  ;;  %345 = vmatpush.msra.mxu2 %v217_v24  ;;  %v5397_v24 = vld [vmem:[%s7075_s1 + $0x30] sm:$0xff] }
  0x22   :  { %145 = vadd.xlane.f32.xlu0 %v144_v10  ;;  %v156_v20 = vmul.f32 %v4801_v13, %v155_v15 }
  0x23   :  { %151 = vadd.xlane.f32.xlu1 %v150_v11 }
  0x24   :  { %v157_v25 = vadd.f32 %v4801_v13, %v156_v20  ;;  %272 = vrot.lane.b32.xlu2 %v5361_v4, %s5184_s12 }
  0x26   :  { %v5330_v26 = vsel %vm158_vm1, %v4801_v13, %v157_v25  ;;  %vm657_vm1 = vcmask 64512  }
  0x36   :  { %274 = vrot.lane.b32.xlu0 %v5339_v48, %s5184_s12 }
  0x3c   :  { %276 = vrot.lane.b32.xlu1 %v5349_v50, %s5184_s12 }
  0x3e   :  { %415 = vrot.lane.b32.xlu0 %v5397_v24, %s5185_s20 }
  0x76   :  { %v5376_v20 = vpop.permute.xlu2 %270 }
  0x8d   :  { %v143_v27 = vpop.xlane.xlu0 %142 }
  0x8e   :  { %v149_v28 = vpop.xlane.xlu1 %148  ;;  %v160_v29 = vmul.f32 %v5330_v26, %v143_v27  ;;  %v131_v27 = vld [vmem:[%s7076_s2 + $0x20] sm:$0xff] }
  0x8f   :  { %v162_v30 = vmul.f32 %v5330_v26, %v149_v28  ;;  %v5409_v28 = vld [vmem:[%s7075_s1 + $0x10] sm:$0xff] }
  0x90   :  { %v164_v31 = vadd.f32 1e-05, %v160_v29  ;;  %v130_v29 = vld [vmem:[%s7076_s2 + $0x18] sm:$0xff] }
  0x91   :  { %v166_v32 = vadd.f32 1e-05, %v162_v30  ;;  %v5414_v30 = vpop.permute.xlu2 %272 }
  0x92   :  { %4802 = vrsqrt.f32 %v164_v31  ;;  %vm174_vm3 = vweird.f32 %v164_v31 }
  0x93   :  { %4804 = vrsqrt.f32 %v166_v32  ;;  %vm194_vm5 = vweird.f32 %v166_v32 }
  0x95   :  { %v146_v33 = vpop.xlane.xlu0 %145 }
  0x96   :  { %v152_v34 = vpop.xlane.xlu1 %151  ;;  %v161_v35 = vmul.f32 %v5330_v26, %v146_v33 }
  0x97   :  { %v163_v36 = vmul.f32 %v5330_v26, %v152_v34 }
  0x98   :  { %v4803_v37 = vpop.eup %4802  ;;  %v165_v38 = vadd.f32 1e-05, %v161_v35 }
  0x99   :  { %v167_v39 = vadd.f32 1e-05, %v163_v36  ;;  %v4805_v40 = vpop.eup %4804  ;;  %v169_v41 = vmul.f32 %v4803_v37, %v164_v31  ;;  %vm175_vm2 = vweird.f32 %v4803_v37  ;;  %v129_v31 = vld [vmem:[%s7076_s2 + $0x10] sm:$0xff] }
  0x9a   :  { %4806 = vrsqrt.f32 %v165_v38  ;;  %v189_v42 = vmul.f32 %v4805_v40, %v166_v32  ;;  %vm176_vm4 = vmor %vm174_vm3, %vm175_vm2  ;;  %vm195_vm6 = vweird.f32 %v4805_v40  ;;  %vm184_vm7 = vweird.f32 %v165_v38 }
  0x9b   :  { %v170_v43 = vmul.f32 %v4803_v37, %v169_v41  ;;  %4808 = vrsqrt.f32 %v167_v39  ;;  %vm196_vm9 = vmor %vm194_vm5, %vm195_vm6  ;;  %vm204_vm11 = vweird.f32 %v167_v39  ;;  %v127_v41 = vld [vmem:[%s7076_s2] sm:$0xff]  ;;  %vm1427_vm2 = vcmask 1047556  }
  0x9c   :  { %v190_v45 = vmul.f32 %v4805_v40, %v189_v42  ;;  %v5440_v42 = vld [vmem:[%s7075_s1 + $0x20] sm:$0xff]  ;;  %vm1923_vm3 = vcmask 195584  }
  0x9d   :  { %v171_v44 = vmul.f32 0.5, %v170_v43 }
  0x9e   :  { %v191_v53 = vmul.f32 0.5, %v190_v45 }
  0x9f   :  { %v172_v46 = vsub.f32 1.5, %v171_v44 }
  0xa0   :  { %v4807_v47 = vpop.eup %4806  ;;  %v192_v62 = vsub.f32 1.5, %v191_v53 }
  0xa1   :  { %v4809_v51 = vpop.eup %4808  ;;  %v179_v52 = vmul.f32 %v4807_v47, %v165_v38  ;;  %v173_v54 = vmul.f32 %v4803_v37, %v172_v46  ;;  %vm185_vm8 = vweird.f32 %v4807_v47 }
  0xa2   :  { %v199_v56 = vmul.f32 %v4809_v51, %v167_v39  ;;  %v193_v8 = vmul.f32 %v4805_v40, %v192_v62  ;;  %vm186_vm10 = vmor %vm184_vm7, %vm185_vm8  ;;  %vm205_vm12 = vweird.f32 %v4809_v51 }
  0xa3   :  { %v180_v58 = vmul.f32 %v4807_v47, %v179_v52  ;;  %v177_v59 = vsel %vm176_vm4, %v4803_v37, %v173_v54  ;;  %vm206_vm13 = vmor %vm204_vm11, %vm205_vm12 }
  0xa4   :  { %v208_v60 = vmul.f32 %v177_v59, %v5277_v0  ;;  %v200_v63 = vmul.f32 %v4809_v51, %v199_v56  ;;  %v197_v12 = vsel %vm196_vm9, %v4805_v40, %v193_v8  ;;  %v128_v40 = vld [vmem:[%s7076_s2 + $0x8] sm:$0xff] }
  0xa5   :  { %v181_v61 = vmul.f32 0.5, %v180_v58  ;;  %v210_v14 = vmul.f32 %v197_v12, %v5287_v2  ;;  %v5381_v2 = vld [vmem:[%s7075_s1] sm:$0xff] }
  0xa6   :  { %v213_v3 = vmul.f32 %v4795_v57, %v208_v60  ;;  %v201_v0 = vmul.f32 0.5, %v200_v63  ;;  %409 = vrot.lane.b32.xlu2 %v5381_v2, %s5185_s20 }
  0xa7   :  { %v182_v6 = vsub.f32 1.5, %v181_v61  ;;  %v215_v16 = vmul.f32 %v4795_v57, %v210_v14 }
  0xa8   :  { %4487 = vmatmul.msk.f32.vlgmr.msra.gmra.mxu0 %vm140_vm0, %v213_v3  ;;  %4495 = vmatmul.msk.f32.vlgmr.msra.gmra.mxu2 %vm140_vm0, %v213_v3  ;;  %v202_v11 = vsub.f32 1.5, %v201_v0  ;;  %v5423_v34 = vpop.permute.xlu0 %274 }
  0xa9   :  { %v183_v7 = vmul.f32 %v4807_v47, %v182_v6 }
  0xaa   :  { %v203_v15 = vmul.f32 %v4809_v51, %v202_v11 }
  0xab   :  { %v187_v9 = vsel %vm186_vm10, %v4807_v47, %v183_v7 }
  0xac   :  { %v209_v10 = vmul.f32 %v187_v9, %v5282_v1  ;;  %v207_v17 = vsel %vm206_vm13, %v4809_v51, %v203_v15 }
  0xad   :  { %v211_v1 = vmul.f32 %v207_v17, %v5296_v5  ;;  %v133_v5 = vld [vmem:[%s7076_s2 + $0x30] sm:$0xff] }
  0xae   :  { %v214_v13 = vmul.f32 %v4795_v57, %v209_v10  ;;  %385 = vmatpush.msra.mxu3 %v133_v5  ;;  %411 = vrot.lane.b32.xlu2 %v5409_v28, %s5185_s20  ;;  %v5427_v37 = vpop.permute.xlu1 %276 }
  0xaf   :  { %v216_v18 = vmul.f32 %v4795_v57, %v211_v1 }
  0xb0   :  { %4488 = vmatmul.msk.f32.gmra.mxu0 %vm140_vm0, %v214_v13  ;;  %4496 = vmatmul.msk.f32.gmra.mxu2 %vm140_vm0, %v214_v13  ;;  %v5486_v62 = vpop.permute.xlu0 %415 }
  0xb1   :  { %386 = vmatpush.msra.mxu3 %v132_v23 }
  0xb3   :  { %387 = vmatpush.msra.mxu3 %v131_v27 }
  0xb5   :  { %388 = vmatpush.msra.mxu3 %v130_v29 }
  0xb6   :  { %413 = vrot.lane.b32.xlu2 %v5440_v42, %s5185_s20 }
  0xb7   :  { %389 = vmatpush.msra.mxu3 %v129_v31 }
  0xb8   :  { %4489 = vmatmul.msk.f32.gmra.mxu0 %vm140_vm0, %v215_v16  ;;  %4497 = vmatmul.msk.f32.gmra.mxu2 %vm140_vm0, %v215_v16 }
  0xb9   :  { %390 = vmatpush.msra.mxu3 %v128_v40 }
  0xbb   :  { %391 = vmatpush.msra.mxu3 %v127_v41 }
  0xc0   :  { %4490 = vmatmul.msk.f32.gmra.mxu0 %vm140_vm0, %v216_v18  ;;  %4498 = vmatmul.msk.f32.gmra.mxu2 %vm140_vm0, %v216_v18 }
 0x100   :  { %v5479_v58 = vpop.permute.xlu2 %409 }
 0x108   :  { %v5481_v59 = vpop.permute.xlu2 %411 }
 0x110   :  { %v5483_v60 = vpop.permute.xlu2 %413 }
 0x125   :  { %v254_v22 = vpop.f32.mrf.mxu0 }
 0x126   :  { %v282_v25 = vmul.f32 %v5376_v20, %v254_v22 }
 0x128   :  { %4491 = vmatmul.msk.f32.vlgmr.msra.gmra.mxu1 %vm288_vm14, %v282_v25 }
 0x12b   :  { %v347_v43 = vpop.f32.mrf.mxu2 }
 0x12d   :  { %v257_v32 = vpop.f32.mrf.mxu0 }
 0x12e   :  { %v283_v33 = vmul.f32 %v5414_v30, %v257_v32 }
 0x130   :  { %4492 = vmatmul.msk.f32.gmra.mxu1 %vm288_vm14, %v283_v33 }
 0x133   :  { %v350_v46 = vpop.f32.mrf.mxu2 }
 0x135   :  { %v260_v35 = vpop.f32.mrf.mxu0 }
 0x136   :  { %v284_v36 = vmul.f32 %v5423_v34, %v260_v35 }
 0x138   :  { %4493 = vmatmul.msk.f32.gmra.mxu1 %vm288_vm14, %v284_v36 }
 0x13b   :  { %v353_v52 = vpop.f32.mrf.mxu2 }
 0x13d   :  { %v263_v38 = vpop.f32.mrf.mxu0 }
 0x13e   :  { %v285_v39 = vmul.f32 %v5427_v37, %v263_v38 }
 0x140   :  { %4494 = vmatmul.msk.f32.gmra.mxu1 %vm288_vm14, %v285_v39 }
 0x143   :  { %v356_v55 = vpop.f32.mrf.mxu2 }
 0x1a5   :  { %v318_v44 = vpop.f32.mrf.mxu1 }
 0x1a6   :  { %v348_v45 = vadd.f32 %v347_v43, %v318_v44 }
 0x1a8   :  { %473 = vrot.lane.b32.xlu0 %v348_v45, %s5186_s19  ;;  %465 = vrot.lane.b32.xlu1 %v348_v45, %s5187_s3  ;;  %v359_v8 = vmul.f32 %v348_v45, %v5381_v2 }
 0x1a9   :  { %4499 = vmatmul.msk.f32.vlgmr.msra.gmra.mxu3 %vm363_vm15, %v348_v45 }
 0x1ad   :  { %v321_v47 = vpop.f32.mrf.mxu1 }
 0x1ae   :  { %v5447_v51 = vadd.f32 %v350_v46, %v321_v47 }
 0x1b0   :  { %457 = vrot.lane.b32.xlu0 %v348_v45, %s5188_s21  ;;  %982 = vrot.lane.b32.xlu1 %v348_v45, %s5185_s20  ;;  %v360_v14 = vmul.f32 %v5447_v51, %v5409_v28 }
 0x1b1   :  { %475 = vrot.lane.b32.xlu2 %v5447_v51, %s5186_s19  ;;  %4500 = vmatmul.msk.f32.gmra.mxu3 %vm363_vm15, %v5447_v51 }
 0x1b5   :  { %v324_v53 = vpop.f32.mrf.mxu1 }
 0x1b6   :  { %v5455_v54 = vadd.f32 %v353_v52, %v324_v53 }
 0x1b8   :  { %467 = vrot.lane.b32.xlu1 %v5447_v51, %s5187_s3  ;;  %461 = vrot.lane.b32.xlu0 %v5455_v54, %s5188_s21  ;;  %v361_v1 = vmul.f32 %v5455_v54, %v5440_v42 }
 0x1b9   :  { %477 = vrot.lane.b32.xlu2 %v5455_v54, %s5186_s19  ;;  %4501 = vmatmul.msk.f32.gmra.mxu3 %vm363_vm15, %v5455_v54 }
 0x1bd   :  { %v327_v56 = vpop.f32.mrf.mxu1 }
 0x1be   :  { %v5465_v57 = vadd.f32 %v356_v55, %v327_v56 }
 0x1c0   :  { %459 = vrot.lane.b32.xlu1 %v5447_v51, %s5188_s21  ;;  %479 = vrot.lane.b32.xlu0 %v5465_v57, %s5186_s19  ;;  %v362_v22 = vmul.f32 %v5465_v57, %v5397_v24 }
 0x1c1   :  { %471 = vrot.lane.b32.xlu2 %v5465_v57, %s5187_s3  ;;  %4502 = vmatmul.msk.f32.gmra.mxu3 %vm363_vm15, %v5465_v57 }
 0x1c8   :  { %469 = vrot.lane.b32.xlu1 %v5455_v54, %s5187_s3 }
 0x1c9   :  { %463 = vrot.lane.b32.xlu2 %v5465_v57, %s5188_s21 }
 0x20b   :  { %v476_v61 = vpop.permute.xlu2 %475 }
 0x20c   :  { %1008 = vrot.lane.b32.xlu0 %v476_v61, %s5185_s20 }
 0x213   :  { %v478_v5 = vpop.permute.xlu2 %477 }
 0x21a   :  { %v466_v63 = vpop.permute.xlu1 %465  ;;  %v474_v3 = vpop.permute.xlu0 %473 }
 0x21b   :  { %998 = vrot.lane.b32.xlu1 %v466_v63, %s5185_s20  ;;  %1006 = vrot.lane.b32.xlu2 %v474_v3, %s5185_s20  ;;  %v472_v25 = vpop.permute.xlu2 %471 }
 0x222   :  { %v5490_v6 = vpop.permute.xlu1 %982  ;;  %v458_v24 = vpop.permute.xlu0 %457 }
 0x223   :  { %v5545_v29 = vpop.permute.xlu2 %463 }
 0x22a   :  { %v468_v0 = vpop.permute.xlu1 %467  ;;  %v462_v27 = vpop.permute.xlu0 %461 }
 0x22b   :  { %1000 = vrot.lane.b32.xlu2 %v468_v0, %s5185_s20 }
 0x22c   :  { %v393_v7 = vpop.f32.mrf.mxu3 }
 0x22d   :  { %v421_v9 = vmul.f32 %v5479_v58, %v393_v7 }
 0x22f   :  { %v5495_v10 = vadd.f32 %v421_v9, %v359_v8 }
 0x231   :  { %449 = vrot.lane.b32.xlu1 %v5495_v10, %s5186_s19 }
 0x232   :  { %v5499_v11 = vpop.permute.xlu1 %459  ;;  %v480_v28 = vpop.permute.xlu0 %479 }
 0x233   :  { %441 = vrot.lane.b32.xlu2 %v5495_v10, %s5187_s3 }
 0x234   :  { %v396_v12 = vpop.f32.mrf.mxu3 }
 0x235   :  { %v422_v13 = vmul.f32 %v5481_v59, %v396_v12 }
 0x237   :  { %v5506_v15 = vadd.f32 %v422_v13, %v360_v14 }
 0x23a   :  { %v470_v16 = vpop.permute.xlu1 %469 }
 0x23b   :  { %1002 = vrot.lane.b32.xlu0 %v470_v16, %s5185_s20  ;;  %451 = vrot.lane.b32.xlu2 %v5506_v15, %s5186_s19 }
 0x23c   :  { %v399_v17 = vpop.f32.mrf.mxu3 }
 0x23d   :  { %v423_v18 = vmul.f32 %v5483_v60, %v399_v17 }
 0x23f   :  { %v5514_v19 = vadd.f32 %v423_v18, %v361_v1 }
 0x241   :  { %445 = vrot.lane.b32.xlu1 %v5514_v19, %s5187_s3 }
 0x243   :  { %433 = vrot.lane.b32.xlu0 %v5495_v10, %s5188_s21  ;;  %435 = vrot.lane.b32.xlu2 %v5506_v15, %s5188_s21 }
 0x244   :  { %v402_v2 = vpop.f32.mrf.mxu3 }
 0x245   :  { %v424_v21 = vmul.f32 %v5486_v62, %v402_v2 }
 0x247   :  { %v5525_v23 = vadd.f32 %v424_v21, %v362_v22 }
 0x249   :  { %437 = vrot.lane.b32.xlu1 %v5514_v19, %s5188_s21 }
 0x24b   :  { %443 = vrot.lane.b32.xlu0 %v5506_v15, %s5187_s3  ;;  %447 = vrot.lane.b32.xlu2 %v5525_v23, %s5187_s3 }
 0x251   :  { %1004 = vrot.lane.b32.xlu1 %v472_v25, %s5185_s20 }
 0x253   :  { %453 = vrot.lane.b32.xlu0 %v5514_v19, %s5186_s19  ;;  %1010 = vrot.lane.b32.xlu2 %v478_v5, %s5185_s20 }
 0x259   :  { %455 = vrot.lane.b32.xlu1 %v5525_v23, %s5186_s19 }
 0x25b   :  { %990 = vrot.lane.b32.xlu0 %v458_v24, %s5185_s20 }
 0x263   :  { %984 = vrot.lane.b32.xlu0 %v5447_v51, %s5185_s20 }
 0x26b   :  { %1012 = vrot.lane.b32.xlu0 %v480_v28, %s5185_s20 }
 0x273   :  { %439 = vrot.lane.b32.xlu0 %v5525_v23, %s5188_s21 }
 0x275   :  { %v5547_v31 = vpop.permute.xlu2 %1006 }
 0x27e   :  { %v5560_v42 = vpop.permute.xlu0 %1008 }
 0x285   :  { %v5549_v32 = vpop.permute.xlu2 %1000 }
 0x28d   :  { %v442_v33 = vpop.permute.xlu2 %441  ;;  %v5553_v36 = vpop.permute.xlu1 %998 }
 0x295   :  { %v5551_v35 = vpop.permute.xlu2 %451 }
 0x29d   :  { %v5555_v38 = vpop.permute.xlu2 %435 }
 0x29e   :  { %v4678_v39 = vpack.i.bf16 %v5555_v38, %v5506_v15 }
 0x2a0   :  { %4679 = vrot.lane.b32.xlu0 %v4678_v39, %s5184_s12 }
 0x2a3   :  { %v450_v40 = vpop.permute.xlu1 %449 }
 0x2a4   :  { %v4663_v41 = vpack.i.bf16 %v450_v40, %v442_v33 }
 0x2a5   :  { %v448_v63 = vpop.permute.xlu2 %447 }
 0x2a6   :  { %4664 = vrot.lane.b32.xlu2 %v4663_v41, %s5184_s12 }
 0x2ad   :  { %v5563_v43 = vpop.permute.xlu0 %1002  ;;  %v5586_v14 = vpop.permute.xlu2 %1010 }
 0x2b3   :  { %v446_v44 = vpop.permute.xlu1 %445 }
 0x2b5   :  { %v434_v45 = vpop.permute.xlu0 %433 }
 0x2b6   :  { %v4668_v46 = vpack.i.bf16 %v434_v45, %v5495_v10 }
 0x2b8   :  { %4669 = vrot.lane.b32.xlu1 %v4668_v46, %s5184_s12 }
 0x2bb   :  { %v5567_v47 = vpop.permute.xlu1 %437 }
 0x2bc   :  { %v4688_v51 = vpack.i.bf16 %v5567_v47, %v5514_v19 }
 0x2bd   :  { %v444_v52 = vpop.permute.xlu0 %443 }
 0x2be   :  { %4689 = vrot.lane.b32.xlu2 %v4688_v51, %s5184_s12  ;;  %v4673_v53 = vpack.i.bf16 %v5551_v35, %v444_v52 }
 0x2c0   :  { %4674 = vrot.lane.b32.xlu1 %v4673_v53, %s5184_s12 }
 0x2c3   :  { %v5574_v55 = vpop.permute.xlu1 %1004 }
 0x2c5   :  { %v454_v56 = vpop.permute.xlu0 %453 }
 0x2c6   :  { %v4683_v61 = vpack.i.bf16 %v454_v56, %v446_v44 }
 0x2c8   :  { %4684 = vrot.lane.b32.xlu0 %v4683_v61, %s5184_s12 }
 0x2cb   :  { %v456_v3 = vpop.permute.xlu1 %455 }
 0x2cc   :  { %v4693_v0 = vpack.i.bf16 %v456_v3, %v448_v63 }
 0x2cd   :  { %v5577_v7 = vpop.permute.xlu0 %990 }
 0x2ce   :  { %4694 = vrot.lane.b32.xlu2 %v4693_v0, %s5184_s12 }
 0x2d5   :  { %v5580_v8 = vpop.permute.xlu0 %984 }
 0x2dd   :  { %v5582_v9 = vpop.permute.xlu0 %1012 }
 0x2e5   :  { %v440_v12 = vpop.permute.xlu0 %439 }
 0x2e6   :  { %v4698_v13 = vpack.i.bf16 %v440_v12, %v5525_v23 }
 0x2e8   :  { %4699 = vrot.lane.b32.xlu1 %v4698_v13, %s5184_s12 }
 0x300   :  { %v4665_v16 = vpop.permute.xlu2 %4664 }
 0x301   :  { %4704 = vxpose.xlu0.b32.start [1/4] (short) (narrow) %v4665_v16, 8 }
 0x312   :  { %v4680_v1 = vpop.permute.xlu0 %4679 }
 0x318   :  { %v4690_v2 = vpop.permute.xlu2 %4689 }
 0x328   :  { %v4695_v5 = vpop.permute.xlu2 %4694 }
 0x32a   :  { %v4670_v17 = vpop.permute.xlu1 %4669 }
 0x32b   :  { %4717 = vxpose.xlu2.b32.start [1/4] (short) (narrow) %v4670_v17, 8 }
 0x332   :  { %v4675_v18 = vpop.permute.xlu1 %4674 }
 0x333   :  { %4706 = vxpose.xlu0.b32.cont [2/4] (short) (narrow) %v4675_v18, 8  ;;  %4719 = vxpose.xlu2.b32.cont [2/4] (short) (narrow) %v4680_v1, 8 }
 0x33a   :  { %v4685_v21 = vpop.permute.xlu0 %4684 }
 0x33b   :  { %4708 = vxpose.xlu0.b32.cont [3/4] (short) (narrow) %v4685_v21, 8  ;;  %4721 = vxpose.xlu2.b32.cont [3/4] (short) (narrow) %v4690_v2, 8 }
 0x343   :  { %4710 = vxpose.xlu0.b32.end [4/4] (short) (narrow) %v4695_v5, 8 }
 0x35a   :  { %v4700_v22 = vpop.permute.xlu1 %4699 }
 0x35b   :  { %4723 = vxpose.xlu2.b32.end [4/4] (short) (narrow) %v4700_v22, 8 }
 0x3b1   :  { %994 = vrot.lane.b32.xlu0 %v462_v27, %s5185_s20 }
 0x3c4   :  { %986 = vrot.lane.b32.xlu2 %v5455_v54, %s5185_s20 }
 0x3cc   :  { %988 = vrot.lane.b32.xlu2 %v5465_v57, %s5185_s20 }
 0x3cf   :  { %v4711_v25 = vpop.trf.xlu0 }
 0x3d0   :  { %v4712_v24 = vunpack.i.l.bf16 %v4711_v25  ;;  %v4715_v28 = vunpack.i.h.bf16 %v4711_v25 }
 0x3d2   :  { %755 = vmatpush.msrb.mxu2 %v4712_v24  ;;  %792 = vmatpush.msrb.mxu3 %v4715_v28 }
 0x3d3   :  { %4511 = vmatmul.msk.f32.vlgmr.msrb.gmra.mxu2 %vm657_vm1, %v442_v33  ;;  %4515 = vmatmul.msk.f32.vlgmr.msrb.gmra.mxu3 %vm657_vm1, %v450_v40 }
 0x3db   :  { %4512 = vmatmul.msk.f32.gmra.mxu2 %vm657_vm1, %v444_v52  ;;  %4516 = vmatmul.msk.f32.gmra.mxu3 %vm657_vm1, %v5551_v35 }
 0x3dc   :  { %v4724_v27 = vpop.trf.xlu2 }
 0x3dd   :  { %v4725_v54 = vunpack.i.l.bf16 %v4724_v27  ;;  %v4728_v39 = vunpack.i.h.bf16 %v4724_v27 }
 0x3df   :  { %681 = vmatpush.msrb.mxu1 %v4725_v54  ;;  %718 = vmatpush.msrb.mxu0 %v4728_v39 }
 0x3e0   :  { %4503 = vmatmul.msk.f32.vlgmr.msrb.gmra.mxu1 %vm657_vm1, %v5495_v10  ;;  %4507 = vmatmul.msk.f32.vlgmr.msrb.gmra.mxu0 %vm657_vm1, %v434_v45 }
 0x3e3   :  { %4513 = vmatmul.msk.f32.gmra.mxu2 %vm657_vm1, %v446_v44  ;;  %4517 = vmatmul.msk.f32.gmra.mxu3 %vm657_vm1, %v454_v56 }
 0x3e8   :  { %4504 = vmatmul.msk.f32.gmra.mxu1 %vm657_vm1, %v5506_v15  ;;  %4508 = vmatmul.msk.f32.gmra.mxu0 %vm657_vm1, %v5555_v38 }
 0x3eb   :  { %4514 = vmatmul.msk.f32.gmra.mxu2 %vm657_vm1, %v448_v63  ;;  %4518 = vmatmul.msk.f32.gmra.mxu3 %vm657_vm1, %v456_v3 }
 0x3f0   :  { %4505 = vmatmul.msk.f32.gmra.mxu1 %vm657_vm1, %v5514_v19  ;;  %4509 = vmatmul.msk.f32.gmra.mxu0 %vm657_vm1, %v5567_v47 }
 0x3f8   :  { %4506 = vmatmul.msk.f32.gmra.mxu1 %vm657_vm1, %v5525_v23  ;;  %4510 = vmatmul.msk.f32.gmra.mxu0 %vm657_vm1, %v440_v12 }
 0x456   :  { %v794_v57 = vpop.f32.mrf.mxu3  ;;  %v757_v44 = vpop.f32.mrf.mxu2 }
 0x457   :  { %v758_v18 = vadd.f32 %v757_v44, %v5344_v49  ;;  %v795_v21 = vadd.f32 %v794_v57, %v5344_v49 }
 0x459   :  { %v830_v2 = vsel %vm140_vm0, %v758_v18, -inf  ;;  %v842_v5 = vsel %vm140_vm0, %v795_v21, -inf }
 0x45d   :  { %v683_v10 = vpop.f32.mrf.mxu1  ;;  %v720_v15 = vpop.f32.mrf.mxu0 }
 0x45e   :  { %v5617_v33 = vadd.f32 %v683_v10, %v5344_v49  ;;  %v797_v35 = vpop.f32.mrf.mxu3  ;;  %v721_v51 = vadd.f32 %v720_v15, %v5344_v49  ;;  %v760_v0 = vpop.f32.mrf.mxu2 }
 0x45f   :  { %v761_v12 = vadd.f32 %v760_v0, %v5361_v4  ;;  %v5654_v22 = vadd.f32 %v797_v35, %v5361_v4 }
 0x460   :  { %v806_v38 = vsel %vm140_vm0, %v5617_v33, -inf  ;;  %v818_v63 = vsel %vm140_vm0, %v721_v51, -inf }
 0x461   :  { %807 = vmax.xlane.f32.xlu1 %v806_v38  ;;  %v833_v17 = vsel %vm140_vm0, %v761_v12, -inf  ;;  %v845_v25 = vsel %vm140_vm0, %v5654_v22, -inf }
 0x465   :  { %v686_v19 = vpop.f32.mrf.mxu1  ;;  %v723_v40 = vpop.f32.mrf.mxu0 }
 0x466   :  { %v5622_v41 = vadd.f32 %v686_v19, %v5361_v4  ;;  %v5625_v23 = vadd.f32 %v723_v40, %v5361_v4  ;;  %v800_v47 = vpop.f32.mrf.mxu3  ;;  %v763_v54 = vpop.f32.mrf.mxu2 }
 0x467   :  { %v5633_v52 = vadd.f32 %v800_v47, %v5339_v48  ;;  %v5661_v49 = vadd.f32 %v763_v54, %v5339_v48  ;;  %v5665_v4 = vpop.permute.xlu2 %986  ;;  %v5686_v47 = vpop.permute.xlu0 %994 }
 0x468   :  { %v821_v45 = vsel %vm140_vm0, %v5625_v23, -inf  ;;  %v809_v46 = vsel %vm140_vm0, %v5622_v41, -inf }
 0x469   :  { %822 = vmax.xlane.f32.xlu0 %v821_v45  ;;  %810 = vmax.xlane.f32.xlu2 %v809_v46  ;;  %v848_v61 = vsel %vm140_vm0, %v5633_v52, -inf }
 0x46d   :  { %v689_v53 = vpop.f32.mrf.mxu1  ;;  %v726_v24 = vpop.f32.mrf.mxu0 }
 0x46e   :  { %v690_v56 = vadd.f32 %v689_v53, %v5339_v48  ;;  %v727_v28 = vadd.f32 %v726_v24, %v5339_v48 }
 0x46f   :  { %v5667_v39 = vpop.permute.xlu2 %988 }
 0x470   :  { %v812_v3 = vsel %vm140_vm0, %v690_v56, -inf  ;;  %v824_v27 = vsel %vm140_vm0, %v727_v28, -inf }
 0x471   :  { %849 = vmax.xlane.f32.xlu0 %v848_v61  ;;  %819 = vmax.xlane.f32.xlu2 %v818_v63 }
 0x472   :  { %813 = vmax.xlane.f32.xlu1 %v812_v3 }
 0x475   :  { %v692_v13 = vpop.f32.mrf.mxu1 }
 0x476   :  { %v5642_v16 = vadd.f32 %v692_v13, %v5349_v50 }
 0x478   :  { %v815_v1 = vsel %vm140_vm0, %v5642_v16, -inf }
 0x479   :  { %834 = vmax.xlane.f32.xlu2 %v833_v17 }
 0x47a   :  { %816 = vmax.xlane.f32.xlu1 %v815_v1 }
 0x482   :  { %831 = vmax.xlane.f32.xlu1 %v830_v2 }
 0x485   :  { %996 = vrot.lane.b32.xlu0 %v5545_v29, %s5185_s20  ;;  %v836_v29 = vsel %vm140_vm0, %v5661_v49, -inf }
 0x48a   :  { %843 = vmax.xlane.f32.xlu1 %v842_v5 }
 0x492   :  { %846 = vmax.xlane.f32.xlu1 %v845_v25 }
 0x49a   :  { %825 = vmax.xlane.f32.xlu1 %v824_v27 }
 0x4a2   :  { %837 = vmax.xlane.f32.xlu1 %v836_v29 }
 0x4d4   :  { %v5672_v10 = vpop.xlane.xlu1 %807 }
 0x4dc   :  { %1094 = vxpose.xlu1.b32.start [1/4] (short) (narrow) %v5553_v36, 8  ;;  %v5670_v57 = vpop.xlane.xlu2 %810  ;;  %v823_v3 = vpop.xlane.xlu0 %822 }
 0x4dd   :  { %v859_v1 = vsub.f32 %v5625_v23, %v823_v3 }
 0x4e4   :  { %1095 = vxpose.xlu1.b32.cont [2/4] (short) (narrow) %v5549_v32, 8  ;;  %v820_v15 = vpop.xlane.xlu2 %819 }
 0x4e5   :  { %v858_v35 = vsub.f32 %v721_v51, %v820_v15  ;;  %v814_v48 = vpop.xlane.xlu1 %813 }
 0x4e6   :  { %v856_v38 = vsub.f32 %v690_v56, %v814_v48 }
 0x4e7   :  { %v878_v19 = vmul.f32 1.442695, %v858_v35 }
 0x4e8   :  { %v874_v40 = vmul.f32 1.442695, %v856_v38 }
 0x4e9   :  { %4810 = vpow2.f32 %v878_v19 }
 0x4ea   :  { %4812 = vpow2.f32 %v874_v40 }
 0x4ec   :  { %1096 = vxpose.xlu1.b32.cont [3/4] (short) (narrow) %v5563_v43, 8  ;;  %v835_v51 = vpop.xlane.xlu2 %834 }
 0x4ed   :  { %v5676_v44 = vpop.xlane.xlu1 %816  ;;  %v863_v56 = vsub.f32 %v761_v12, %v835_v51  ;;  %v854_v51 = vsub.f32 %v5617_v33, %v5672_v10 }
 0x4ee   :  { %v857_v3 = vsub.f32 %v5642_v16, %v5676_v44 }
 0x4ef   :  { %v5678_v45 = vpop.eup %4810  ;;  %v888_v63 = vmul.f32 1.442695, %v863_v56 }
 0x4f0   :  { %v5680_v36 = vpop.eup %4812  ;;  %v914_v46 = vsel %vm140_vm0, %v5678_v45, 0.0 }
 0x4f1   :  { %915 = vadd.xlane.f32.xlu0 %v914_v46  ;;  %v908_v32 = vsel %vm140_vm0, %v5680_v36, 0.0 }
 0x4f2   :  { %909 = vadd.xlane.f32.xlu2 %v908_v32 }
 0x4f4   :  { %1097 = vxpose.xlu1.b32.end [4/4] (short) (narrow) %v5574_v55, 8  ;;  %v880_v55 = vmul.f32 1.442695, %v859_v1  ;;  %v876_v1 = vmul.f32 1.442695, %v857_v3 }
 0x4f5   :  { %v832_v43 = vpop.xlane.xlu1 %831 }
 0x4f6   :  { %v862_v53 = vsub.f32 %v758_v18, %v832_v43  ;;  %v870_v43 = vmul.f32 1.442695, %v854_v51 }
 0x4f8   :  { %v886_v61 = vmul.f32 1.442695, %v862_v53 }
 0x4fa   :  { %4814 = vpow2.f32 %v886_v61 }
 0x4fb   :  { %4816 = vpow2.f32 %v888_v63  ;;  %v729_v63 = vpop.f32.mrf.mxu0 }
 0x4fd   :  { %v844_v0 = vpop.xlane.xlu1 %843 }
 0x4fe   :  { %v866_v13 = vsub.f32 %v795_v21, %v844_v0 }
 0x500   :  { %v5689_v17 = vpop.eup %4814  ;;  %v894_v2 = vmul.f32 1.442695, %v866_v13  ;;  %v803_v13 = vpop.f32.mrf.mxu3 }
 0x501   :  { %v926_v5 = vsel %vm140_vm0, %v5689_v17, 0.0  ;;  %v5694_v12 = vpop.eup %4816 }
 0x502   :  { %4818 = vpow2.f32 %v894_v2  ;;  %927 = vadd.xlane.f32.xlu0 %v926_v5  ;;  %v929_v21 = vsel %vm140_vm0, %v5694_v12, 0.0  ;;  %v804_v2 = vadd.f32 %v803_v13, %v5349_v50 }
 0x503   :  { %4820 = vpow2.f32 %v880_v55 }
 0x504   :  { %v851_v55 = vsel %vm140_vm0, %v804_v2, -inf }
 0x505   :  { %v847_v18 = vpop.xlane.xlu1 %846 }
 0x506   :  { %v867_v5 = vsub.f32 %v5654_v22, %v847_v18 }
 0x508   :  { %v5696_v25 = vpop.eup %4818 }
 0x509   :  { %v938_v23 = vsel %vm140_vm0, %v5696_v25, 0.0  ;;  %v5702_v27 = vpop.eup %4820 }
 0x50a   :  { %930 = vadd.xlane.f32.xlu0 %v929_v21  ;;  %939 = vadd.xlane.f32.xlu2 %v938_v23  ;;  %v917_v15 = vsel %vm140_vm0, %v5702_v27, 0.0  ;;  %v896_v21 = vmul.f32 1.442695, %v867_v5  ;;  %v850_v23 = vpop.xlane.xlu0 %849 }
 0x50d   :  { %v826_v24 = vpop.xlane.xlu1 %825 }
 0x50e   :  { %v860_v54 = vsub.f32 %v727_v28, %v826_v24 }
 0x510   :  { %v882_v29 = vmul.f32 1.442695, %v860_v54  ;;  %v868_v54 = vsub.f32 %v5633_v52, %v850_v23 }
 0x512   :  { %4822 = vpow2.f32 %v882_v29  ;;  %918 = vadd.xlane.f32.xlu2 %v917_v15  ;;  %v898_v44 = vmul.f32 1.442695, %v868_v54 }
 0x515   :  { %v838_v35 = vpop.xlane.xlu1 %837 }
 0x516   :  { %v864_v48 = vsub.f32 %v5661_v49, %v838_v35  ;;  %v855_v49 = vsub.f32 %v5622_v41, %v5670_v57  ;;  %v730_v41 = vadd.f32 %v729_v63, %v5349_v50  ;;  %v766_v57 = vpop.f32.mrf.mxu2 }
 0x517   :  { %v767_v10 = vadd.f32 %v766_v57, %v5349_v50 }
 0x518   :  { %v5707_v38 = vpop.eup %4822  ;;  %v890_v19 = vmul.f32 1.442695, %v864_v48  ;;  %v872_v32 = vmul.f32 1.442695, %v855_v49  ;;  %v827_v33 = vsel %vm140_vm0, %v730_v41, -inf }
 0x519   :  { %v920_v40 = vsel %vm140_vm0, %v5707_v38, 0.0  ;;  %v839_v0 = vsel %vm140_vm0, %v767_v10, -inf }
 0x51a   :  { %4824 = vpow2.f32 %v890_v19  ;;  %921 = vadd.xlane.f32.xlu2 %v920_v40 }
 0x51b   :  { %4826 = vpow2.f32 %v872_v32 }
 0x51c   :  { %4828 = vpow2.f32 %v870_v43 }
 0x51d   :  { %4830 = vpow2.f32 %v876_v1 }
 0x51e   :  { %4832 = vpow2.f32 %v896_v21 }
 0x51f   :  { %4834 = vpow2.f32 %v898_v44 }
 0x520   :  { %v5711_v46 = vpop.eup %4824 }
 0x521   :  { %v932_v28 = vsel %vm140_vm0, %v5711_v46, 0.0  ;;  %v5721_v53 = vpop.eup %4826 }
 0x522   :  { %933 = vadd.xlane.f32.xlu2 %v932_v28  ;;  %v905_v56 = vsel %vm140_vm0, %v5721_v53, 0.0  ;;  %v5725_v61 = vpop.eup %4828 }
 0x523   :  { %v4831_v24 = vpop.eup %4830 }
 0x524   :  { %v911_v16 = vsel %vm140_vm0, %v4831_v24, 0.0  ;;  %v5740_v29 = vpop.eup %4832 }
 0x525   :  { %v941_v50 = vsel %vm140_vm0, %v5740_v29, 0.0  ;;  %v5744_v22 = vpop.eup %4834 }
 0x526   :  { %v944_v18 = vsel %vm140_vm0, %v5744_v22, 0.0 }
 0x54e   :  { %992 = vrot.lane.b32.xlu1 %v5499_v11, %s5185_s20  ;;  %v902_v11 = vsel %vm140_vm0, %v5725_v61, 0.0 }
 0x578   :  { %906 = vadd.xlane.f32.xlu1 %v905_v56 }
 0x580   :  { %903 = vadd.xlane.f32.xlu1 %v902_v11  ;;  %v5748_v15 = vpop.trf.xlu1 }
 0x588   :  { %828 = vmax.xlane.f32.xlu1 %v827_v33 }
 0x590   :  { %840 = vmax.xlane.f32.xlu1 %v839_v0 }
 0x598   :  { %852 = vmax.xlane.f32.xlu1 %v851_v55 }
 0x5a0   :  { %912 = vadd.xlane.f32.xlu1 %v911_v16 }
 0x5a8   :  { %942 = vadd.xlane.f32.xlu1 %v941_v50 }
 0x5b0   :  { %945 = vadd.xlane.f32.xlu1 %v944_v18 }
 0x5c0   :  { %v993_v52 = vpop.permute.xlu1 %992 }
 0x5eb   :  { %v907_v35 = vpop.xlane.xlu1 %906 }
 0x5f3   :  { %v904_v48 = vpop.xlane.xlu1 %903 }
 0x5fb   :  { %v829_v19 = vpop.xlane.xlu1 %828 }
 0x5fc   :  { %v861_v40 = vsub.f32 %v730_v41, %v829_v19  ;;  %v910_v41 = vpop.xlane.xlu2 %909 }
 0x5fe   :  { %v884_v28 = vmul.f32 1.442695, %v861_v40 }
 0x600   :  { %4836 = vpow2.f32 %v884_v28 }
 0x603   :  { %v841_v49 = vpop.xlane.xlu1 %840 }
 0x604   :  { %v865_v32 = vsub.f32 %v767_v10, %v841_v49 }
 0x606   :  { %v4837_v51 = vpop.eup %4836  ;;  %v892_v43 = vmul.f32 1.442695, %v865_v32 }
 0x607   :  { %v923_v56 = vsel %vm140_vm0, %v4837_v51, 0.0 }
 0x608   :  { %4838 = vpow2.f32 %v892_v43  ;;  %924 = vadd.xlane.f32.xlu2 %v923_v56 }
 0x60b   :  { %v853_v11 = vpop.xlane.xlu1 %852 }
 0x60c   :  { %v869_v63 = vsub.f32 %v804_v2, %v853_v11 }
 0x60e   :  { %v5751_v33 = vpop.eup %4838  ;;  %v900_v57 = vmul.f32 1.442695, %v869_v63 }
 0x60f   :  { %v935_v3 = vsel %vm140_vm0, %v5751_v33, 0.0 }
 0x610   :  { %4840 = vpow2.f32 %v900_v57  ;;  %936 = vadd.xlane.f32.xlu0 %v935_v3 }
 0x613   :  { %v913_v0 = vpop.xlane.xlu1 %912 }
 0x614   :  { %4842 = vrcp.f32 %v913_v0 }
 0x615   :  { %4844 = vrcp.f32 %v910_v41 }
 0x616   :  { %v5755_v10 = vpop.eup %4840  ;;  %4846 = vrcp.f32 %v907_v35 }
 0x617   :  { %v947_v13 = vsel %vm140_vm0, %v5755_v10, 0.0  ;;  %4848 = vrcp.f32 %v904_v48 }
 0x618   :  { %948 = vadd.xlane.f32.xlu1 %v947_v13 }
 0x61a   :  { %v4843_v1 = vpop.eup %4842 }
 0x61b   :  { %v969_v2 = vmul.f32 %v4843_v1, %v4831_v24  ;;  %v4845_v5 = vpop.eup %4844 }
 0x61c   :  { %v968_v55 = vmul.f32 %v4845_v5, %v5680_v36  ;;  %v4847_v21 = vpop.eup %4846  ;;  %v940_v36 = vpop.xlane.xlu2 %939 }
 0x61d   :  { %4519 = vmatpush.xpose.msk.msra.mxu1 %vm140_vm0, %v969_v2  ;;  %v967_v23 = vmul.f32 %v4847_v21, %v5721_v53  ;;  %v4849_v54 = vpop.eup %4848 }
 0x61e   :  { %v966_v16 = vmul.f32 %v4849_v54, %v5725_v61 }
 0x621   :  { %4520 = vmatpush.xpose.msk.msra.mxu1 %vm140_vm0, %v968_v55 }
 0x624   :  { %v919_v53 = vpop.xlane.xlu2 %918 }
 0x625   :  { %4521 = vmatpush.xpose.msk.msra.mxu1 %vm140_vm0, %v967_v23 }
 0x629   :  { %4522 = vmatpush.xpose.msk.msra.mxu1 %vm140_vm0, %v966_v16  ;;  %v5189_v16 = vmov 1983009808  }
 0x631   :  { %1126 = vxpose.xlu2.b32.start [1/4] (short) (narrow) %v5547_v31, 8  ;;  %v997_v31 = vpop.permute.xlu0 %996 }
 0x639   :  { %1127 = vxpose.xlu2.b32.cont [2/4] (short) (narrow) %v5560_v42, 8  ;;  %1030 = vxpose.xlu0.b32.start [1/4] (short) (narrow) %v5490_v6, 8  ;;  %v916_v42 = vpop.xlane.xlu0 %915  ;;  %v922_v6 = vpop.xlane.xlu2 %921 }
 0x641   :  { %1128 = vxpose.xlu2.b32.cont [3/4] (short) (narrow) %v5586_v14, 8  ;;  %1031 = vxpose.xlu0.b32.cont [2/4] (short) (narrow) %v5580_v8, 8  ;;  %v928_v14 = vpop.xlane.xlu0 %927  ;;  %v934_v61 = vpop.xlane.xlu2 %933 }
 0x642   :  { %v943_v8 = vpop.xlane.xlu1 %942 }
 0x649   :  { %1129 = vxpose.xlu2.b32.end [4/4] (short) (narrow) %v5582_v9, 8  ;;  %1032 = vxpose.xlu0.b32.cont [3/4] (short) (narrow) %v5665_v4, 8  ;;  %v931_v24 = vpop.xlane.xlu0 %930 }
 0x651   :  { %1033 = vxpose.xlu0.b32.end [4/4] (short) (narrow) %v5667_v39, 8  ;;  %v946_v39 = vpop.xlane.xlu1 %945 }
 0x652   :  { %1062 = vxpose.xlu1.b32.start [1/4] (short) (narrow) %v5577_v7, 8 }
 0x65a   :  { %1063 = vxpose.xlu1.b32.cont [2/4] (short) (narrow) %v993_v52, 8 }
 0x662   :  { %1064 = vxpose.xlu1.b32.cont [3/4] (short) (narrow) %v5686_v47, 8 }
 0x66a   :  { %1065 = vxpose.xlu1.b32.end [4/4] (short) (narrow) %v997_v31, 8 }
 0x67b   :  { %v925_v9 = vpop.xlane.xlu2 %924 }
 0x67c   :  { %4850 = vrcp.f32 %v925_v9  ;;  %v5190_v9 = vmov 1934713408  }
 0x67d   :  { %4852 = vrcp.f32 %v922_v6 }
 0x67e   :  { %4854 = vrcp.f32 %v919_v53 }
 0x682   :  { %v4851_v4 = vpop.eup %4850 }
 0x683   :  { %v973_v7 = vmul.f32 %v4851_v4, %v4837_v51  ;;  %v937_v44 = vpop.xlane.xlu0 %936  ;;  %v4853_v50 = vpop.eup %4852  ;;  %v1456_v4 = vunpack.c.l.s4 %v5190_v9 }
 0x684   :  { %4856 = vrcp.f32 %v937_v44  ;;  %v972_v47 = vmul.f32 %v4853_v50, %v5707_v38  ;;  %v4855_v18 = vpop.eup %4854 }
 0x685   :  { %4858 = vrcp.f32 %v916_v42  ;;  %4524 = vmatpush.xpose.msk.msra.mxu0 %vm140_vm0, %v973_v7  ;;  %v971_v40 = vmul.f32 %v4855_v18, %v5702_v27 }
 0x686   :  { %4860 = vrcp.f32 %v934_v61 }
 0x687   :  { %4862 = vrcp.f32 %v931_v24 }
 0x689   :  { %4525 = vmatpush.xpose.msk.msra.mxu0 %vm140_vm0, %v972_v47 }
 0x68a   :  { %v4857_v52 = vpop.eup %4856 }
 0x68b   :  { %v4859_v35 = vpop.eup %4858  ;;  %v977_v48 = vmul.f32 %v4857_v52, %v5751_v33  ;;  %v949_v19 = vpop.xlane.xlu1 %948 }
 0x68c   :  { %v4861_v28 = vpop.eup %4860  ;;  %4864 = vrcp.f32 %v949_v19  ;;  %v970_v38 = vmul.f32 %v4859_v35, %v5678_v45  ;;  %v5821_v35 = vunpack.c.0.s8 %v1456_v4 }
 0x68d   :  { %4866 = vrcp.f32 %v928_v14  ;;  %4526 = vmatpush.xpose.msk.msra.mxu0 %vm140_vm0, %v971_v40  ;;  %4529 = vmatpush.xpose.msk.msra.mxu2 %vm140_vm0, %v977_v48  ;;  %v976_v49 = vmul.f32 %v4861_v28, %v5711_v46  ;;  %v4863_v32 = vpop.eup %4862 }
 0x68e   :  { %4868 = vrcp.f32 %v946_v39  ;;  %v975_v56 = vmul.f32 %v4863_v32, %v5694_v12 }
 0x68f   :  { %4870 = vrcp.f32 %v943_v8 }
 0x690   :  { %4872 = vrcp.f32 %v940_v36  ;;  %v1432_v36 = vunpack.c.l.s4 %v5189_v16 }
 0x691   :  { %4527 = vmatpush.xpose.msk.msra.mxu0 %vm140_vm0, %v970_v38  ;;  %4530 = vmatpush.xpose.msk.msra.mxu2 %vm140_vm0, %v976_v49 }
 0x692   :  { %v4865_v51 = vpop.eup %4864  ;;  %v5812_v6 = vunpack.c.0.s8 %v1432_v36 }
 0x693   :  { %v4867_v27 = vpop.eup %4866  ;;  %v981_v43 = vmul.f32 %v4865_v51, %v5755_v10 }
 0x694   :  { %v4869_v11 = vpop.eup %4868  ;;  %v974_v45 = vmul.f32 %v4867_v27, %v5689_v17 }
 0x695   :  { %4531 = vmatpush.xpose.msk.msra.mxu2 %vm140_vm0, %v975_v56  ;;  %4534 = vmatpush.xpose.msk.msra.mxu3 %vm140_vm0, %v981_v43  ;;  %v980_v46 = vmul.f32 %v4869_v11, %v5744_v22  ;;  %v4871_v63 = vpop.eup %4870 }
 0x696   :  { %v979_v33 = vmul.f32 %v4871_v63, %v5740_v29  ;;  %v4873_v57 = vpop.eup %4872 }
 0x697   :  { %v978_v12 = vmul.f32 %v4873_v57, %v5696_v25 }
 0x699   :  { %4532 = vmatpush.xpose.msk.msra.mxu2 %vm140_vm0, %v974_v45  ;;  %4535 = vmatpush.xpose.msk.msra.mxu3 %vm140_vm0, %v980_v46 }
 0x69c   :  { %4533 = vmatmul.msk.f32.vlgmr.msra.gmra.mxu2 %vm140_vm0, %v5748_v15 }
 0x69d   :  { %4536 = vmatpush.xpose.msk.msra.mxu3 %vm140_vm0, %v979_v33 }
 0x6a1   :  { %4537 = vmatpush.xpose.msk.msra.mxu3 %vm140_vm0, %v978_v12 }
 0x6ca   :  { %v1142_v17 = vpop.trf.xlu2 }
 0x6cb   :  { %4538 = vmatmul.msk.f32.vlgmr.msra.gmra.mxu3 %vm140_vm0, %v1142_v17 }
 0x6dd   :  { %v1046_v22 = vpop.trf.xlu0 }
 0x6de   :  { %4523 = vmatmul.msk.f32.vlgmr.msra.gmra.mxu1 %vm140_vm0, %v1046_v22 }
 0x6f6   :  { %v1078_v3 = vpop.trf.xlu1 }
 0x6f7   :  { %4528 = vmatmul.msk.f32.vlgmr.msra.gmra.mxu0 %vm140_vm0, %v1078_v3 }
 0x71f   :  { %v1260_v15 = vpop.f32.mrf.mxu2 }
 0x74e   :  { %v1295_v0 = vpop.f32.mrf.mxu3 }
 0x75b   :  { %v1190_v29 = vpop.f32.mrf.mxu1 }
 0x75c   :  { %1298 = vxpose.xlu2.b32.start.end [1/1] (short) (narrow) %v1190_v29, 32 }
 0x774   :  { %v1225_v41 = vpop.f32.mrf.mxu0 }
 0x775   :  { %1330 = vxpose.xlu0.b32.start.end [1/1] (short) (narrow) %v1225_v41, 32 }
 0x77c   :  { %1362 = vxpose.xlu2.b32.start.end [1/1] (short) (narrow) %v1260_v15, 32 }
 0x795   :  { %1394 = vxpose.xlu0.b32.start.end [1/1] (short) (narrow) %v1295_v0, 32 }
 0x7f5   :  { %v1314_v25 = vpop.trf.xlu2 }
 0x7f6   :  { %v1429_v54 = vrot.slane %v1314_v25, 4 }
 0x7fd   :  { %v1315_v10 = vpop.trf.xlu2 }
 0x7fe   :  { %v1485_v42 = vrot.slane %v1315_v10, 4 }
 0x805   :  { %v1316_v13 = vpop.trf.xlu2 }
 0x806   :  { %v1541_v39 = vrot.slane %v1316_v13, 4 }
 0x80d   :  { %v5804_v1 = vpop.trf.xlu2 }
 0x80e   :  { %v1597_v27 = vrot.slane %v5804_v1, 4 }
 0x815   :  { %v1378_v5 = vpop.trf.xlu2 }
 0x816   :  { %v1426_v53 = vrot.slane %v1378_v5, 4  ;;  %v1430_v14 = vsel %vm1427_vm2, %v1378_v5, %v1429_v54 }
 0x817   :  { %v1438_v44 = vperm.slane %v1430_v14, %v5812_v6 }
 0x818   :  { %v1428_v24 = vsel %vm1427_vm2, %v1426_v53, %v1314_v25 }
 0x819   :  { %v1346_v2 = vpop.trf.xlu0  ;;  %v1434_v50 = vperm.slane %v1428_v24, %v5812_v6  ;;  %v1465_v49 = vrot.slane %v1438_v44, 4 }
 0x81a   :  { %v1441_v47 = vrot.slane %v1346_v2, 4 }
 0x81b   :  { %v1453_v43 = vrot.slane %v1434_v50, 4 }
 0x81d   :  { %v1379_v23 = vpop.trf.xlu2 }
 0x81e   :  { %v1483_v61 = vrot.slane %v1379_v23, 4  ;;  %v1486_v7 = vsel %vm1427_vm2, %v1379_v23, %v1485_v42 }
 0x81f   :  { %v1494_v52 = vperm.slane %v1486_v7, %v5812_v6 }
 0x820   :  { %v1484_v18 = vsel %vm1427_vm2, %v1483_v61, %v1315_v10 }
 0x821   :  { %v5806_v55 = vpop.trf.xlu0  ;;  %v5826_v32 = vperm.slane %v1484_v18, %v5812_v6  ;;  %v1521_v33 = vrot.slane %v1494_v52, 4 }
 0x822   :  { %v1497_v57 = vrot.slane %v5806_v55, 4 }
 0x823   :  { %v1509_v3 = vrot.slane %v5826_v32, 4 }
 0x825   :  { %v1380_v8 = vpop.trf.xlu2 }
 0x826   :  { %v1539_v19 = vrot.slane %v1380_v8, 4  ;;  %v1542_v40 = vsel %vm1427_vm2, %v1380_v8, %v1541_v39 }
 0x827   :  { %v5832_v11 = vperm.slane %v1542_v40, %v5812_v6 }
 0x828   :  { %v1540_v12 = vsel %vm1427_vm2, %v1539_v19, %v1316_v13 }
 0x829   :  { %v5808_v21 = vpop.trf.xlu0  ;;  %v5846_v5 = vperm.slane %v1540_v12, %v5812_v6  ;;  %v1577_v13 = vrot.slane %v5832_v11, 4 }
 0x82a   :  { %v1553_v61 = vrot.slane %v5808_v21, 4 }
 0x82d   :  { %v1381_v17 = vpop.trf.xlu2 }
 0x82e   :  { %v1598_v0 = vsel %vm1427_vm2, %v1381_v17, %v1597_v27  ;;  %v1595_v23 = vrot.slane %v1381_v17, 4 }
 0x82f   :  { %v5854_v8 = vperm.slane %v1598_v0, %v5812_v6 }
 0x830   :  { %v1596_v19 = vsel %vm1427_vm2, %v1595_v23, %v5804_v1 }
 0x831   :  { %v5810_v31 = vpop.trf.xlu0 }
 0x839   :  { %v1410_v48 = vpop.trf.xlu0 }
 0x83a   :  { %v1439_v28 = vrot.slane %v1410_v48, 4  ;;  %v1442_v38 = vsel %vm1427_vm2, %v1410_v48, %v1441_v47 }
 0x83b   :  { %v1450_v51 = vperm.slane %v1442_v38, %v5812_v6 }
 0x83c   :  { %v1440_v56 = vsel %vm1427_vm2, %v1439_v28, %v1346_v2 }
 0x83d   :  { %v1446_v45 = vperm.slane %v1440_v56, %v5812_v6  ;;  %v1463_v46 = vrot.slane %v1450_v51, 4  ;;  %v1466_v63 = vsel %vm1427_vm2, %v1450_v51, %v1465_v49 }
 0x83e   :  { %v1474_v22 = vperm.slane %v1466_v63, %v5821_v35 }
 0x83f   :  { %v1451_v29 = vrot.slane %v1446_v45, 4  ;;  %v1454_v41 = vsel %vm1427_vm2, %v1446_v45, %v1453_v43  ;;  %v1464_v15 = vsel %vm1427_vm2, %v1463_v46, %v1438_v44  ;;  %v5878_v46 = vperm.slane %v1596_v19, %v5812_v6 }
 0x840   :  { %v1462_v25 = vperm.slane %v1454_v41, %v5821_v35  ;;  %v1470_v10 = vperm.slane %v1464_v15, %v5821_v35  ;;  %v1481_v2 = vrot.slane %v1474_v22, 4 }
 0x841   :  { %v1452_v54 = vsel %vm1427_vm2, %v1451_v29, %v1434_v50  ;;  %v1411_v16 = vpop.trf.xlu0 }
 0x842   :  { %v1458_v36 = vperm.slane %v1452_v54, %v5821_v35  ;;  %v1477_v53 = vrot.slane %v1462_v25, 4  ;;  %v1479_v42 = vrot.slane %v1470_v10, 4  ;;  %v1482_v14 = vsel %vm1427_vm2, 0.0, %v1481_v2 }
 0x843   :  { %v1495_v24 = vrot.slane %v1411_v16, 4  ;;  %v1498_v9 = vsel %vm1427_vm2, %v1411_v16, %v1497_v57  ;;  %v1662_v39 = vsel %vm1427_vm2, %v1481_v2, %v1470_v10  ;;  %v1667_v7 = vrot.slane %v1482_v14, 4 }
 0x844   :  { %v1478_v4 = vsel %vm1427_vm2, 0.0, %v1477_v53  ;;  %v1506_v44 = vperm.slane %v1498_v9, %v5812_v6  ;;  %v1480_v50 = vsel %vm1427_vm2, 0.0, %v1479_v42  ;;  %v1475_v48 = vrot.slane %v1458_v36, 4 }
 0x845   :  { %v1656_v47 = vrot.slane %v1478_v4, 4  ;;  %v1496_v18 = vsel %vm1427_vm2, %v1495_v24, %v5806_v55  ;;  %v5868_v49 = vperm.slane %v1662_v39, %v5812_v6  ;;  %v1651_v43 = vsel %vm1427_vm2, %v1477_v53, %v1458_v36 }
 0x846   :  { %v1502_v40 = vperm.slane %v1496_v18, %v5812_v6  ;;  %v1519_v28 = vrot.slane %v1506_v44, 4  ;;  %v1522_v38 = vsel %vm1427_vm2, %v1506_v44, %v1521_v33  ;;  %v1476_v27 = vsel %vm1427_vm2, 0.0, %v1475_v48 }
 0x847   :  { %v1530_v51 = vperm.slane %v1522_v38, %v5821_v35  ;;  %v1565_v55 = vrot.slane %v5846_v5, 4  ;;  %v1668_v45 = vsel %vm1427_vm2, %v1667_v7, %v1480_v50  ;;  %v1657_v12 = vsel %vm1427_vm2, %v1656_v47, %v1476_v27 }
 0x848   :  { %v1510_v56 = vsel %vm1427_vm2, %v1502_v40, %v1509_v3  ;;  %v1520_v1 = vsel %vm1427_vm2, %v1519_v28, %v1494_v52  ;;  %v1507_v63 = vrot.slane %v1502_v40, 4  ;;  %v1655_v3 = vperm.slane %v1651_v43, %v5812_v6 }
 0x849   :  { %v1518_v33 = vperm.slane %v1510_v56, %v5821_v35  ;;  %v1412_v57 = vpop.trf.xlu0  ;;  %v1526_v17 = vperm.slane %v1520_v1, %v5821_v35  ;;  %v1633_v52 = vrot.slane %v5854_v8, 4  ;;  %v1537_v41 = vrot.slane %v1530_v51, 4 }
 0x84a   :  { %v1551_v22 = vrot.slane %v1412_v57, 4  ;;  %v1554_v29 = vsel %vm1427_vm2, %v1412_v57, %v1553_v61  ;;  %v1672_v15 = vperm.slane %v1668_v45, %v5812_v6  ;;  %v1687_v0 = vrot.slane %v5868_v49, 4 }
 0x84b   :  { %v1609_v25 = vrot.slane %v5810_v31, 4  ;;  %v1562_v2 = vperm.slane %v1554_v29, %v5812_v6  ;;  %v1661_v23 = vperm.slane %v1657_v12, %v5812_v6  ;;  %v1621_v54 = vrot.slane %v5878_v46, 4 }
 0x84c   :  { %v1552_v10 = vsel %vm1427_vm2, %v1551_v22, %v5808_v21  ;;  %v1508_v16 = vsel %vm1427_vm2, %v1507_v63, %v5826_v32  ;;  %v1533_v36 = vrot.slane %v1518_v33, 4  ;;  %v1535_v42 = vrot.slane %v1526_v17, 4 }
 0x84d   :  { %v1558_v53 = vperm.slane %v1552_v10, %v5812_v6  ;;  %v1575_v14 = vrot.slane %v1562_v2, 4  ;;  %v1578_v61 = vsel %vm1427_vm2, %v1562_v2, %v1577_v13  ;;  %v1675_v24 = vrot.slane %v1655_v3, 4 }
 0x84e   :  { %v1538_v9 = vsel %vm1427_vm2, 0.0, %v1537_v41  ;;  %v1688_v39 = vsel %vm1427_vm2, %v1672_v15, %v1687_v0  ;;  %v1586_v32 = vperm.slane %v1578_v61, %v5821_v35  ;;  %v1534_v47 = vsel %vm1427_vm2, 0.0, %v1533_v36 }
 0x84f   :  { %v1563_v21 = vrot.slane %v1558_v53, 4  ;;  %v1566_v4 = vsel %vm1427_vm2, %v1558_v53, %v1565_v55  ;;  %v1576_v7 = vsel %vm1427_vm2, %v1575_v14, %v5832_v11  ;;  %v1676_v44 = vsel %vm1427_vm2, %v1661_v23, %v1675_v24 }
 0x850   :  { %v1696_v50 = vperm.slane %v1688_v39, %v5821_v35  ;;  %v1716_v13 = vsel %vm1427_vm2, %v1537_v41, %v1526_v17  ;;  %v1574_v18 = vperm.slane %v1566_v4, %v5821_v35  ;;  %v1684_v48 = vperm.slane %v1676_v44, %v5821_v35 }
 0x851   :  { %v1413_v19 = vpop.trf.xlu0  ;;  %v1514_v40 = vperm.slane %v1508_v16, %v5821_v35  ;;  %v1564_v11 = vsel %vm1427_vm2, %v1563_v21, %v5846_v5  ;;  %v1536_v51 = vsel %vm1427_vm2, 0.0, %v1535_v42  ;;  %v1721_v27 = vrot.slane %v1538_v9, 4 }
 0x852   :  { %v1701_v28 = vrot.slane %v1696_v50, 4  ;;  %v1607_v38 = vrot.slane %v1413_v19, 4  ;;  %v5915_v43 = vperm.slane %v1576_v7, %v5821_v35  ;;  %v1703_v55 = vrot.slane %v1684_v48, 4 }
 0x853   :  { %v1710_v56 = vrot.slane %v1534_v47, 4  ;;  %v5918_v1 = vperm.slane %v1716_v13, %v5812_v6  ;;  %v1593_v45 = vrot.slane %v1586_v32, 4  ;;  %v5922_v33 = vperm.slane %v1564_v11, %v5821_v35 }
 0x854   :  { %v1702_v63 = vsel %vm1427_vm2, %v1701_v28, %v1684_v48  ;;  %v5924_v5 = vrot.slane %v1574_v18, 4  ;;  %v1704_v57 = vsel %vm1427_vm2, %v1696_v50, %v1703_v55  ;;  %v1608_v12 = vsel %vm1427_vm2, %v1607_v38, %v5810_v31 }
 0x855   :  { %1887 = vrot.lane.b32.xlu2 %v1702_v63, %s5182_s6  ;;  %1903 = vrot.lane.b32.xlu0 %v1704_v57, %s5191_s10  ;;  %v1610_v17 = vsel %vm1427_vm2, %v1413_v19, %v1609_v25  ;;  %v1614_v22 = vperm.slane %v1608_v12, %v5812_v6  ;;  %v1673_v29 = vrot.slane %v1661_v23, 4  ;;  %v1685_v41 = vrot.slane %v1672_v15, 4 }
 0x856   :  { %v1591_v0 = vrot.slane %v5915_v43, 4  ;;  %v1618_v10 = vperm.slane %v1610_v17, %v5812_v6  ;;  %v1531_v2 = vrot.slane %v1514_v40, 4  ;;  %v1705_v16 = vsel %vm1427_vm2, %v1533_v36, %v1514_v40 }
 0x857   :  { %v1619_v53 = vrot.slane %v1614_v22, 4  ;;  %v1622_v42 = vsel %vm1427_vm2, %v1614_v22, %v1621_v54  ;;  %v1674_v31 = vsel %vm1427_vm2, %v1673_v29, %v1655_v3  ;;  %v1686_v14 = vsel %vm1427_vm2, %v1685_v41, %v5868_v49 }
 0x858   :  { %v1630_v25 = vperm.slane %v1622_v42, %v5821_v35  ;;  %v1631_v61 = vrot.slane %v1618_v10, 4  ;;  %v1634_v15 = vsel %vm1427_vm2, %v1618_v10, %v1633_v52  ;;  %v5945_v23 = vperm.slane %v1674_v31, %v5821_v35 }
 0x859   :  { %v1620_v36 = vsel %vm1427_vm2, %v1619_v53, %v5878_v46  ;;  %v1642_v54 = vperm.slane %v1634_v15, %v5821_v35  ;;  %v5951_v3 = vperm.slane %v1686_v14, %v5821_v35  ;;  %v1532_v49 = vsel %vm1427_vm2, 0.0, %v1531_v2 }
 0x85a   :  { %v1626_v24 = vperm.slane %v1620_v36, %v5821_v35  ;;  %v1632_v9 = vsel %vm1427_vm2, %v1631_v61, %v5854_v8  ;;  %v1645_v21 = vrot.slane %v1630_v25, 4  ;;  %v1699_v52 = vrot.slane %v5945_v23, 4 }
 0x85b   :  { %v1638_v4 = vperm.slane %v1632_v9, %v5821_v35  ;;  %v1649_v39 = vrot.slane %v1642_v54, 4  ;;  %v1709_v46 = vperm.slane %v1705_v16, %v5812_v6  ;;  %v1722_v7 = vsel %vm1427_vm2, %v1721_v27, %v1536_v51 }
 0x85c   :  { %v1643_v32 = vrot.slane %v1626_v24, 4  ;;  %v1646_v44 = vsel %vm1427_vm2, 0.0, %v1645_v21  ;;  %v1700_v50 = vsel %vm1427_vm2, %v5951_v3, %v1699_v52  ;;  %v1711_v47 = vsel %vm1427_vm2, %v1710_v56, %v1532_v49 }
 0x85d   :  { %v1647_v13 = vrot.slane %v1638_v4, 4  ;;  %v1650_v8 = vsel %vm1427_vm2, 0.0, %v1649_v39  ;;  %v1818_v18 = vrot.slane %v1646_v44, 4  ;;  %1871 = vrot.lane.b32.xlu1 %v1700_v50, %s5176_s26  ;;  %v1715_v48 = vperm.slane %v1711_v47, %v5812_v6 }
 0x85e   :  { %v1594_v19 = vsel %vm1427_vm2, 0.0, %v1593_v45  ;;  %v1726_v40 = vperm.slane %v1722_v7, %v5812_v6  ;;  %v1729_v11 = vrot.slane %v1709_v46, 4  ;;  %v1741_v28 = vrot.slane %v5918_v1, 4 }
 0x85f   :  { %v1590_v38 = vsel %vm1427_vm2, 0.0, %v5924_v5  ;;  %v1770_v51 = vsel %vm1427_vm2, %v1593_v45, %v5915_v43  ;;  %v1829_v27 = vrot.slane %v1650_v8, 4  ;;  %v1644_v55 = vsel %vm1427_vm2, 0.0, %v1643_v32 }
 0x860   :  { %v1730_v56 = vsel %vm1427_vm2, %v1715_v48, %v1729_v11  ;;  %v1742_v63 = vsel %vm1427_vm2, %v1726_v40, %v1741_v28  ;;  %v1739_v57 = vrot.slane %v1726_v40, 4  ;;  %v1813_v12 = vsel %vm1427_vm2, %v1645_v21, %v1626_v24 }
 0x861   :  { %v1648_v17 = vsel %vm1427_vm2, 0.0, %v1647_v13  ;;  %v1738_v22 = vperm.slane %v1730_v56, %v5821_v35  ;;  %v1750_v29 = vperm.slane %v1742_v63, %v5821_v35  ;;  %v1819_v41 = vsel %vm1427_vm2, %v1818_v18, %v1644_v55 }
 0x862   :  { %v1774_v43 = vperm.slane %v1770_v51, %v5812_v6  ;;  %v1775_v45 = vrot.slane %v1594_v19, 4  ;;  %v1727_v10 = vrot.slane %v1715_v48, 4  ;;  %v1823_v2 = vperm.slane %v1819_v41, %v5812_v6 }
 0x863   :  { %v1764_v16 = vrot.slane %v1590_v38, 4  ;;  %v1755_v53 = vrot.slane %v1750_v29, 4  ;;  %v1740_v42 = vsel %vm1427_vm2, %v1739_v57, %v5918_v1  ;;  %v1817_v31 = vperm.slane %v1813_v12, %v5812_v6 }
 0x864   :  { %v1824_v14 = vsel %vm1427_vm2, %v1649_v39, %v1638_v4  ;;  %v1830_v25 = vsel %vm1427_vm2, %v1829_v27, %v1648_v17  ;;  %v1835_v61 = vrot.slane %v1823_v2, 4  ;;  %v1587_v15 = vrot.slane %v5922_v33, 4 }
 0x865   :  { %v1592_v36 = vsel %vm1427_vm2, 0.0, %v1591_v0  ;;  %v1697_v54 = vrot.slane %v5951_v3, 4  ;;  %v1756_v49 = vsel %vm1427_vm2, %v1755_v53, %v1738_v22  ;;  %v1834_v24 = vperm.slane %v1830_v25, %v5812_v6 }
 0x866   :  { %1889 = vrot.lane.b32.xlu1 %v1756_v49, %s5182_s6  ;;  %v1728_v1 = vsel %vm1427_vm2, %v1727_v10, %v1709_v46  ;;  %v1746_v9 = vperm.slane %v1740_v42, %v5821_v35  ;;  %v1836_v21 = vsel %vm1427_vm2, %v1835_v61, %v1817_v31  ;;  %v1588_v52 = vsel %vm1427_vm2, 0.0, %v1587_v15 }
 0x867   :  { %v1828_v4 = vperm.slane %v1824_v14, %v5812_v6  ;;  %v1842_v0 = vperm.slane %v1836_v21, %v5821_v35  ;;  %v1847_v39 = vrot.slane %v1834_v24, 4  ;;  %v1765_v3 = vsel %vm1427_vm2, %v1764_v16, %v1588_v52  ;;  %v1931_v21 = vld [vmem:[#allocation5 + $0x18] sm:$0xff] }
 0x868   :  { %v1759_v7 = vsel %vm1427_vm2, %v5924_v5, %v5922_v33  ;;  %v1769_v32 = vperm.slane %v1765_v3, %v5812_v6  ;;  %v1776_v46 = vsel %vm1427_vm2, %v1775_v45, %v1592_v36  ;;  %v1837_v44 = vrot.slane %v1817_v31, 4  ;;  %1956 = vmatpush.msrb.mxu1 %v1931_v21  ;;  %v1928_v3 = vld [vmem:[#allocation5] sm:$0xff] }
 0x869   :  { %v1757_v50 = vrot.slane %v1738_v22, 4  ;;  %v1848_v47 = vsel %vm1427_vm2, %v1847_v39, %v1828_v4  ;;  %v1861_v13 = vrot.slane %v1842_v0, 4  ;;  %v1780_v8 = vperm.slane %v1776_v46, %v5812_v6  ;;  %v1929_v39 = vld [vmem:[#allocation5 + $0x8] sm:$0xff] }
 0x86a   :  { %v1734_v18 = vperm.slane %v1728_v1, %v5821_v35  ;;  %v1854_v48 = vperm.slane %v1848_v47, %v5821_v35  ;;  %v1838_v19 = vsel %vm1427_vm2, %v1823_v2, %v1837_v44  ;;  %v1781_v40 = vrot.slane %v1769_v32, 4 }
 0x86b   :  { %v1751_v11 = vrot.slane %v1746_v9, 4  ;;  %v1763_v33 = vperm.slane %v1759_v7, %v5812_v6  ;;  %v1849_v5 = vrot.slane %v1828_v4, 4  ;;  %v1793_v28 = vrot.slane %v1780_v8, 4 }
 0x86c   :  { %v1859_v38 = vrot.slane %v1854_v48, 4  ;;  %v1862_v51 = vsel %vm1427_vm2, %v1854_v48, %v1861_v13  ;;  %v1846_v27 = vperm.slane %v1838_v19, %v5821_v35  ;;  %v1758_v55 = vsel %vm1427_vm2, %v1750_v29, %v1757_v50 }
 0x86d   :  { %1877 = vrot.lane.b32.xlu2 %v1862_v51, %s5176_s26  ;;  %v1782_v56 = vsel %vm1427_vm2, %v1781_v40, %v1763_v33  ;;  %v1794_v63 = vsel %vm1427_vm2, %v1793_v28, %v1774_v43  ;;  %v1795_v57 = vrot.slane %v1774_v43, 4  ;;  %v1850_v22 = vsel %vm1427_vm2, %v1834_v24, %v1849_v5 }
 0x86e   :  { %1905 = vrot.lane.b32.xlu1 %v1758_v55, %s5191_s10  ;;  %v1788_v12 = vperm.slane %v1782_v56, %v5821_v35  ;;  %v1800_v17 = vperm.slane %v1794_v63, %v5821_v35  ;;  %v1698_v41 = vsel %vm1427_vm2, %v1697_v54, %v5945_v23  ;;  %v1860_v29 = vsel %vm1427_vm2, %v1859_v38, %v1842_v0  ;;  %v1930_v0 = vld [vmem:[#allocation5 + $0x10] sm:$0xff] }
 0x86f   :  { %v1752_v45 = vsel %vm1427_vm2, %v1751_v11, %v1734_v18  ;;  %v1865_v10 = vrot.slane %v1846_v27, 4  ;;  %v1753_v16 = vrot.slane %v1734_v18, 4  ;;  %v1783_v53 = vrot.slane %v1763_v33, 4  ;;  %1957 = vmatpush.msrb.mxu1 %v1930_v0 }
 0x870   :  { %v1805_v2 = vrot.slane %v1800_v17, 4  ;;  %v1796_v42 = vsel %vm1427_vm2, %v1780_v8, %v1795_v57  ;;  %v1858_v43 = vperm.slane %v1850_v22, %v5821_v35  ;;  %v1807_v49 = vrot.slane %v1788_v12, 4  ;;  %v5002_v22 = vld [vmem:[%s7074_s0] sm:$0xff] }
 0x871   :  { %v1754_v25 = vsel %vm1427_vm2, %v1746_v9, %v1753_v16  ;;  %v1804_v23 = vperm.slane %v1796_v42, %v5821_v35  ;;  %v1784_v61 = vsel %vm1427_vm2, %v1769_v32, %v1783_v53  ;;  %1958 = vmatpush.msrb.mxu1 %v1929_v39  ;;  %v2051_v39 = vld [vmem:[#allocation7] sm:$0xff] }
 0x872   :  { %v1806_v31 = vsel %vm1427_vm2, %v1805_v2, %v1788_v12  ;;  %v1866_v14 = vsel %vm1427_vm2, %v1858_v43, %v1865_v10  ;;  %v1792_v15 = vperm.slane %v1784_v61, %v5821_v35  ;;  %v1808_v24 = vsel %vm1427_vm2, %v1800_v17, %v1807_v49  ;;  %v5003_v2 = vld [vmem:[%s7074_s0 + $0x8] sm:$0xff] }
 0x873   :  { %v1809_v36 = vrot.slane %v1804_v23, 4  ;;  %v1863_v52 = vrot.slane %v1858_v43, 4  ;;  %1959 = vmatpush.msrb.mxu1 %v1928_v3 }
 0x874   :  { %v1811_v1 = vrot.slane %v1792_v15, 4 }
 0x875   :  { %1909 = vrot.lane.b32.xlu2 %v1866_v14, %s5191_s10  ;;  %v1810_v54 = vsel %vm1427_vm2, %v1809_v36, %v1792_v15  ;;  %v1864_v4 = vsel %vm1427_vm2, %v1863_v52, %v1846_v27  ;;  %v5005_v15 = vld [vmem:[%s7074_s0 + $0x18] sm:$0xff] }
 0x876   :  { %1873 = vrot.lane.b32.xlu1 %v1754_v25, %s5176_s26  ;;  %v1812_v9 = vsel %vm1427_vm2, %v1804_v23, %v1811_v1  ;;  %v2053_v1 = vld [vmem:[#allocation7 + $0x10] sm:$0xff] }
 0x87e   :  { %1891 = vrot.lane.b32.xlu1 %v1810_v54, %s5182_s6 }
 0x886   :  { %1875 = vrot.lane.b32.xlu1 %v1808_v24, %s5176_s26  ;;  %v2054_v24 = vld [vmem:[#allocation7 + $0x18] sm:$0xff] }
 0x887   :  { %2079 = vmatpush.msrb.mxu0 %v2054_v24 }
 0x889   :  { %2080 = vmatpush.msrb.mxu0 %v2053_v1 }
 0x88e   :  { %1907 = vrot.lane.b32.xlu1 %v1812_v9, %s5191_s10  ;;  %v2052_v9 = vld [vmem:[#allocation7 + $0x8] sm:$0xff] }
 0x88f   :  { %2081 = vmatpush.msrb.mxu0 %v2052_v9 }
 0x891   :  { %2082 = vmatpush.msrb.mxu0 %v2051_v39  ;;  %v2202_v39 = vld [vmem:[%s7081_s7 + $0x30] sm:$0xff] }
 0x896   :  { %1893 = vrot.lane.b32.xlu1 %v1864_v4, %s5182_s6 }
 0x8af   :  { %v1888_v32 = vpop.permute.xlu2 %1887 }
 0x8c7   :  { %v1904_v44 = vpop.permute.xlu0 %1903  ;;  %v1878_v28 = vpop.permute.xlu2 %1877 }
 0x8c8   :  { %v1918_v55 = vsel %vm657_vm1, %v1860_v29, %v1878_v28 }
 0x8cf   :  { %v1872_v7 = vpop.permute.xlu1 %1871  ;;  %v1910_v63 = vpop.permute.xlu2 %1909 }
 0x8d0   :  { %v1915_v46 = vsel %vm657_vm1, %v1698_v41, %v1872_v7 }
 0x8d1   :  { %v1919_v50 = vsel %vm288_vm14, %v1915_v46, %v1888_v32 }
 0x8d2   :  { %v1924_v47 = vsel %vm1923_vm3, %v1919_v50, %v1904_v44  ;;  %v4796_v50 = vld [vmem:[#allocation2 + $0x2] ss:$0 sm:$0xff] }
 0x8d3   :  { %4539 = vmatmul.msk.f32.vlgmr.msrb.gmra.mxu1 %vm140_vm0, %v1924_v47 }
 0x8d8   :  { %v1890_v13 = vpop.permute.xlu1 %1889 }
 0x8e0   :  { %v1906_v8 = vpop.permute.xlu1 %1905 }
 0x8e8   :  { %v1874_v18 = vpop.permute.xlu1 %1873 }
 0x8e9   :  { %v1916_v48 = vsel %vm657_vm1, %v1752_v45, %v1874_v18 }
 0x8ea   :  { %v1920_v19 = vsel %vm288_vm14, %v1916_v48, %v1890_v13 }
 0x8eb   :  { %v1925_v40 = vsel %vm1923_vm3, %v1920_v19, %v1906_v8 }
 0x8ec   :  { %4540 = vmatmul.msk.f32.gmra.mxu1 %vm140_vm0, %v1925_v40 }
 0x8f0   :  { %v1892_v11 = vpop.permute.xlu1 %1891 }
 0x8f8   :  { %v1876_v33 = vpop.permute.xlu1 %1875 }
 0x8f9   :  { %v1917_v5 = vsel %vm657_vm1, %v1806_v31, %v1876_v33  ;;  %v5004_v31 = vld [vmem:[%s7074_s0 + $0x10] sm:$0xff] }
 0x8fa   :  { %v1921_v51 = vsel %vm288_vm14, %v1917_v5, %v1892_v11 }
 0x900   :  { %v1908_v38 = vpop.permute.xlu1 %1907 }
 0x901   :  { %v1926_v27 = vsel %vm1923_vm3, %v1921_v51, %v1908_v38 }
 0x902   :  { %4541 = vmatmul.msk.f32.gmra.mxu1 %vm140_vm0, %v1926_v27 }
 0x908   :  { %v1894_v56 = vpop.permute.xlu1 %1893 }
 0x909   :  { %v1922_v57 = vsel %vm288_vm14, %v1918_v55, %v1894_v56 }
 0x90a   :  { %v1927_v12 = vsel %vm1923_vm3, %v1922_v57, %v1910_v63 }
 0x90b   :  { %4542 = vmatmul.msk.f32.gmra.mxu1 %vm140_vm0, %v1927_v12 }
 0x950   :  { %v1961_v17 = vpop.f32.mrf.mxu1 }
 0x951   :  { %v6065_v41 = vadd.f32 %v5002_v22, %v1961_v17 }
 0x953   :  { %v1978_v45 = vmul.f32 %v6065_v41, %v6065_v41 }
 0x955   :  { %v1982_v29 = vsel %vm140_vm0, %v1978_v45, 0.0 }
 0x956   :  { %1983 = vadd.xlane.f32.xlu1 %v1982_v29 }
 0x969   :  { %v1964_v10 = vpop.f32.mrf.mxu1 }
 0x96a   :  { %v6073_v16 = vadd.f32 %v5003_v2, %v1964_v10 }
 0x96c   :  { %v1979_v53 = vmul.f32 %v6073_v16, %v6073_v16 }
 0x96e   :  { %v1985_v42 = vsel %vm140_vm0, %v1979_v53, 0.0 }
 0x96f   :  { %1986 = vadd.xlane.f32.xlu2 %v1985_v42 }
 0x97f   :  { %v1967_v43 = vpop.f32.mrf.mxu1 }
 0x980   :  { %v6081_v14 = vadd.f32 %v5004_v31, %v1967_v43 }
 0x982   :  { %v1980_v25 = vmul.f32 %v6081_v14, %v6081_v14 }
 0x984   :  { %v1988_v23 = vsel %vm140_vm0, %v1980_v25, 0.0 }
 0x985   :  { %1989 = vadd.xlane.f32.xlu0 %v1988_v23 }
 0x988   :  { %v1970_v61 = vpop.f32.mrf.mxu1 }
 0x989   :  { %v6089_v36 = vadd.f32 %v5005_v15, %v1970_v61 }
 0x98b   :  { %v1981_v54 = vmul.f32 %v6089_v36, %v6089_v36 }
 0x98d   :  { %v1991_v49 = vsel %vm140_vm0, %v1981_v54, 0.0 }
 0x98e   :  { %1992 = vadd.xlane.f32.xlu1 %v1991_v49 }
 0x9c9   :  { %v1984_v21 = vpop.xlane.xlu1 %1983 }
 0x9ca   :  { %v1994_v52 = vmul.f32 %v1984_v21, %v5330_v26 }
 0x9cc   :  { %v1998_v4 = vadd.f32 1e-05, %v1994_v52 }
 0x9ce   :  { %4874 = vrsqrt.f32 %v1998_v4  ;;  %vm2008_vm5 = vweird.f32 %v1998_v4 }
 0x9d4   :  { %v4875_v0 = vpop.eup %4874 }
 0x9d5   :  { %v2003_v3 = vmul.f32 %v4875_v0, %v1998_v4  ;;  %vm2009_vm4 = vweird.f32 %v4875_v0 }
 0x9d6   :  { %vm2010_vm6 = vmor %vm2008_vm5, %vm2009_vm4 }
 0x9d7   :  { %v2004_v7 = vmul.f32 %v4875_v0, %v2003_v3  ;;  %v2201_v3 = vld [vmem:[%s7081_s7 + $0x28] sm:$0xff] }
 0x9d9   :  { %v2005_v32 = vmul.f32 0.5, %v2004_v7  ;;  %v2200_v7 = vld [vmem:[%s7081_s7 + $0x20] sm:$0xff] }
 0x9db   :  { %v2006_v46 = vsub.f32 1.5, %v2005_v32 }
 0x9dd   :  { %v2007_v44 = vmul.f32 %v4875_v0, %v2006_v46  ;;  %v2199_v46 = vld [vmem:[%s7081_s7 + $0x18] sm:$0xff] }
 0x9df   :  { %v2011_v47 = vsel %vm2010_vm6, %v4875_v0, %v2007_v44  ;;  %v2203_v0 = vld [vmem:[%s7081_s7 + $0x38] sm:$0xff]  ;;  %v2198_v44 = vld [vmem:[%s7081_s7 + $0x10] sm:$0xff] }
 0x9e0   :  { %v2042_v13 = vmul.f32 %v2011_v47, %v6065_v41  ;;  %2224 = vmatpush.msrb.mxu2 %v2203_v0  ;;  %v2197_v47 = vld [vmem:[%s7081_s7 + $0x8] sm:$0xff] }
 0x9e2   :  { %v2047_v8 = vmul.f32 %v4796_v50, %v2042_v13  ;;  %v1987_v18 = vpop.xlane.xlu2 %1986  ;;  %2225 = vmatpush.msrb.mxu2 %v2202_v39 }
 0x9e3   :  { %v1995_v48 = vmul.f32 %v1987_v18, %v5330_v26 }
 0x9e4   :  { %4543 = vmatmul.msk.f32.vlgmr.msrb.gmra.mxu0 %vm140_vm0, %v2047_v8  ;;  %2226 = vmatpush.msrb.mxu2 %v2201_v3 }
 0x9e5   :  { %v1999_v19 = vadd.f32 1e-05, %v1995_v48  ;;  %v2196_v48 = vld [vmem:[%s7081_s7] sm:$0xff] }
 0x9e6   :  { %2227 = vmatpush.msrb.mxu2 %v2200_v7 }
 0x9e7   :  { %4876 = vrsqrt.f32 %v1999_v19  ;;  %vm2018_vm8 = vweird.f32 %v1999_v19 }
 0x9e8   :  { %2228 = vmatpush.msrb.mxu2 %v2199_v46 }
 0x9ea   :  { %2229 = vmatpush.msrb.mxu2 %v2198_v44 }
 0x9ec   :  { %2230 = vmatpush.msrb.mxu2 %v2197_v47 }
 0x9ed   :  { %v4877_v40 = vpop.eup %4876 }
 0x9ee   :  { %v2013_v11 = vmul.f32 %v4877_v40, %v1999_v19  ;;  %vm2019_vm7 = vweird.f32 %v4877_v40  ;;  %2231 = vmatpush.msrb.mxu2 %v2196_v48  ;;  %v5006_v19 = vld [vmem:[%s7076_s2 + $0x38] sm:$0xff] }
 0x9ef   :  { %vm2020_vm9 = vmor %vm2018_vm8, %vm2019_vm7 }
 0x9f0   :  { %v2014_v33 = vmul.f32 %v4877_v40, %v2013_v11  ;;  %2475 = vmatpush.msra.mxu2 %v5006_v19 }
 0x9f2   :  { %v2015_v5 = vmul.f32 0.5, %v2014_v33  ;;  %v5008_v33 = vld [vmem:[%s7076_s2 + $0x28] sm:$0xff] }
 0x9f4   :  { %v2016_v28 = vsub.f32 1.5, %v2015_v5 }
 0x9f6   :  { %v2017_v38 = vmul.f32 %v4877_v40, %v2016_v28  ;;  %v5009_v28 = vld [vmem:[%s7076_s2 + $0x20] sm:$0xff] }
 0x9f8   :  { %v1990_v51 = vpop.xlane.xlu0 %1989  ;;  %v2021_v27 = vsel %vm2020_vm9, %v4877_v40, %v2017_v38  ;;  %v5007_v40 = vld [vmem:[%s7076_s2 + $0x30] sm:$0xff]  ;;  %v5010_v38 = vld [vmem:[%s7076_s2 + $0x18] sm:$0xff] }
 0x9f9   :  { %v1996_v55 = vmul.f32 %v1990_v51, %v5330_v26  ;;  %v2043_v56 = vmul.f32 %v2021_v27, %v6073_v16  ;;  %2476 = vmatpush.msra.mxu2 %v5007_v40  ;;  %v5011_v27 = vld [vmem:[%s7076_s2 + $0x10] sm:$0xff] }
 0x9fb   :  { %v2000_v63 = vadd.f32 1e-05, %v1996_v55  ;;  %v2048_v57 = vmul.f32 %v4796_v50, %v2043_v56  ;;  %2477 = vmatpush.msra.mxu2 %v5008_v33  ;;  %v5012_v55 = vld [vmem:[%s7076_s2 + $0x8] sm:$0xff] }
 0x9fd   :  { %4878 = vrsqrt.f32 %v2000_v63  ;;  %4544 = vmatmul.msk.f32.gmra.mxu0 %vm140_vm0, %v2048_v57  ;;  %vm2028_vm11 = vweird.f32 %v2000_v63  ;;  %2478 = vmatpush.msra.mxu2 %v5009_v28 }
 0x9ff   :  { %2479 = vmatpush.msra.mxu2 %v5010_v38 }
 0xa01   :  { %v1993_v12 = vpop.xlane.xlu1 %1992  ;;  %2480 = vmatpush.msra.mxu2 %v5011_v27 }
 0xa02   :  { %v1997_v17 = vmul.f32 %v1993_v12, %v5330_v26 }
 0xa03   :  { %v4879_v22 = vpop.eup %4878  ;;  %2481 = vmatpush.msra.mxu2 %v5012_v55 }
 0xa04   :  { %v2023_v45 = vmul.f32 %v4879_v22, %v2000_v63  ;;  %v2001_v29 = vadd.f32 1e-05, %v1997_v17  ;;  %vm2029_vm10 = vweird.f32 %v4879_v22  ;;  %v5013_v63 = vld [vmem:[%s7076_s2] sm:$0xff] }
 0xa05   :  { %vm2030_vm12 = vmor %vm2028_vm11, %vm2029_vm10  ;;  %2482 = vmatpush.msra.mxu2 %v5013_v63 }
 0xa06   :  { %v2024_v10 = vmul.f32 %v4879_v22, %v2023_v45  ;;  %4880 = vrsqrt.f32 %v2001_v29  ;;  %vm2038_vm4 = vweird.f32 %v2001_v29 }
 0xa08   :  { %v2025_v2 = vmul.f32 0.5, %v2024_v10 }
 0xa0a   :  { %v2026_v53 = vsub.f32 1.5, %v2025_v2 }
 0xa0c   :  { %v4881_v42 = vpop.eup %4880  ;;  %v2027_v43 = vmul.f32 %v4879_v22, %v2026_v53 }
 0xa0d   :  { %v2033_v31 = vmul.f32 %v4881_v42, %v2001_v29  ;;  %vm2039_vm13 = vweird.f32 %v4881_v42 }
 0xa0e   :  { %v2031_v25 = vsel %vm2030_vm12, %v4879_v22, %v2027_v43  ;;  %vm2040_vm5 = vmor %vm2038_vm4, %vm2039_vm13 }
 0xa0f   :  { %v2034_v23 = vmul.f32 %v4881_v42, %v2033_v31  ;;  %v2044_v61 = vmul.f32 %v2031_v25, %v6081_v14 }
 0xa11   :  { %v2035_v15 = vmul.f32 0.5, %v2034_v23  ;;  %v2049_v54 = vmul.f32 %v4796_v50, %v2044_v61 }
 0xa13   :  { %v2036_v49 = vsub.f32 1.5, %v2035_v15  ;;  %4545 = vmatmul.msk.f32.gmra.mxu0 %vm140_vm0, %v2049_v54 }
 0xa15   :  { %v2037_v24 = vmul.f32 %v4881_v42, %v2036_v49 }
 0xa17   :  { %v2041_v1 = vsel %vm2040_vm5, %v4881_v42, %v2037_v24 }
 0xa18   :  { %v2045_v9 = vmul.f32 %v2041_v1, %v6089_v36 }
 0xa1a   :  { %v2050_v21 = vmul.f32 %v4796_v50, %v2045_v9 }
 0xa1c   :  { %4546 = vmatmul.msk.f32.gmra.mxu0 %vm140_vm0, %v2050_v21 }
 0xa61   :  { %v2084_v52 = vpop.f32.mrf.mxu0 }
 0xa62   :  { %2180 = vrot.lane.b32.xlu2 %v2084_v52, %s5185_s20  ;;  %v4547_v32 = vmul.f32 -1.442695, %v2084_v52 }
 0xa64   :  { %4882 = vpow2.f32 %v4547_v32 }
 0xa6a   :  { %v4883_v13 = vpop.eup %4882 }
 0xa6b   :  { %v2108_v8 = vadd.f32 1.0, %v4883_v13 }
 0xa6d   :  { %4884 = vrcp.f32 %v2108_v8  ;;  %v2123_v12 = vand.u32 2147483648, %v2108_v8  ;;  %vm2117_vm7 = vweird.f32 %v2108_v8  ;;  %v2121_v17 = vand.u32 2147483647, %v2108_v8 }
 0xa6f   :  { %v2124_v45 = vor.u32 1.1754944e-38, %v2123_v12  ;;  %vm2122_vm9 = vcmp.eq.f32.partialorder %v2121_v17, 8.507059e+37 }
 0xa73   :  { %v4885_v11 = vpop.eup %4884 }
 0xa74   :  { %v2113_v5 = vmul.f32 %v4885_v11, %v2108_v8  ;;  %vm2118_vm6 = vweird.f32 %v4885_v11 }
 0xa75   :  { %vm2119_vm8 = vmor %vm2117_vm7, %vm2118_vm6 }
 0xa76   :  { %v2114_v51 = vsub.f32 1.0, %v2113_v5 }
 0xa78   :  { %v2115_v56 = vmul.f32 %v4885_v11, %v2114_v51 }
 0xa7a   :  { %v6107_v4 = vpop.f32.mrf.mxu0  ;;  %v2116_v57 = vadd.f32 %v4885_v11, %v2115_v56 }
 0xa7b   :  { %2182 = vrot.lane.b32.xlu1 %v6107_v4, %s5185_s20  ;;  %v4548_v2 = vmul.f32 -1.442695, %v6107_v4 }
 0xa7c   :  { %v2120_v22 = vsel %vm2119_vm8, %v4885_v11, %v2116_v57 }
 0xa7d   :  { %v2125_v29 = vsel %vm2122_vm9, %v2124_v45, %v2120_v22  ;;  %4886 = vpow2.f32 %v4548_v2 }
 0xa7e   :  { %v2172_v10 = vmul.f32 %v2125_v29, %v2084_v52 }
 0xa83   :  { %v4887_v43 = vpop.eup %4886 }
 0xa84   :  { %v2109_v31 = vadd.f32 1.0, %v4887_v43 }
 0xa86   :  { %4888 = vrcp.f32 %v2109_v31  ;;  %v2138_v21 = vand.u32 2147483648, %v2109_v31  ;;  %vm2132_vm11 = vweird.f32 %v2109_v31  ;;  %v2136_v0 = vand.u32 2147483647, %v2109_v31 }
 0xa88   :  { %v2139_v7 = vor.u32 1.1754944e-38, %v2138_v21  ;;  %vm2137_vm13 = vcmp.eq.f32.partialorder %v2136_v0, 8.507059e+37  ;;  %v4561_v0 = vld [vmem:[%s7082_s8 + $0x30] sm:$0xff] }
 0xa8c   :  { %v4889_v23 = vpop.eup %4888 }
 0xa8d   :  { %v2128_v61 = vmul.f32 %v4889_v23, %v2109_v31  ;;  %vm2133_vm10 = vweird.f32 %v4889_v23 }
 0xa8e   :  { %vm2134_vm12 = vmor %vm2132_vm11, %vm2133_vm10 }
 0xa8f   :  { %v2129_v54 = vsub.f32 1.0, %v2128_v61 }
 0xa90   :  { %v6129_v50 = vpop.f32.mrf.mxu0 }
 0xa91   :  { %2184 = vrot.lane.b32.xlu0 %v6129_v50, %s5185_s20  ;;  %v4549_v25 = vmul.f32 -1.442695, %v6129_v50  ;;  %v2130_v24 = vmul.f32 %v4889_v23, %v2129_v54 }
 0xa93   :  { %4890 = vpow2.f32 %v4549_v25  ;;  %v2131_v9 = vadd.f32 %v4889_v23, %v2130_v24 }
 0xa95   :  { %v2135_v39 = vsel %vm2134_vm12, %v4889_v23, %v2131_v9 }
 0xa96   :  { %v2140_v46 = vsel %vm2137_vm13, %v2139_v7, %v2135_v39  ;;  %v4560_v39 = vld [vmem:[%s7082_s8 + $0x28] sm:$0xff]  ;;  %v4559_v7 = vld [vmem:[%s7082_s8 + $0x20] sm:$0xff] }
 0xa97   :  { %v2173_v44 = vmul.f32 %v2140_v46, %v6107_v4 }
 0xa99   :  { %v6136_v18 = vpop.f32.mrf.mxu0  ;;  %v4891_v49 = vpop.eup %4890 }
 0xa9a   :  { %2186 = vrot.lane.b32.xlu2 %v6136_v18, %s5185_s20  ;;  %v4550_v15 = vmul.f32 -1.442695, %v6136_v18  ;;  %v2110_v1 = vadd.f32 1.0, %v4891_v49 }
 0xa9c   :  { %4892 = vpow2.f32 %v4550_v15  ;;  %v2153_v28 = vand.u32 2147483648, %v2110_v1  ;;  %vm2147_vm5 = vweird.f32 %v2110_v1  ;;  %v2151_v38 = vand.u32 2147483647, %v2110_v1 }
 0xa9d   :  { %4894 = vrcp.f32 %v2110_v1 }
 0xa9e   :  { %v2154_v55 = vor.u32 1.1754944e-38, %v2153_v28  ;;  %vm2152_vm7 = vcmp.eq.f32.partialorder %v2151_v38, 8.507059e+37 }
 0xaa2   :  { %v4893_v52 = vpop.eup %4892 }
 0xaa3   :  { %v2111_v3 = vadd.f32 1.0, %v4893_v52  ;;  %v4895_v32 = vpop.eup %4894  ;;  %v4558_v52 = vld [vmem:[%s7078_s4 + $0x38] sm:$0xff] }
 0xaa4   :  { %v2143_v47 = vmul.f32 %v4895_v32, %v2110_v1  ;;  %vm2148_vm4 = vweird.f32 %v4895_v32  ;;  %2434 = vmatpush.msra.mxu0 %v4558_v52 }
 0xaa5   :  { %4896 = vrcp.f32 %v2111_v3  ;;  %vm2149_vm6 = vmor %vm2147_vm5, %vm2148_vm4  ;;  %v2168_v63 = vand.u32 2147483648, %v2111_v3  ;;  %vm2162_vm9 = vweird.f32 %v2111_v3  ;;  %v2166_v57 = vand.u32 2147483647, %v2111_v3 }
 0xaa6   :  { %v2144_v48 = vsub.f32 1.0, %v2143_v47 }
 0xaa7   :  { %v2169_v29 = vor.u32 1.1754944e-38, %v2168_v63  ;;  %vm2167_vm11 = vcmp.eq.f32.partialorder %v2166_v57, 8.507059e+37 }
 0xaa8   :  { %v2145_v11 = vmul.f32 %v4895_v32, %v2144_v48 }
 0xaaa   :  { %v2146_v5 = vadd.f32 %v4895_v32, %v2145_v11 }
 0xaab   :  { %v4897_v19 = vpop.eup %4896 }
 0xaac   :  { %v2158_v40 = vmul.f32 %v4897_v19, %v2111_v3  ;;  %v2150_v27 = vsel %vm2149_vm6, %v4895_v32, %v2146_v5  ;;  %vm2163_vm8 = vweird.f32 %v4897_v19  ;;  %v4556_v3 = vld [vmem:[%s7078_s4 + $0x28] sm:$0xff]  ;;  %v4555_v32 = vld [vmem:[%s7078_s4 + $0x20] sm:$0xff] }
 0xaad   :  { %v2155_v4 = vsel %vm2152_vm7, %v2154_v55, %v2150_v27  ;;  %vm2164_vm10 = vmor %vm2162_vm9, %vm2163_vm8 }
 0xaae   :  { %v2159_v33 = vsub.f32 1.0, %v2158_v40  ;;  %v2174_v12 = vmul.f32 %v2155_v4, %v6129_v50 }
 0xab0   :  { %v2160_v51 = vmul.f32 %v4897_v19, %v2159_v33  ;;  %v4797_v33 = vld [vmem:[#allocation2 + $0x1] ss:$0 sm:$0xff] }
 0xab2   :  { %v2161_v56 = vadd.f32 %v4897_v19, %v2160_v51 }
 0xab4   :  { %v2165_v22 = vsel %vm2164_vm10, %v4897_v19, %v2161_v56 }
 0xabc   :  { %v2181_v53 = vpop.permute.xlu2 %2180 }
 0xabd   :  { %v2192_v42 = vmul.f32 %v2181_v53, %v2172_v10  ;;  %v2170_v10 = vsel %vm2167_vm11, %v2169_v29, %v2165_v22 }
 0xabe   :  { %v2175_v53 = vmul.f32 %v2170_v10, %v6136_v18 }
 0xabf   :  { %4551 = vmatmul.msk.f32.vlgmr.msrb.gmra.mxu2 %vm363_vm15, %v2192_v42 }
 0xaed   :  { %v2183_v13 = vpop.permute.xlu1 %2182 }
 0xaee   :  { %v2193_v8 = vmul.f32 %v2183_v13, %v2173_v44 }
 0xaf0   :  { %4552 = vmatmul.msk.f32.gmra.mxu2 %vm363_vm15, %v2193_v8 }
 0xaf4   :  { %v2187_v2 = vpop.permute.xlu2 %2186 }
 0xaf5   :  { %v2195_v42 = vmul.f32 %v2187_v2, %v2175_v53 }
 0xb03   :  { %v2185_v17 = vpop.permute.xlu0 %2184 }
 0xb04   :  { %v2194_v45 = vmul.f32 %v2185_v17, %v2174_v12 }
 0xb06   :  { %4553 = vmatmul.msk.f32.gmra.mxu2 %vm363_vm15, %v2194_v45 }
 0xb0e   :  { %4554 = vmatmul.msk.f32.gmra.mxu2 %vm363_vm15, %v2195_v42 }
 0xb42   :  { %v2233_v43 = vpop.f32.mrf.mxu2 }
 0xb43   :  { %v6178_v31 = vadd.f32 %v2233_v43, %v6065_v41 }
 0xb45   :  { %v2250_v50 = vmul.f32 %v6178_v31, %v6178_v31 }
 0xb47   :  { %v2254_v25 = vsel %vm140_vm0, %v2250_v50, 0.0 }
 0xb48   :  { %2255 = vadd.xlane.f32.xlu1 %v2254_v25 }
 0xb73   :  { %v2236_v23 = vpop.f32.mrf.mxu2 }
 0xb74   :  { %v6184_v61 = vadd.f32 %v2236_v23, %v6073_v16 }
 0xb76   :  { %v2251_v18 = vmul.f32 %v6184_v61, %v6184_v61 }
 0xb78   :  { %v2257_v15 = vsel %vm140_vm0, %v2251_v18, 0.0 }
 0xb79   :  { %2258 = vadd.xlane.f32.xlu0 %v2257_v15 }
 0xb89   :  { %v2239_v54 = vpop.f32.mrf.mxu2 }
 0xb8a   :  { %v6190_v41 = vadd.f32 %v2239_v54, %v6081_v14  ;;  %v4562_v14 = vld [vmem:[%s7082_s8 + $0x38] sm:$0xff] }
 0xb8b   :  { %2357 = vmatpush.msrb.mxu3 %v4562_v14 }
 0xb8c   :  { %v2252_v49 = vmul.f32 %v6190_v41, %v6190_v41 }
 0xb8d   :  { %2358 = vmatpush.msrb.mxu3 %v4561_v0 }
 0xb8e   :  { %v2260_v24 = vsel %vm140_vm0, %v2252_v49, 0.0 }
 0xb8f   :  { %2261 = vadd.xlane.f32.xlu2 %v2260_v24  ;;  %2359 = vmatpush.msrb.mxu3 %v4560_v39 }
 0xb91   :  { %v2242_v1 = vpop.f32.mrf.mxu2  ;;  %2360 = vmatpush.msrb.mxu3 %v4559_v7 }
 0xb92   :  { %v6196_v16 = vadd.f32 %v2242_v1, %v6089_v36  ;;  %v4557_v36 = vld [vmem:[%s7078_s4 + $0x30] sm:$0xff] }
 0xb93   :  { %2435 = vmatpush.msra.mxu0 %v4557_v36 }
 0xb94   :  { %v2253_v9 = vmul.f32 %v6196_v16, %v6196_v16 }
 0xb95   :  { %2436 = vmatpush.msra.mxu0 %v4556_v3 }
 0xb96   :  { %v2263_v21 = vsel %vm140_vm0, %v2253_v9, 0.0 }
 0xb97   :  { %2264 = vadd.xlane.f32.xlu1 %v2263_v21  ;;  %2437 = vmatpush.msra.mxu0 %v4555_v32 }
 0xbbb   :  { %v2256_v46 = vpop.xlane.xlu1 %2255 }
 0xbbc   :  { %v2266_v44 = vmul.f32 %v2256_v46, %v5330_v26  ;;  %v2380_v46 = vld [vmem:[#allocation8 + $0x18] sm:$0xff] }
 0xbbd   :  { %2407 = vmatpush.msra.mxu1 %v2380_v46 }
 0xbbe   :  { %v2270_v47 = vadd.f32 1e-05, %v2266_v44  ;;  %v2379_v44 = vld [vmem:[#allocation8 + $0x10] sm:$0xff] }
 0xbbf   :  { %2408 = vmatpush.msra.mxu1 %v2379_v44 }
 0xbc0   :  { %4898 = vrsqrt.f32 %v2270_v47  ;;  %vm2280_vm13 = vweird.f32 %v2270_v47 }
 0xbc6   :  { %v4899_v13 = vpop.eup %4898 }
 0xbc7   :  { %v2275_v8 = vmul.f32 %v4899_v13, %v2270_v47  ;;  %vm2281_vm12 = vweird.f32 %v4899_v13 }
 0xbc8   :  { %vm2282_vm4 = vmor %vm2280_vm13, %vm2281_vm12 }
 0xbc9   :  { %v2276_v48 = vmul.f32 %v4899_v13, %v2275_v8 }
 0xbcb   :  { %v2277_v19 = vmul.f32 0.5, %v2276_v48 }
 0xbcd   :  { %v2278_v40 = vsub.f32 1.5, %v2277_v19 }
 0xbcf   :  { %v2279_v11 = vmul.f32 %v4899_v13, %v2278_v40 }
 0xbd1   :  { %v2283_v5 = vsel %vm2282_vm4, %v4899_v13, %v2279_v11 }
 0xbd2   :  { %v2314_v28 = vmul.f32 %v2283_v5, %v6178_v31 }
 0xbd4   :  { %v2319_v38 = vmul.f32 %v4797_v33, %v2314_v28 }
 0xbd6   :  { %4563 = vmatmul.msk.f32.vlgmr.msrb.gmra.mxu3 %vm140_vm0, %v2319_v38  ;;  %4571 = vmatmul.msk.f32.vlgmr.msra.gmra.mxu0 %vm140_vm0, %v2319_v38 }
 0xbec   :  { %v2259_v51 = vpop.xlane.xlu0 %2258 }
 0xbed   :  { %v2267_v27 = vmul.f32 %v2259_v51, %v5330_v26 }
 0xbef   :  { %v2271_v55 = vadd.f32 1e-05, %v2267_v27 }
 0xbf1   :  { %4900 = vrsqrt.f32 %v2271_v55  ;;  %vm2290_vm6 = vweird.f32 %v2271_v55 }
 0xbf7   :  { %v4901_v4 = vpop.eup %4900 }
 0xbf8   :  { %v2285_v56 = vmul.f32 %v4901_v4, %v2271_v55  ;;  %vm2291_vm5 = vweird.f32 %v4901_v4 }
 0xbf9   :  { %vm2292_vm7 = vmor %vm2290_vm6, %vm2291_vm5 }
 0xbfa   :  { %v2286_v63 = vmul.f32 %v4901_v4, %v2285_v56 }
 0xbfc   :  { %v2287_v57 = vmul.f32 0.5, %v2286_v63 }
 0xbfe   :  { %v2288_v12 = vsub.f32 1.5, %v2287_v57  ;;  %v5014_v57 = vld [vmem:[%s7075_s1] sm:$0xff] }
 0xc00   :  { %v2289_v17 = vmul.f32 %v4901_v4, %v2288_v12 }
 0xc02   :  { %v2262_v22 = vpop.xlane.xlu2 %2261  ;;  %v2293_v45 = vsel %vm2292_vm7, %v4901_v4, %v2289_v17 }
 0xc03   :  { %v2268_v29 = vmul.f32 %v2262_v22, %v5330_v26  ;;  %v2315_v10 = vmul.f32 %v2293_v45, %v6184_v61 }
 0xc05   :  { %v2272_v2 = vadd.f32 1e-05, %v2268_v29  ;;  %v2320_v53 = vmul.f32 %v4797_v33, %v2315_v10  ;;  %v5015_v29 = vld [vmem:[%s7075_s1 + $0x10] sm:$0xff] }
 0xc07   :  { %4902 = vrsqrt.f32 %v2272_v2  ;;  %4564 = vmatmul.msk.f32.gmra.mxu3 %vm140_vm0, %v2320_v53  ;;  %4572 = vmatmul.msk.f32.gmra.mxu0 %vm140_vm0, %v2320_v53  ;;  %vm2300_vm9 = vweird.f32 %v2272_v2 }
 0xc0a   :  { %v2265_v42 = vpop.xlane.xlu1 %2264 }
 0xc0b   :  { %v2269_v43 = vmul.f32 %v2265_v42, %v5330_v26  ;;  %v5016_v42 = vld [vmem:[%s7075_s1 + $0x20] sm:$0xff] }
 0xc0d   :  { %v4903_v50 = vpop.eup %4902  ;;  %v2273_v25 = vadd.f32 1e-05, %v2269_v43 }
 0xc0e   :  { %v2295_v23 = vmul.f32 %v4903_v50, %v2272_v2  ;;  %vm2301_vm8 = vweird.f32 %v4903_v50 }
 0xc0f   :  { %4904 = vrsqrt.f32 %v2273_v25  ;;  %vm2302_vm10 = vmor %vm2300_vm9, %vm2301_vm8  ;;  %vm2310_vm12 = vweird.f32 %v2273_v25 }
 0xc10   :  { %v2296_v18 = vmul.f32 %v4903_v50, %v2295_v23  ;;  %v5017_v23 = vld [vmem:[%s7075_s1 + $0x30] sm:$0xff] }
 0xc12   :  { %v2297_v15 = vmul.f32 0.5, %v2296_v18 }
 0xc14   :  { %v2298_v54 = vsub.f32 1.5, %v2297_v15 }
 0xc15   :  { %v4905_v49 = vpop.eup %4904 }
 0xc16   :  { %v2299_v24 = vmul.f32 %v4903_v50, %v2298_v54  ;;  %v2305_v1 = vmul.f32 %v4905_v49, %v2273_v25  ;;  %vm2311_vm11 = vweird.f32 %v4905_v49 }
 0xc17   :  { %vm2312_vm13 = vmor %vm2310_vm12, %vm2311_vm11 }
 0xc18   :  { %v2306_v9 = vmul.f32 %v4905_v49, %v2305_v1  ;;  %v2303_v21 = vsel %vm2302_vm10, %v4903_v50, %v2299_v24 }
 0xc19   :  { %v2316_v14 = vmul.f32 %v2303_v21, %v6190_v41 }
 0xc1a   :  { %v2307_v52 = vmul.f32 0.5, %v2306_v9 }
 0xc1b   :  { %v2321_v0 = vmul.f32 %v4797_v33, %v2316_v14 }
 0xc1c   :  { %v2308_v36 = vsub.f32 1.5, %v2307_v52 }
 0xc1d   :  { %4565 = vmatmul.msk.f32.gmra.mxu3 %vm140_vm0, %v2321_v0  ;;  %4573 = vmatmul.msk.f32.gmra.mxu0 %vm140_vm0, %v2321_v0 }
 0xc1e   :  { %v2309_v39 = vmul.f32 %v4905_v49, %v2308_v36 }
 0xc20   :  { %v2313_v3 = vsel %vm2312_vm13, %v4905_v49, %v2309_v39 }
 0xc21   :  { %v2317_v7 = vmul.f32 %v2313_v3, %v6196_v16 }
 0xc23   :  { %v2322_v32 = vmul.f32 %v4797_v33, %v2317_v7 }
 0xc25   :  { %4566 = vmatmul.msk.f32.gmra.mxu3 %vm140_vm0, %v2322_v32  ;;  %4574 = vmatmul.msk.f32.gmra.mxu0 %vm140_vm0, %v2322_v32 }
 0xc53   :  { %v2439_v5 = vpop.f32.mrf.mxu0 }
 0xc59   :  { %v2362_v47 = vpop.f32.mrf.mxu3 }
 0xc5a   :  { %v2374_v13 = vmul.f32 %v2362_v47, %v5376_v20 }
 0xc5c   :  { %4567 = vmatmul.msk.f32.vlgmr.msra.gmra.mxu1 %vm288_vm14, %v2374_v13 }
 0xc8a   :  { %v2365_v8 = vpop.f32.mrf.mxu3 }
 0xc8b   :  { %v2375_v48 = vmul.f32 %v2365_v8, %v5414_v30  ;;  %v2442_v30 = vpop.f32.mrf.mxu0 }
 0xc8d   :  { %4568 = vmatmul.msk.f32.gmra.mxu1 %vm288_vm14, %v2375_v48 }
 0xca0   :  { %v2368_v19 = vpop.f32.mrf.mxu3 }
 0xca1   :  { %v2376_v40 = vmul.f32 %v2368_v19, %v5423_v34  ;;  %v2445_v34 = vpop.f32.mrf.mxu0 }
 0xca3   :  { %4569 = vmatmul.msk.f32.gmra.mxu1 %vm288_vm14, %v2376_v40 }
 0xca8   :  { %v2371_v11 = vpop.f32.mrf.mxu3 }
 0xca9   :  { %v2377_v33 = vmul.f32 %v2371_v11, %v5427_v37  ;;  %v2448_v37 = vpop.f32.mrf.mxu0 }
 0xcab   :  { %4570 = vmatmul.msk.f32.gmra.mxu1 %vm288_vm14, %v2377_v33 }
 0xcd9   :  { %v2410_v28 = vpop.f32.mrf.mxu1 }
 0xcda   :  { %v6249_v20 = vadd.f32 %v2439_v5, %v2410_v28 }
 0xcdc   :  { %4575 = vmatmul.msk.f32.vlgmr.msra.gmra.mxu2 %vm363_vm15, %v6249_v20  ;;  %v2451_v12 = vmul.f32 %v5014_v57, %v6249_v20 }
 0xd0a   :  { %v2413_v38 = vpop.f32.mrf.mxu1 }
 0xd0b   :  { %v6253_v51 = vadd.f32 %v2442_v30, %v2413_v38 }
 0xd0d   :  { %4576 = vmatmul.msk.f32.gmra.mxu2 %vm363_vm15, %v6253_v51  ;;  %v2452_v10 = vmul.f32 %v5015_v29, %v6253_v51 }
 0xd20   :  { %v2416_v27 = vpop.f32.mrf.mxu1 }
 0xd21   :  { %v6257_v55 = vadd.f32 %v2445_v34, %v2416_v27 }
 0xd23   :  { %4577 = vmatmul.msk.f32.gmra.mxu2 %vm363_vm15, %v6257_v55  ;;  %v2453_v43 = vmul.f32 %v5016_v42, %v6257_v55 }
 0xd28   :  { %v2419_v4 = vpop.f32.mrf.mxu1 }
 0xd29   :  { %v6261_v56 = vadd.f32 %v2448_v37, %v2419_v4 }
 0xd2b   :  { %4578 = vmatmul.msk.f32.gmra.mxu2 %vm363_vm15, %v6261_v56  ;;  %v2454_v18 = vmul.f32 %v5017_v23, %v6261_v56 }
 0xd5f   :  { %v2484_v63 = vpop.f32.mrf.mxu2 }
 0xd60   :  { %v2496_v17 = vmul.f32 %v2484_v63, %v5479_v58 }
 0xd62   :  { %v6270_v22 = vadd.f32 %v2496_v17, %v2451_v12 }
 0xd64   :  { %2508 = vrot.lane.b32.xlu2 %v6270_v22, %s5188_s21  ;;  %2524 = vrot.lane.b32.xlu0 %v6270_v22, %s5186_s19 }
 0xd6c   :  { %2516 = vrot.lane.b32.xlu0 %v6270_v22, %s5187_s3 }
 0xd90   :  { %v2487_v45 = vpop.f32.mrf.mxu2 }
 0xd91   :  { %v2497_v58 = vmul.f32 %v2487_v45, %v5481_v59 }
 0xd93   :  { %v6283_v2 = vadd.f32 %v2497_v58, %v2452_v10 }
 0xd95   :  { %2510 = vrot.lane.b32.xlu2 %v6283_v2, %s5188_s21  ;;  %2526 = vrot.lane.b32.xlu1 %v6283_v2, %s5186_s19  ;;  %v4729_v54 = vpack.i.bf16 %v6283_v2, %v6270_v22 }
 0xd9d   :  { %2518 = vrot.lane.b32.xlu1 %v6283_v2, %s5187_s3 }
 0xda6   :  { %v2490_v53 = vpop.f32.mrf.mxu2 }
 0xda7   :  { %v2498_v59 = vmul.f32 %v2490_v53, %v5483_v60 }
 0xda9   :  { %v6296_v50 = vadd.f32 %v2498_v59, %v2453_v43 }
 0xdab   :  { %2520 = vrot.lane.b32.xlu1 %v6296_v50, %s5187_s3  ;;  %2512 = vrot.lane.b32.xlu2 %v6296_v50, %s5188_s21 }
 0xdac   :  { %2528 = vrot.lane.b32.xlu0 %v6296_v50, %s5186_s19 }
 0xdae   :  { %v2493_v25 = vpop.f32.mrf.mxu2 }
 0xdaf   :  { %v2499_v60 = vmul.f32 %v2493_v25, %v5486_v62 }
 0xdb1   :  { %v6309_v15 = vadd.f32 %v2499_v60, %v2454_v18 }
 0xdb3   :  { %4730 = vrot.lane.b32.xlu1 %v4729_v54, %s5184_s12  ;;  %2514 = vrot.lane.b32.xlu2 %v6309_v15, %s5188_s21  ;;  %v4734_v49 = vpack.i.bf16 %v6309_v15, %v6296_v50 }
 0xdb4   :  { %2530 = vrot.lane.b32.xlu0 %v6309_v15, %s5186_s19 }
 0xdbb   :  { %4735 = vrot.lane.b32.xlu2 %v4734_v49, %s5184_s12 }
 0xdbc   :  { %2522 = vrot.lane.b32.xlu0 %v6309_v15, %s5187_s3 }
 0xdbe   :  { %v6325_v62 = vpop.permute.xlu2 %2508 }
 0xdc3   :  { %2532 = vrot.lane.b32.xlu2 %v6249_v20, %s5188_s21 }
 0xdd6   :  { %v6327_v24 = vpop.permute.xlu0 %2524 }
 0xdd7   :  { %v4739_v1 = vpack.i.bf16 %v6325_v62, %v6327_v24 }
 0xdd9   :  { %4740 = vrot.lane.b32.xlu0 %v4739_v1, %s5184_s12 }
 0xdde   :  { %v6332_v9 = vpop.permute.xlu0 %2516 }
 0xdef   :  { %v6334_v21 = vpop.permute.xlu2 %2510 }
 0xe05   :  { %v6341_v0 = vpop.permute.xlu2 %2512 }
 0xe07   :  { %v6336_v14 = vpop.permute.xlu1 %2526 }
 0xe08   :  { %v4744_v52 = vpack.i.bf16 %v6332_v9, %v6336_v14 }
 0xe0a   :  { %4745 = vrot.lane.b32.xlu1 %v4744_v52, %s5184_s12 }
 0xe0d   :  { %v6360_v47 = vpop.permute.xlu2 %2514 }
 0xe0f   :  { %v6343_v36 = vpop.permute.xlu1 %2518 }
 0xe10   :  { %v4754_v39 = vpack.i.bf16 %v6341_v0, %v6343_v36 }
 0xe12   :  { %4755 = vrot.lane.b32.xlu0 %v4754_v39, %s5184_s12 }
 0xe15   :  { %v4736_v48 = vpop.permute.xlu2 %4735 }
 0xe16   :  { %v4737_v63 = vunpack.i.l.bf16 %v4736_v48  ;;  %v4738_v17 = vunpack.i.h.bf16 %v4736_v48 }
 0xe1d   :  { %v6353_v32 = vpop.permute.xlu1 %2520  ;;  %v2533_v28 = vpop.permute.xlu2 %2532 }
 0xe1e   :  { %v6348_v3 = vpop.permute.xlu0 %2528 }
 0xe1f   :  { %v4749_v7 = vpack.i.bf16 %v6348_v3, %v6334_v21 }
 0xe21   :  { %4750 = vrot.lane.b32.xlu2 %v4749_v7, %s5184_s12 }
 0xe25   :  { %v4731_v19 = vpop.permute.xlu1 %4730 }
 0xe26   :  { %v6355_v46 = vpop.permute.xlu0 %2530  ;;  %v4732_v11 = vunpack.i.l.bf16 %v4731_v19  ;;  %v4733_v38 = vunpack.i.h.bf16 %v4731_v19 }
 0xe27   :  { %v4759_v44 = vpack.i.bf16 %v6353_v32, %v6355_v46 }
 0xe29   :  { %4760 = vrot.lane.b32.xlu1 %v4759_v44, %s5184_s12 }
 0xe2e   :  { %v6362_v13 = vpop.permute.xlu0 %2522 }
 0xe2f   :  { %v4764_v8 = vpack.i.bf16 %v6362_v13, %v6360_v47 }
 0xe31   :  { %4765 = vrot.lane.b32.xlu2 %v4764_v8, %s5184_s12  ;;  %2534 = vrot.lane.b32.xlu1 %v6253_v51, %s5188_s21  ;;  %s4472_s12 = sshll.u32 %s7085_s11, 4  ;;  %s4473_s12 = int_to_ptr.hbm [resolvable:$true] %s4472_s12 }
 0xe39   :  { %2548 = vrot.lane.b32.xlu2 %v6249_v20, %s5186_s19  ;;  %2542 = vrot.lane.b32.xlu1 %v6253_v51, %s5187_s3 }
 0xe41   :  { %2544 = vrot.lane.b32.xlu2 %v6257_v55, %s5187_s3  ;;  %2536 = vrot.lane.b32.xlu1 %v6257_v55, %s5188_s21 }
 0xe49   :  { %2546 = vrot.lane.b32.xlu2 %v6261_v56, %s5187_s3  ;;  %2550 = vrot.lane.b32.xlu1 %v6253_v51, %s5186_s19 }
 0xe4b   :  { %v4741_v40 = vpop.permute.xlu0 %4740 }
 0xe4c   :  { %v4742_v33 = vunpack.i.l.bf16 %v4741_v40 }
 0xe4e   :  { %v4769_v5 = vpack.i.bf16 %v4742_v33, %v4732_v11 }
 0xe50   :  { %4770 = vxpose.xlu0.b32.start [1/4] (short) (narrow) %v4769_v5, 8  ;;  %v5020_v5 = vld [vmem:[%s7075_s1 + $0x28] sm:$0xff] }
 0xe51   :  { %3064 = vrot.lane.b32.xlu2 %v2533_v28, %s5185_s20  ;;  %2538 = vrot.lane.b32.xlu1 %v6261_v56, %s5188_s21 }
 0xe59   :  { %2554 = vrot.lane.b32.xlu1 %v6261_v56, %s5186_s19 }
 0xe61   :  { %3056 = vrot.lane.b32.xlu1 %v6249_v20, %s5185_s20 }
 0xe69   :  { %3058 = vrot.lane.b32.xlu1 %v6253_v51, %s5185_s20  ;;  %v4743_v51 = vunpack.i.h.bf16 %v4741_v40 }
 0xe71   :  { %3060 = vrot.lane.b32.xlu1 %v6257_v55, %s5185_s20 }
 0xe7b   :  { %v4751_v37 = vpop.permute.xlu2 %4750 }
 0xe7c   :  { %v4746_v30 = vpop.permute.xlu1 %4745  ;;  %v4753_v4 = vunpack.i.h.bf16 %v4751_v37  ;;  %v4752_v43 = vunpack.i.l.bf16 %v4751_v37 }
 0xe7d   :  { %v4747_v34 = vunpack.i.l.bf16 %v4746_v30  ;;  %v4748_v10 = vunpack.i.h.bf16 %v4746_v30 }
 0xe7e   :  { %v4773_v57 = vpack.i.bf16 %v4753_v4, %v4737_v63 }
 0xe7f   :  { %v4771_v27 = vpack.i.bf16 %v4747_v34, %v4733_v38  ;;  %v4782_v58 = vpack.i.bf16 %v4748_v10, %v4743_v51 }
 0xe81   :  { %4772 = vxpose.xlu0.b32.cont [2/4] (short) (narrow) %v4771_v27, 8  ;;  %v6475_v27 = vld [vmem:[%s7075_s1 + $0x38] sm:$0xff] }
 0xe84   :  { %v4756_v53 = vpop.permute.xlu0 %4755 }
 0xe85   :  { %v4757_v42 = vunpack.i.l.bf16 %v4756_v53  ;;  %v4758_v23 = vunpack.i.h.bf16 %v4756_v53 }
 0xe87   :  { %v4784_v59 = vpack.i.bf16 %v4757_v42, %v4752_v43 }
 0xe89   :  { %4774 = vxpose.xlu0.b32.cont [3/4] (short) (narrow) %v4773_v57, 8 }
 0xe8b   :  { %v4766_v60 = vpop.permute.xlu2 %4765 }
 0xe93   :  { %v2549_v39 = vpop.permute.xlu2 %2548 }
 0xe9b   :  { %v4761_v12 = vpop.permute.xlu1 %4760  ;;  %v2545_v8 = vpop.permute.xlu2 %2544 }
 0xe9c   :  { %v4762_v45 = vunpack.i.l.bf16 %v4761_v12  ;;  %v4763_v25 = vunpack.i.h.bf16 %v4761_v12 }
 0xe9e   :  { %v4775_v29 = vpack.i.bf16 %v4762_v45, %v4738_v17  ;;  %v4786_v18 = vpack.i.bf16 %v4763_v25, %v4758_v23 }
 0xea0   :  { %4776 = vxpose.xlu0.b32.end [4/4] (short) (narrow) %v4775_v29, 8 }
 0xea3   :  { %v2535_v54 = vpop.permute.xlu1 %2534 }
 0xea6   :  { %4783 = vxpose.xlu1.b32.start [1/4] (short) (narrow) %v4782_v58, 8 }
 0xeab   :  { %v2543_v49 = vpop.permute.xlu1 %2542 }
 0xeae   :  { %4785 = vxpose.xlu1.b32.cont [2/4] (short) (narrow) %v4784_v59, 8 }
 0xeb3   :  { %v2537_v1 = vpop.permute.xlu1 %2536 }
 0xeb6   :  { %4787 = vxpose.xlu1.b32.cont [3/4] (short) (narrow) %v4786_v18, 8 }
 0xebb   :  { %v2551_v52 = vpop.permute.xlu1 %2550 }
 0xebe   :  { %4789 = vxpose.xlu1.b32.end [4/4] (short) (narrow) %v4766_v60, 8 }
 0xec3   :  { %v2539_v7 = vpop.permute.xlu1 %2538 }
 0xecb   :  { %v2555_v44 = vpop.permute.xlu1 %2554 }
 0xed3   :  { %v6402_v40 = vpop.permute.xlu1 %3056 }
 0xf0e   :  { %2540 = vrot.lane.b32.xlu0 %v6249_v20, %s5187_s3 }
 0xf16   :  { %2552 = vrot.lane.b32.xlu0 %v6257_v55, %s5186_s19  ;;  %v2547_v55 = vpop.permute.xlu2 %2546 }
 0xf18   :  { %3080 = vrot.lane.b32.xlu1 %v2549_v39, %s5185_s20 }
 0xf1e   :  { %3062 = vrot.lane.b32.xlu0 %v6261_v56, %s5185_s20  ;;  %v6411_v56 = vpop.permute.xlu1 %3058 }
 0xf20   :  { %3074 = vrot.lane.b32.xlu1 %v2543_v49, %s5185_s20 }
 0xf26   :  { %3066 = vrot.lane.b32.xlu0 %v2535_v54, %s5185_s20 }
 0xf28   :  { %3076 = vrot.lane.b32.xlu1 %v2545_v8, %s5185_s20 }
 0xf2c   :  { %v4777_v20 = vpop.trf.xlu0 }
 0xf2d   :  { %v4781_v48 = vunpack.i.h.bf16 %v4777_v20  ;;  %v4778_v19 = vunpack.i.l.bf16 %v4777_v20 }
 0xf2e   :  { %3082 = vrot.lane.b32.xlu0 %v2551_v52, %s5185_s20 }
 0xf2f   :  { %2755 = vmatpush.msra.mxu3 %v4778_v19  ;;  %2866 = vmatpush.msrb.mxu2 %v4781_v48 }
 0xf30   :  { %3070 = vrot.lane.b32.xlu1 %v2539_v7, %s5185_s20  ;;  %4579 = vmatmul.msk.f32.vlgmr.msra.gmra.mxu3 %vm657_vm1, %v6270_v22  ;;  %v6422_v22 = vpop.permute.xlu1 %3060  ;;  %v6513_v7 = vpop.permute.xlu2 %3064 }
 0xf31   :  { %4591 = vmatmul.msk.f32.vlgmr.msrb.gmra.mxu2 %vm657_vm1, %v6327_v24 }
 0xf36   :  { %3086 = vrot.lane.b32.xlu0 %v2555_v44, %s5185_s20 }
 0xf38   :  { %3078 = vrot.lane.b32.xlu1 %v2547_v55, %s5185_s20  ;;  %4580 = vmatmul.msk.f32.gmra.mxu3 %vm657_vm1, %v6283_v2 }
 0xf39   :  { %4592 = vmatmul.msk.f32.gmra.mxu2 %vm657_vm1, %v6336_v14 }
 0xf40   :  { %4581 = vmatmul.msk.f32.gmra.mxu3 %vm657_vm1, %v6296_v50 }
 0xf41   :  { %4593 = vmatmul.msk.f32.gmra.mxu2 %vm657_vm1, %v6348_v3 }
 0xf48   :  { %4582 = vmatmul.msk.f32.gmra.mxu3 %vm657_vm1, %v6309_v15 }
 0xf49   :  { %4594 = vmatmul.msk.f32.gmra.mxu2 %vm657_vm1, %v6355_v46  ;;  %v5019_v46 = vld [vmem:[%s7075_s1 + $0x18] sm:$0xff] }
 0xf4a   :  { %v4790_v24 = vpop.trf.xlu1 }
 0xf4b   :  { %v4794_v11 = vunpack.i.h.bf16 %v4790_v24  ;;  %v4791_v2 = vunpack.i.l.bf16 %v4790_v24 }
 0xf4d   :  { %2792 = vmatpush.msrb.mxu1 %v4791_v2  ;;  %2829 = vmatpush.msrb.mxu0 %v4794_v11 }
 0xf4e   :  { %4583 = vmatmul.msk.f32.vlgmr.msrb.gmra.mxu1 %vm657_vm1, %v6325_v62  ;;  %4587 = vmatmul.msk.f32.vlgmr.msrb.gmra.mxu0 %vm657_vm1, %v6332_v9 }
 0xf56   :  { %4584 = vmatmul.msk.f32.gmra.mxu1 %vm657_vm1, %v6334_v21  ;;  %4588 = vmatmul.msk.f32.gmra.mxu0 %vm657_vm1, %v6343_v36  ;;  %v5018_v21 = vld [vmem:[%s7075_s1 + $0x8] sm:$0xff] }
 0xf5e   :  { %4585 = vmatmul.msk.f32.gmra.mxu1 %vm657_vm1, %v6341_v0  ;;  %4589 = vmatmul.msk.f32.gmra.mxu0 %vm657_vm1, %v6353_v32 }
 0xf66   :  { %4586 = vmatmul.msk.f32.gmra.mxu1 %vm657_vm1, %v6360_v47  ;;  %4590 = vmatmul.msk.f32.gmra.mxu0 %vm657_vm1, %v6362_v13 }
 0xf80   :  { %v2541_v50 = vpop.permute.xlu0 %2540 }
 0xf81   :  { %3072 = vrot.lane.b32.xlu2 %v2541_v50, %s5185_s20 }
 0xf88   :  { %v2553_v15 = vpop.permute.xlu0 %2552 }
 0xf89   :  { %3068 = vrot.lane.b32.xlu2 %v2537_v1, %s5185_s20 }
 0xf91   :  { %3084 = vrot.lane.b32.xlu2 %v2553_v15, %s5185_s20  ;;  %v6532_v15 = vpop.permute.xlu0 %3062 }
 0xfb3   :  { %v2757_v62 = vpop.f32.mrf.mxu3 }
 0xfb4   :  { %v2868_v9 = vpop.f32.mrf.mxu2  ;;  %v6450_v14 = vadd.f32 %v5018_v21, %v2757_v62 }
 0xfb5   :  { %v6452_v0 = vadd.f32 %v5018_v21, %v2868_v9 }
 0xfb6   :  { %v2880_v3 = vsel %vm140_vm0, %v6450_v14, -inf }
 0xfb7   :  { %v2916_v36 = vsel %vm140_vm0, %v6452_v0, -inf }
 0xfb8   :  { %2917 = vmax.xlane.f32.xlu0 %v2916_v36  ;;  %v6535_v36 = vpop.permute.xlu0 %3066 }
 0xfba   :  { %2881 = vmax.xlane.f32.xlu2 %v2880_v3 }
 0xfbb   :  { %v2760_v32 = vpop.f32.mrf.mxu3 }
 0xfbc   :  { %v6461_v47 = vadd.f32 %v5019_v46, %v2760_v32  ;;  %v2871_v18 = vpop.f32.mrf.mxu2 }
 0xfbd   :  { %v6503_v60 = vadd.f32 %v5019_v46, %v2871_v18 }
 0xfbe   :  { %v2883_v13 = vsel %vm140_vm0, %v6461_v47, -inf }
 0xfbf   :  { %v2919_v54 = vsel %vm140_vm0, %v6503_v60, -inf }
 0xfc2   :  { %2884 = vmax.xlane.f32.xlu2 %v2883_v13 }
 0xfc3   :  { %v2763_v33 = vpop.f32.mrf.mxu3 }
 0xfc4   :  { %v6468_v28 = vadd.f32 %v5020_v5, %v2763_v33  ;;  %v2874_v8 = vpop.f32.mrf.mxu2 }
 0xfc5   :  { %v6517_v20 = vadd.f32 %v5020_v5, %v2874_v8 }
 0xfc6   :  { %v2886_v30 = vsel %vm140_vm0, %v6468_v28, -inf }
 0xfc7   :  { %v2922_v19 = vsel %vm140_vm0, %v6517_v20, -inf }
 0xfca   :  { %2887 = vmax.xlane.f32.xlu2 %v2886_v30 }
 0xfcb   :  { %v2766_v38 = vpop.f32.mrf.mxu3  ;;  %v2794_v34 = vpop.f32.mrf.mxu1 }
 0xfcc   :  { %v6478_v37 = vadd.f32 %v6475_v27, %v2766_v38  ;;  %v6482_v57 = vadd.f32 %v5018_v21, %v2794_v34  ;;  %v2831_v17 = vpop.f32.mrf.mxu0 }
 0xfcd   :  { %v6486_v29 = vadd.f32 %v5018_v21, %v2831_v17 }
 0xfce   :  { %v2889_v4 = vsel %vm140_vm0, %v6478_v37, -inf  ;;  %v2892_v12 = vsel %vm140_vm0, %v6482_v57, -inf }
 0xfcf   :  { %v2904_v10 = vsel %vm140_vm0, %v6486_v29, -inf }
 0xfd2   :  { %2890 = vmax.xlane.f32.xlu2 %v2889_v4 }
 0xfd3   :  { %v2797_v63 = vpop.f32.mrf.mxu1 }
 0xfd4   :  { %v6493_v53 = vadd.f32 %v5019_v46, %v2797_v63  ;;  %v2834_v59 = vpop.f32.mrf.mxu0 }
 0xfd5   :  { %v6499_v25 = vadd.f32 %v5019_v46, %v2834_v59 }
 0xfd6   :  { %v2895_v43 = vsel %vm140_vm0, %v6493_v53, -inf }
 0xfd7   :  { %v2907_v23 = vsel %vm140_vm0, %v6499_v25, -inf }
 0xfda   :  { %2893 = vmax.xlane.f32.xlu2 %v2892_v12 }
 0xfdb   :  { %v2800_v45 = vpop.f32.mrf.mxu1  ;;  %v6519_v48 = vpop.permute.xlu2 %3072 }
 0xfdc   :  { %v6507_v49 = vadd.f32 %v5020_v5, %v2800_v45  ;;  %v2837_v52 = vpop.f32.mrf.mxu0 }
 0xfdd   :  { %v6511_v39 = vadd.f32 %v5020_v5, %v2837_v52  ;;  %v6542_v5 = vpop.permute.xlu0 %3082 }
 0xfde   :  { %v2898_v1 = vsel %vm140_vm0, %v6507_v49, -inf }
 0xfdf   :  { %v2910_v44 = vsel %vm140_vm0, %v6511_v39, -inf }
 0xfe2   :  { %2905 = vmax.xlane.f32.xlu2 %v2904_v10 }
 0xfe3   :  { %v2803_v51 = vpop.f32.mrf.mxu1  ;;  %v6528_v2 = vpop.permute.xlu2 %3068 }
 0xfe4   :  { %v6491_v58 = vadd.f32 %v6475_v27, %v2803_v51  ;;  %v2840_v55 = vpop.f32.mrf.mxu0 }
 0xfe5   :  { %v6524_v24 = vadd.f32 %v6475_v27, %v2840_v55  ;;  %v6549_v63 = vpop.permute.xlu0 %3086 }
 0xfe6   :  { %v2901_v42 = vsel %vm140_vm0, %v6491_v58, -inf }
 0xfe7   :  { %2902 = vmax.xlane.f32.xlu0 %v2901_v42  ;;  %v2913_v11 = vsel %vm140_vm0, %v6524_v24, -inf }
 0xfea   :  { %2896 = vmax.xlane.f32.xlu2 %v2895_v43 }
 0xfeb   :  { %v6530_v50 = vpop.permute.xlu2 %3084 }
 0xff2   :  { %2908 = vmax.xlane.f32.xlu2 %v2907_v23 }
 0xffa   :  { %2920 = vmax.xlane.f32.xlu2 %v2919_v54 }
0x1002   :  { %2899 = vmax.xlane.f32.xlu2 %v2898_v1 }
0x100a   :  { %2911 = vmax.xlane.f32.xlu2 %v2910_v44 }
0x1012   :  { %2923 = vmax.xlane.f32.xlu2 %v2922_v19 }
0x101a   :  { %2914 = vmax.xlane.f32.xlu2 %v2913_v11 }
0x102b   :  { %v2918_v43 = vpop.xlane.xlu0 %2917 }
0x102d   :  { %v2882_v62 = vpop.xlane.xlu2 %2881 }
0x102e   :  { %v2928_v9 = vsub.f32 %v6450_v14, %v2882_v62 }
0x1030   :  { %v2944_v21 = vmul.f32 1.442695, %v2928_v9 }
0x1032   :  { %4906 = vpow2.f32 %v2944_v21 }
0x1035   :  { %v2885_v3 = vpop.xlane.xlu2 %2884 }
0x1036   :  { %v2929_v32 = vsub.f32 %v6461_v47, %v2885_v3  ;;  %v2877_v47 = vpop.f32.mrf.mxu2 }
0x1037   :  { %v6552_v12 = vadd.f32 %v6475_v27, %v2877_v47 }
0x1038   :  { %v6538_v46 = vpop.eup %4906  ;;  %v2946_v13 = vmul.f32 1.442695, %v2929_v32 }
0x1039   :  { %v2976_v33 = vsel %vm140_vm0, %v6538_v46, 0.0  ;;  %v2925_v51 = vsel %vm140_vm0, %v6552_v12, -inf }
0x103a   :  { %4908 = vpow2.f32 %v2946_v13  ;;  %2977 = vadd.xlane.f32.xlu1 %v2976_v33 }
0x103d   :  { %v2888_v30 = vpop.xlane.xlu2 %2887 }
0x103e   :  { %v2930_v14 = vsub.f32 %v6468_v28, %v2888_v30 }
0x1040   :  { %v6545_v38 = vpop.eup %4908  ;;  %v2948_v34 = vmul.f32 1.442695, %v2930_v14 }
0x1041   :  { %v2979_v4 = vsel %vm140_vm0, %v6545_v38, 0.0 }
0x1042   :  { %4910 = vpow2.f32 %v2948_v34  ;;  %2980 = vadd.xlane.f32.xlu1 %v2979_v4 }
0x1045   :  { %v2891_v17 = vpop.xlane.xlu2 %2890 }
0x1046   :  { %v2931_v45 = vsub.f32 %v6478_v37, %v2891_v17  ;;  %v2940_v37 = vsub.f32 %v6452_v0, %v2918_v43 }
0x1048   :  { %v6555_v10 = vpop.eup %4910  ;;  %v2950_v28 = vmul.f32 1.442695, %v2931_v45  ;;  %v2968_v1 = vmul.f32 1.442695, %v2940_v37 }
0x1049   :  { %v2982_v42 = vsel %vm140_vm0, %v6555_v10, 0.0 }
0x104a   :  { %4912 = vpow2.f32 %v2950_v28  ;;  %2926 = vmax.xlane.f32.xlu1 %v2925_v51  ;;  %2983 = vadd.xlane.f32.xlu0 %v2982_v42 }
0x104d   :  { %v2894_v59 = vpop.xlane.xlu2 %2893 }
0x104e   :  { %v2932_v27 = vsub.f32 %v6482_v57, %v2894_v59 }
0x1050   :  { %v6562_v23 = vpop.eup %4912  ;;  %v2952_v18 = vmul.f32 1.442695, %v2932_v27 }
0x1051   :  { %v2985_v54 = vsel %vm140_vm0, %v6562_v23, 0.0 }
0x1052   :  { %4914 = vpow2.f32 %v2952_v18  ;;  %2986 = vadd.xlane.f32.xlu2 %v2985_v54 }
0x1053   :  { %4916 = vpow2.f32 %v2968_v1 }
0x1055   :  { %v2906_v52 = vpop.xlane.xlu2 %2905 }
0x1056   :  { %v2936_v44 = vsub.f32 %v6486_v29, %v2906_v52 }
0x1058   :  { %v6568_v8 = vpop.eup %4914  ;;  %v2960_v19 = vmul.f32 1.442695, %v2936_v44 }
0x1059   :  { %v2988_v57 = vsel %vm140_vm0, %v6568_v8, 0.0  ;;  %v6572_v55 = vpop.eup %4916 }
0x105a   :  { %4918 = vpow2.f32 %v2960_v19  ;;  %2989 = vadd.xlane.f32.xlu0 %v2988_v57  ;;  %v3012_v29 = vsel %vm140_vm0, %v6572_v55, 0.0 }
0x105d   :  { %v2897_v0 = vpop.xlane.xlu2 %2896 }
0x105e   :  { %v2933_v11 = vsub.f32 %v6493_v53, %v2897_v0 }
0x1060   :  { %v6575_v62 = vpop.eup %4918  ;;  %v2954_v9 = vmul.f32 1.442695, %v2933_v11 }
0x1061   :  { %v3000_v21 = vsel %vm140_vm0, %v6575_v62, 0.0 }
0x1062   :  { %4920 = vpow2.f32 %v2954_v9  ;;  %3013 = vadd.xlane.f32.xlu0 %v3012_v29  ;;  %3001 = vadd.xlane.f32.xlu2 %v3000_v21 }
0x1065   :  { %v2909_v3 = vpop.xlane.xlu2 %2908 }
0x1066   :  { %v2937_v32 = vsub.f32 %v6499_v25, %v2909_v3 }
0x1068   :  { %v6582_v13 = vpop.eup %4920  ;;  %v2962_v33 = vmul.f32 1.442695, %v2937_v32 }
0x1069   :  { %v2991_v53 = vsel %vm140_vm0, %v6582_v13, 0.0 }
0x106a   :  { %4922 = vpow2.f32 %v2962_v33  ;;  %2992 = vadd.xlane.f32.xlu0 %v2991_v53 }
0x106d   :  { %v2921_v30 = vpop.xlane.xlu2 %2920 }
0x106e   :  { %v2941_v14 = vsub.f32 %v6503_v60, %v2921_v30  ;;  %v6596_v60 = vpop.permute.xlu1 %3080 }
0x1070   :  { %v6587_v34 = vpop.eup %4922  ;;  %v2970_v4 = vmul.f32 1.442695, %v2941_v14 }
0x1071   :  { %v3003_v47 = vsel %vm140_vm0, %v6587_v34, 0.0 }
0x1072   :  { %4924 = vpow2.f32 %v2970_v4  ;;  %3004 = vadd.xlane.f32.xlu0 %v3003_v47 }
0x1075   :  { %v2900_v25 = vpop.xlane.xlu2 %2899 }
0x1076   :  { %v2934_v17 = vsub.f32 %v6507_v49, %v2900_v25  ;;  %v2903_v49 = vpop.xlane.xlu0 %2902  ;;  %v6604_v1 = vpop.permute.xlu1 %3074 }
0x1077   :  { %v2935_v44 = vsub.f32 %v6491_v58, %v2903_v49 }
0x1078   :  { %v6592_v45 = vpop.eup %4924  ;;  %v2956_v28 = vmul.f32 1.442695, %v2934_v17 }
0x1079   :  { %v3015_v51 = vsel %vm140_vm0, %v6592_v45, 0.0  ;;  %v2958_v57 = vmul.f32 1.442695, %v2935_v44 }
0x107a   :  { %4926 = vpow2.f32 %v2956_v28  ;;  %3016 = vadd.xlane.f32.xlu1 %v3015_v51 }
0x107d   :  { %v2912_v42 = vpop.xlane.xlu2 %2911 }
0x107e   :  { %v2938_v43 = vsub.f32 %v6511_v39, %v2912_v42  ;;  %v3077_v29 = vpop.permute.xlu1 %3076 }
0x1080   :  { %v6599_v59 = vpop.eup %4926  ;;  %v2964_v27 = vmul.f32 1.442695, %v2938_v43 }
0x1081   :  { %v2994_v37 = vsel %vm140_vm0, %v6599_v59, 0.0 }
0x1082   :  { %4928 = vpow2.f32 %v2964_v27  ;;  %2995 = vadd.xlane.f32.xlu2 %v2994_v37 }
0x1085   :  { %v2924_v18 = vpop.xlane.xlu2 %2923 }
0x1086   :  { %v2942_v54 = vsub.f32 %v6517_v20, %v2924_v18  ;;  %v3071_v33 = vpop.permute.xlu1 %3070 }
0x1088   :  { %v6606_v52 = vpop.eup %4928  ;;  %v2972_v19 = vmul.f32 1.442695, %v2942_v54 }
0x1089   :  { %v3006_v39 = vsel %vm140_vm0, %v6606_v52, 0.0 }
0x108a   :  { %4930 = vpow2.f32 %v2972_v19  ;;  %3007 = vadd.xlane.f32.xlu1 %v3006_v39 }
0x108b   :  { %4932 = vpow2.f32 %v2958_v57 }
0x108d   :  { %v2915_v0 = vpop.xlane.xlu2 %2914 }
0x108e   :  { %v2939_v11 = vsub.f32 %v6524_v24, %v2915_v0  ;;  %v3079_v53 = vpop.permute.xlu1 %3078 }
0x1090   :  { %v6612_v9 = vpop.eup %4930  ;;  %v2966_v20 = vmul.f32 1.442695, %v2939_v11 }
0x1091   :  { %v3018_v21 = vsel %vm140_vm0, %v6612_v9, 0.0  ;;  %v6616_v58 = vpop.eup %4932 }
0x1092   :  { %4934 = vpow2.f32 %v2966_v20  ;;  %3019 = vadd.xlane.f32.xlu2 %v3018_v21  ;;  %v2997_v32 = vsel %vm140_vm0, %v6616_v58, 0.0 }
0x1098   :  { %v6618_v3 = vpop.eup %4934 }
0x1099   :  { %v3009_v24 = vsel %vm140_vm0, %v6618_v3, 0.0 }
0x109a   :  { %2998 = vadd.xlane.f32.xlu2 %v2997_v32  ;;  %3010 = vadd.xlane.f32.xlu1 %v3009_v24 }
0x10ad   :  { %v2978_v30 = vpop.xlane.xlu1 %2977 }
0x10b5   :  { %v2981_v14 = vpop.xlane.xlu1 %2980 }
0x10bd   :  { %v2927_v4 = vpop.xlane.xlu1 %2926  ;;  %v2984_v17 = vpop.xlane.xlu0 %2983 }
0x10be   :  { %v2943_v47 = vsub.f32 %v6552_v12, %v2927_v4 }
0x10c0   :  { %v2974_v25 = vmul.f32 1.442695, %v2943_v47 }
0x10c2   :  { %4936 = vpow2.f32 %v2974_v25 }
0x10c3   :  { %3136 = vxpose.xlu2.b32.start [1/4] (short) (narrow) %v6513_v7, 8 }
0x10c5   :  { %v2987_v28 = vpop.xlane.xlu2 %2986 }
0x10c6   :  { %4938 = vrcp.f32 %v2987_v28 }
0x10c7   :  { %4940 = vrcp.f32 %v2984_v17 }
0x10c8   :  { %v6626_v51 = vpop.eup %4936  ;;  %4942 = vrcp.f32 %v2981_v14 }
0x10c9   :  { %v3021_v42 = vsel %vm140_vm0, %v6626_v51, 0.0  ;;  %4944 = vrcp.f32 %v2978_v30 }
0x10ca   :  { %3022 = vadd.xlane.f32.xlu0 %v3021_v42 }
0x10cb   :  { %3137 = vxpose.xlu2.b32.cont [2/4] (short) (narrow) %v6535_v36, 8 }
0x10cc   :  { %v4939_v43 = vpop.eup %4938 }
0x10cd   :  { %v3043_v12 = vmul.f32 %v4939_v43, %v6562_v23  ;;  %v4941_v27 = vpop.eup %4940 }
0x10ce   :  { %v3042_v7 = vmul.f32 %v4941_v27, %v6555_v10  ;;  %v4943_v37 = vpop.eup %4942 }
0x10cf   :  { %4595 = vmatpush.xpose.msk.msrb.mxu3 %vm140_vm0, %v3043_v12  ;;  %v3041_v49 = vmul.f32 %v4943_v37, %v6545_v38  ;;  %v4945_v36 = vpop.eup %4944 }
0x10d0   :  { %v3040_v23 = vmul.f32 %v4945_v36, %v6538_v46 }
0x10d3   :  { %3138 = vxpose.xlu2.b32.cont [3/4] (short) (narrow) %v6528_v2, 8  ;;  %4596 = vmatpush.xpose.msk.msrb.mxu3 %vm140_vm0, %v3042_v7 }
0x10d4   :  { %3104 = vxpose.xlu1.b32.start [1/4] (short) (narrow) %v6402_v40, 8  ;;  %v2990_v40 = vpop.xlane.xlu0 %2989 }
0x10d5   :  { %v3002_v2 = vpop.xlane.xlu2 %3001 }
0x10d7   :  { %4597 = vmatpush.xpose.msk.msrb.mxu3 %vm140_vm0, %v3041_v49 }
0x10db   :  { %3139 = vxpose.xlu2.b32.end [4/4] (short) (narrow) %v3071_v33, 8  ;;  %4598 = vmatpush.xpose.msk.msrb.mxu3 %vm140_vm0, %v3040_v23 }
0x10dc   :  { %3105 = vxpose.xlu1.b32.cont [2/4] (short) (narrow) %v6411_v56, 8  ;;  %v3014_v46 = vpop.xlane.xlu0 %3013 }
0x10e3   :  { %3200 = vxpose.xlu2.b32.start [1/4] (short) (narrow) %v6596_v60, 8 }
0x10e4   :  { %3106 = vxpose.xlu1.b32.cont [3/4] (short) (narrow) %v6422_v22, 8  ;;  %v2993_v60 = vpop.xlane.xlu0 %2992 }
0x10eb   :  { %3201 = vxpose.xlu2.b32.cont [2/4] (short) (narrow) %v6542_v5, 8 }
0x10ec   :  { %3107 = vxpose.xlu1.b32.end [4/4] (short) (narrow) %v6532_v15, 8 }
0x10ed   :  { %v3017_v56 = vpop.xlane.xlu1 %3016 }
0x10f3   :  { %3168 = vxpose.xlu0.b32.start [1/4] (short) (narrow) %v6519_v48, 8  ;;  %3202 = vxpose.xlu2.b32.cont [3/4] (short) (narrow) %v6530_v50, 8  ;;  %v3005_v48 = vpop.xlane.xlu0 %3004 }
0x10f5   :  { %v2996_v38 = vpop.xlane.xlu2 %2995 }
0x10fb   :  { %3169 = vxpose.xlu0.b32.cont [2/4] (short) (narrow) %v6604_v1, 8  ;;  %3203 = vxpose.xlu2.b32.end [4/4] (short) (narrow) %v6549_v63, 8 }
0x10fd   :  { %v3008_v10 = vpop.xlane.xlu1 %3007 }
0x1103   :  { %3170 = vxpose.xlu0.b32.cont [3/4] (short) (narrow) %v3077_v29, 8 }
0x1105   :  { %v3020_v22 = vpop.xlane.xlu2 %3019 }
0x110b   :  { %3171 = vxpose.xlu0.b32.end [4/4] (short) (narrow) %v3079_v53, 8 }
0x110d   :  { %v3011_v5 = vpop.xlane.xlu1 %3010  ;;  %v2999_v15 = vpop.xlane.xlu2 %2998 }
0x110e   :  { %4946 = vrcp.f32 %v3011_v5 }
0x110f   :  { %4948 = vrcp.f32 %v2999_v15 }
0x1110   :  { %4950 = vrcp.f32 %v3008_v10 }
0x1111   :  { %4952 = vrcp.f32 %v2996_v38 }
0x1112   :  { %4954 = vrcp.f32 %v3005_v48 }
0x1113   :  { %4956 = vrcp.f32 %v2993_v60 }
0x1114   :  { %v4947_v50 = vpop.eup %4946  ;;  %4958 = vrcp.f32 %v3002_v2 }
0x1115   :  { %v4949_v18 = vpop.eup %4948  ;;  %v3051_v63 = vmul.f32 %v4947_v50, %v6618_v3  ;;  %4960 = vrcp.f32 %v2990_v40 }
0x1116   :  { %v4951_v54 = vpop.eup %4950  ;;  %v3047_v1 = vmul.f32 %v4949_v18, %v6616_v58 }
0x1117   :  { %v4953_v44 = vpop.eup %4952  ;;  %4605 = vmatpush.xpose.msk.msra.mxu1 %vm140_vm0, %v3051_v63  ;;  %v3050_v19 = vmul.f32 %v4951_v54, %v6606_v52 }
0x1118   :  { %4600 = vmatpush.xpose.msk.msra.mxu3 %vm140_vm0, %v3047_v1  ;;  %v4955_v39 = vpop.eup %4954  ;;  %v3046_v57 = vmul.f32 %v4953_v44, %v6599_v59 }
0x1119   :  { %v4957_v0 = vpop.eup %4956  ;;  %v3049_v11 = vmul.f32 %v4955_v39, %v6587_v34 }
0x111a   :  { %v4959_v20 = vpop.eup %4958  ;;  %v3045_v29 = vmul.f32 %v4957_v0, %v6582_v13 }
0x111b   :  { %4606 = vmatpush.xpose.msk.msra.mxu1 %vm140_vm0, %v3050_v19  ;;  %v4961_v21 = vpop.eup %4960  ;;  %v3048_v52 = vmul.f32 %v4959_v20, %v6575_v62 }
0x111c   :  { %4601 = vmatpush.xpose.msk.msra.mxu3 %vm140_vm0, %v3046_v57  ;;  %v3044_v58 = vmul.f32 %v4961_v21, %v6568_v8 }
0x111f   :  { %4607 = vmatpush.xpose.msk.msra.mxu1 %vm140_vm0, %v3049_v11 }
0x1120   :  { %4602 = vmatpush.xpose.msk.msra.mxu3 %vm140_vm0, %v3045_v29 }
0x1123   :  { %4608 = vmatpush.xpose.msk.msra.mxu1 %vm140_vm0, %v3048_v52 }
0x1124   :  { %4603 = vmatpush.xpose.msk.msra.mxu3 %vm140_vm0, %v3044_v58 }
0x113d   :  { %v3023_v59 = vpop.xlane.xlu0 %3022 }
0x113e   :  { %4962 = vrcp.f32 %v3023_v59 }
0x113f   :  { %4964 = vrcp.f32 %v3020_v22 }
0x1140   :  { %4966 = vrcp.f32 %v3017_v56 }
0x1141   :  { %4968 = vrcp.f32 %v3014_v46 }
0x1144   :  { %v4963_v34 = vpop.eup %4962 }
0x1145   :  { %v3055_v13 = vmul.f32 %v4963_v34, %v6626_v51  ;;  %v4965_v3 = vpop.eup %4964 }
0x1146   :  { %v3054_v32 = vmul.f32 %v4965_v3, %v6612_v9  ;;  %v4967_v62 = vpop.eup %4966 }
0x1147   :  { %4610 = vmatpush.xpose.msk.msra.mxu0 %vm140_vm0, %v3055_v13  ;;  %v3053_v8 = vmul.f32 %v4967_v62, %v6592_v45  ;;  %v4969_v24 = vpop.eup %4968 }
0x1148   :  { %v3052_v33 = vmul.f32 %v4969_v24, %v6572_v55 }
0x114b   :  { %4611 = vmatpush.xpose.msk.msra.mxu0 %vm140_vm0, %v3054_v32 }
0x114f   :  { %4612 = vmatpush.xpose.msk.msra.mxu0 %vm140_vm0, %v3053_v8 }
0x1153   :  { %4613 = vmatpush.xpose.msk.msra.mxu0 %vm140_vm0, %v3052_v33 }
0x115c   :  { %v3152_v30 = vpop.trf.xlu2 }
0x1178   :  { %v3120_v53 = vpop.trf.xlu1 }
0x1179   :  { %4599 = vmatmul.msk.f32.vlgmr.msrb.gmra.mxu3 %vm140_vm0, %v3120_v53 }
0x117c   :  { %v3216_v14 = vpop.trf.xlu2 }
0x117d   :  { %4614 = vmatmul.msk.f32.vlgmr.msra.gmra.mxu0 %vm140_vm0, %v3216_v14 }
0x1181   :  { %4604 = vmatmul.msk.f32.vlgmr.msra.gmra.mxu3 %vm140_vm0, %v3152_v30 }
0x1197   :  { %v3184_v9 = vpop.trf.xlu0 }
0x1198   :  { %4609 = vmatmul.msk.f32.vlgmr.msra.gmra.mxu1 %vm140_vm0, %v3184_v9 }
0x11fa   :  { %v3369_v55 = vpop.f32.mrf.mxu0 }
0x11fc   :  { %v3264_v45 = vpop.f32.mrf.mxu3 }
0x11fd   :  { %3372 = vxpose.xlu0.b32.start.end [1/1] (short) (narrow) %v3264_v45, 32 }
0x1204   :  { %v3299_v47 = vpop.f32.mrf.mxu3 }
0x1215   :  { %v3334_v4 = vpop.f32.mrf.mxu1 }
0x1216   :  { %3436 = vxpose.xlu1.b32.start.end [1/1] (short) (narrow) %v3334_v4, 32 }
0x121d   :  { %3404 = vxpose.xlu0.b32.start.end [1/1] (short) (narrow) %v3299_v47, 32 }
0x1236   :  { %3468 = vxpose.xlu1.b32.start.end [1/1] (short) (narrow) %v3369_v55, 32 }
0x12a1   :  { %v3388_v25 = vpop.trf.xlu0 }
0x12a2   :  { %v3502_v7 = vrot.slane %v3388_v25, 4 }
0x12a9   :  { %v3389_v17 = vpop.trf.xlu0 }
0x12aa   :  { %v3558_v49 = vrot.slane %v3389_v17, 4 }
0x12b1   :  { %v3390_v28 = vpop.trf.xlu0 }
0x12b2   :  { %v3614_v38 = vrot.slane %v3390_v28, 4 }
0x12b9   :  { %v3391_v42 = vpop.trf.xlu0 }
0x12ba   :  { %v3452_v51 = vpop.trf.xlu1  ;;  %v3670_v50 = vrot.slane %v3391_v42, 4 }
0x12bb   :  { %v3500_v37 = vrot.slane %v3452_v51, 4  ;;  %v3503_v2 = vsel %vm1427_vm2, %v3452_v51, %v3502_v7 }
0x12bc   :  { %v3511_v60 = vperm.slane %v3503_v2, %v5812_v6 }
0x12bd   :  { %v3501_v40 = vsel %vm1427_vm2, %v3500_v37, %v3388_v25 }
0x12be   :  { %v3507_v22 = vperm.slane %v3501_v40, %v5812_v6  ;;  %v3538_v39 = vrot.slane %v3511_v60, 4 }
0x12c0   :  { %v3526_v19 = vrot.slane %v3507_v22, 4 }
0x12c1   :  { %v3420_v27 = vpop.trf.xlu0 }
0x12c2   :  { %v3453_v43 = vpop.trf.xlu1  ;;  %v3514_v10 = vrot.slane %v3420_v27, 4 }
0x12c3   :  { %v3556_v23 = vrot.slane %v3453_v43, 4  ;;  %v3559_v56 = vsel %vm1427_vm2, %v3453_v43, %v3558_v49 }
0x12c4   :  { %v6685_v15 = vperm.slane %v3559_v56, %v5812_v6 }
0x12c5   :  { %v3557_v5 = vsel %vm1427_vm2, %v3556_v23, %v3389_v17 }
0x12c6   :  { %v6688_v63 = vperm.slane %v3557_v5, %v5812_v6  ;;  %v3594_v0 = vrot.slane %v6685_v15, 4 }
0x12c8   :  { %v3582_v34 = vrot.slane %v6688_v63, 4 }
0x12c9   :  { %v3421_v46 = vpop.trf.xlu0 }
0x12ca   :  { %v3454_v12 = vpop.trf.xlu1  ;;  %v3570_v32 = vrot.slane %v3421_v46, 4 }
0x12cb   :  { %v3612_v48 = vrot.slane %v3454_v12, 4  ;;  %v3615_v54 = vsel %vm1427_vm2, %v3454_v12, %v3614_v38 }
0x12cc   :  { %v6697_v21 = vperm.slane %v3615_v54, %v5812_v6 }
0x12cd   :  { %v3613_v11 = vsel %vm1427_vm2, %v3612_v48, %v3390_v28 }
0x12ce   :  { %v6705_v8 = vperm.slane %v3613_v11, %v5812_v6  ;;  %v3650_v4 = vrot.slane %v6697_v21, 4 }
0x12d1   :  { %v3422_v62 = vpop.trf.xlu0 }
0x12d2   :  { %v3455_v36 = vpop.trf.xlu1  ;;  %v3626_v17 = vrot.slane %v3422_v62, 4 }
0x12d3   :  { %v3668_v20 = vrot.slane %v3455_v36, 4  ;;  %v3671_v13 = vsel %vm1427_vm2, %v3455_v36, %v3670_v50 }
0x12d4   :  { %v6714_v47 = vperm.slane %v3671_v13, %v5812_v6 }
0x12d5   :  { %v3669_v30 = vsel %vm1427_vm2, %v3668_v20, %v3391_v42 }
0x12d6   :  { %v6720_v12 = vperm.slane %v3669_v30, %v5812_v6 }
0x12d9   :  { %v3423_v13 = vpop.trf.xlu0 }
0x12da   :  { %v3484_v18 = vpop.trf.xlu1 }
0x12db   :  { %v3512_v1 = vrot.slane %v3484_v18, 4  ;;  %v3515_v44 = vsel %vm1427_vm2, %v3484_v18, %v3514_v10 }
0x12dc   :  { %v3523_v57 = vperm.slane %v3515_v44, %v5812_v6 }
0x12dd   :  { %v3513_v29 = vsel %vm1427_vm2, %v3512_v1, %v3420_v27 }
0x12de   :  { %v3519_v52 = vperm.slane %v3513_v29, %v5812_v6  ;;  %v3536_v58 = vrot.slane %v3523_v57, 4  ;;  %v3539_v59 = vsel %vm1427_vm2, %v3523_v57, %v3538_v39 }
0x12df   :  { %v3547_v3 = vperm.slane %v3539_v59, %v5821_v35 }
0x12e0   :  { %v3524_v24 = vrot.slane %v3519_v52, 4  ;;  %v3527_v33 = vsel %vm1427_vm2, %v3519_v52, %v3526_v19  ;;  %v3537_v53 = vsel %vm1427_vm2, %v3536_v58, %v3511_v60 }
0x12e1   :  { %v3535_v14 = vperm.slane %v3527_v33, %v5821_v35  ;;  %v3543_v9 = vperm.slane %v3537_v53, %v5821_v35  ;;  %v3554_v45 = vrot.slane %v3547_v3, 4  ;;  %v3638_v33 = vrot.slane %v6705_v8, 4 }
0x12e2   :  { %v3525_v55 = vsel %vm1427_vm2, %v3524_v24, %v3507_v22  ;;  %v3485_v25 = vpop.trf.xlu1  ;;  %v3706_v53 = vrot.slane %v6714_v47, 4 }
0x12e3   :  { %v3531_v28 = vperm.slane %v3525_v55, %v5821_v35  ;;  %v3550_v51 = vrot.slane %v3535_v14, 4  ;;  %v3552_v43 = vrot.slane %v3543_v9, 4  ;;  %v3555_v42 = vsel %vm1427_vm2, 0.0, %v3554_v45 }
0x12e4   :  { %v3740_v27 = vrot.slane %v3555_v42, 4  ;;  %v3568_v7 = vrot.slane %v3485_v25, 4  ;;  %v3571_v37 = vsel %vm1427_vm2, %v3485_v25, %v3570_v32  ;;  %v3735_v40 = vsel %vm1427_vm2, %v3554_v45, %v3543_v9 }
0x12e5   :  { %v3548_v49 = vrot.slane %v3531_v28, 4  ;;  %v3551_v36 = vsel %vm1427_vm2, 0.0, %v3550_v51  ;;  %v3553_v23 = vsel %vm1427_vm2, 0.0, %v3552_v43  ;;  %v3579_v38 = vperm.slane %v3571_v37, %v5812_v6 }
0x12e6   :  { %v3729_v2 = vrot.slane %v3551_v36, 4  ;;  %v3569_v56 = vsel %vm1427_vm2, %v3568_v7, %v3421_v46  ;;  %v3724_v10 = vsel %vm1427_vm2, %v3550_v51, %v3531_v28  ;;  %v3741_v48 = vsel %vm1427_vm2, %v3740_v27, %v3553_v23 }
0x12e7   :  { %v3575_v22 = vperm.slane %v3569_v56, %v5812_v6  ;;  %v3549_v60 = vsel %vm1427_vm2, 0.0, %v3548_v49  ;;  %v6732_v5 = vperm.slane %v3724_v10, %v5812_v6  ;;  %v6736_v50 = vperm.slane %v3735_v40, %v5812_v6 }
0x12e8   :  { %v3592_v18 = vrot.slane %v3579_v38, 4  ;;  %v3595_v54 = vsel %vm1427_vm2, %v3579_v38, %v3594_v0  ;;  %v3730_v46 = vsel %vm1427_vm2, %v3729_v2, %v3549_v60  ;;  %v6749_v29 = vperm.slane %v3741_v48, %v5812_v6 }
0x12e9   :  { %v3580_v1 = vrot.slane %v3575_v22, 4  ;;  %v3583_v44 = vsel %vm1427_vm2, %v3575_v22, %v3582_v34  ;;  %v3603_v19 = vperm.slane %v3595_v54, %v5821_v35  ;;  %v6743_v39 = vperm.slane %v3730_v46, %v5812_v6 }
0x12ea   :  { %v3591_v57 = vperm.slane %v3583_v44, %v5821_v35  ;;  %v3593_v11 = vsel %vm1427_vm2, %v3592_v18, %v6685_v15  ;;  %v3486_v20 = vpop.trf.xlu1  ;;  %v3748_v0 = vrot.slane %v6732_v5, 4  ;;  %v3760_v24 = vrot.slane %v6736_v50, 4 }
0x12eb   :  { %v3581_v52 = vsel %vm1427_vm2, %v3580_v1, %v6688_v63  ;;  %v3599_v58 = vperm.slane %v3593_v11, %v5821_v35  ;;  %v3610_v59 = vrot.slane %v3603_v19, 4  ;;  %v3624_v34 = vrot.slane %v3486_v20, 4 }
0x12ec   :  { %v6756_v3 = vperm.slane %v3581_v52, %v5821_v35  ;;  %v6758_v32 = vrot.slane %v3591_v57, 4  ;;  %v3627_v15 = vsel %vm1427_vm2, %v3486_v20, %v3626_v17  ;;  %v3749_v30 = vsel %vm1427_vm2, %v6743_v39, %v3748_v0 }
0x12ed   :  { %v3625_v63 = vsel %vm1427_vm2, %v3624_v34, %v3422_v62  ;;  %v3694_v14 = vrot.slane %v6720_v12, 4  ;;  %v3608_v9 = vrot.slane %v3599_v58, 4  ;;  %v6769_v45 = vsel %vm1427_vm2, 0.0, %v3610_v59 }
0x12ee   :  { %v3682_v55 = vrot.slane %v3423_v13, 4  ;;  %v3604_v25 = vrot.slane %v6756_v3, 4  ;;  %v3789_v17 = vsel %vm1427_vm2, %v3610_v59, %v3599_v58  ;;  %v3631_v28 = vperm.slane %v3625_v63, %v5812_v6 }
0x12ef   :  { %v3635_v51 = vperm.slane %v3627_v15, %v5812_v6  ;;  %v6777_v62 = vsel %vm1427_vm2, 0.0, %v6758_v32  ;;  %v3757_v43 = vperm.slane %v3749_v30, %v5821_v35  ;;  %v3761_v42 = vsel %vm1427_vm2, %v6749_v29, %v3760_v24 }
0x12f0   :  { %v3746_v27 = vrot.slane %v6743_v39, 4  ;;  %v3636_v7 = vrot.slane %v3631_v28, 4  ;;  %v3639_v37 = vsel %vm1427_vm2, %v3631_v28, %v3638_v33  ;;  %v3769_v2 = vperm.slane %v3761_v42, %v5821_v35 }
0x12f1   :  { %v3648_v49 = vrot.slane %v3635_v51, 4  ;;  %v3651_v36 = vsel %vm1427_vm2, %v3635_v51, %v3650_v4  ;;  %v3647_v23 = vperm.slane %v3639_v37, %v5821_v35  ;;  %v3776_v56 = vrot.slane %v3757_v43, 4 }
0x12f2   :  { %v3659_v40 = vperm.slane %v3651_v36, %v5821_v35  ;;  %v3487_v38 = vpop.trf.xlu1  ;;  %v3637_v10 = vsel %vm1427_vm2, %v3636_v7, %v6705_v8  ;;  %v3774_v1 = vrot.slane %v3769_v2, 4  ;;  %v3609_v39 = vsel %vm1427_vm2, 0.0, %v3608_v9 }
0x12f3   :  { %v3649_v22 = vsel %vm1427_vm2, %v3648_v49, %v6697_v21  ;;  %v3680_v60 = vrot.slane %v3487_v38, 4  ;;  %v3683_v48 = vsel %vm1427_vm2, %v3487_v38, %v3682_v55  ;;  %v3643_v18 = vperm.slane %v3637_v10, %v5821_v35 }
0x12f4   :  { %v6797_v4 = vperm.slane %v3649_v22, %v5821_v35  ;;  %v3662_v54 = vrot.slane %v3647_v23, 4  ;;  %v3666_v46 = vrot.slane %v3659_v40, 4  ;;  %v3777_v44 = vsel %vm1427_vm2, %v3769_v2, %v3776_v56 }
0x12f5   :  { %v3681_v19 = vsel %vm1427_vm2, %v3680_v60, %v3423_v13  ;;  %v3691_v8 = vperm.slane %v3683_v48, %v5812_v6  ;;  %v6804_v21 = vperm.slane %v3789_v17, %v5812_v6  ;;  %v3794_v57 = vrot.slane %v6769_v45, 4  ;;  %3976 = vrot.lane.b32.xlu0 %v3777_v44, %s5191_s10 }
0x12f6   :  { %v3758_v11 = vrot.slane %v6749_v29, 4  ;;  %v3660_v20 = vrot.slane %v3643_v18, 4  ;;  %v3663_v0 = vsel %vm1427_vm2, 0.0, %v3662_v54  ;;  %v3775_v52 = vsel %vm1427_vm2, %v3774_v1, %v3757_v43 }
0x12f7   :  { %v3687_v58 = vperm.slane %v3681_v19, %v5812_v6  ;;  %v3664_v59 = vrot.slane %v6797_v4, 4  ;;  %v3667_v34 = vsel %vm1427_vm2, 0.0, %v3666_v46  ;;  %3960 = vrot.lane.b32.xlu1 %v3775_v52, %s5182_s6  ;;  %v3704_v13 = vrot.slane %v3691_v8, 4 }
0x12f8   :  { %v3707_v15 = vsel %vm1427_vm2, %v3691_v8, %v3706_v53  ;;  %v3747_v63 = vsel %vm1427_vm2, %v3746_v27, %v6732_v5  ;;  %v3759_v55 = vsel %vm1427_vm2, %v3758_v11, %v6736_v50  ;;  %v3783_v5 = vrot.slane %v6777_v62, 4 }
0x12f9   :  { %v3692_v24 = vrot.slane %v3687_v58, 4  ;;  %v3695_v33 = vsel %vm1427_vm2, %v3687_v58, %v3694_v14  ;;  %v3715_v29 = vperm.slane %v3707_v15, %v5821_v35  ;;  %v3705_v9 = vsel %vm1427_vm2, %v3704_v13, %v6714_v47 }
0x12fa   :  { %v3703_v30 = vperm.slane %v3695_v33, %v5821_v35  ;;  %v6824_v45 = vperm.slane %v3747_v63, %v5821_v35  ;;  %v3711_v14 = vperm.slane %v3705_v9, %v5821_v35  ;;  %v6832_v28 = vperm.slane %v3759_v55, %v5821_v35 }
0x12fb   :  { %v3693_v53 = vsel %vm1427_vm2, %v3692_v24, %v6720_v12  ;;  %v3722_v17 = vrot.slane %v3715_v29, 4  ;;  %v3837_v51 = vrot.slane %v3663_v0, 4  ;;  %v3661_v42 = vsel %vm1427_vm2, 0.0, %v3660_v20 }
0x12fc   :  { %v6836_v47 = vperm.slane %v3693_v53, %v5821_v35  ;;  %v3772_v43 = vrot.slane %v6824_v45, 4  ;;  %v3665_v50 = vsel %vm1427_vm2, 0.0, %v3664_v59  ;;  %v3848_v27 = vrot.slane %v3667_v34, 4 }
0x12fd   :  { %v3605_v12 = vsel %vm1427_vm2, 0.0, %v3604_v25  ;;  %v3718_v7 = vrot.slane %v3703_v30, 4  ;;  %v3720_v37 = vrot.slane %v3711_v14, 4  ;;  %v3723_v49 = vsel %vm1427_vm2, 0.0, %v3722_v17 }
0x12fe   :  { %v3897_v36 = vsel %vm1427_vm2, %v3722_v17, %v3711_v14  ;;  %v3716_v62 = vrot.slane %v6836_v47, 4  ;;  %v3770_v23 = vrot.slane %v6832_v28, 4  ;;  %v3773_v40 = vsel %vm1427_vm2, %v6832_v28, %v3772_v43 }
0x12ff   :  { %v3778_v2 = vsel %vm1427_vm2, %v6758_v32, %v6756_v3  ;;  %3944 = vrot.lane.b32.xlu2 %v3773_v40, %s5176_s26  ;;  %v3784_v56 = vsel %vm1427_vm2, %v3783_v5, %v3605_v12  ;;  %v3795_v38 = vsel %vm1427_vm2, %v3794_v57, %v3609_v39  ;;  %v3814_v10 = vrot.slane %v6804_v21, 4 }
0x1300   :  { %v3782_v25 = vperm.slane %v3778_v2, %v5812_v6  ;;  %v3788_v22 = vperm.slane %v3784_v56, %v5812_v6  ;;  %v3799_v60 = vperm.slane %v3795_v38, %v5812_v6  ;;  %v3832_v48 = vsel %vm1427_vm2, %v3662_v54, %v3643_v18 }
0x1301   :  { %v3838_v1 = vsel %vm1427_vm2, %v3837_v51, %v3661_v42  ;;  %v3719_v3 = vsel %vm1427_vm2, 0.0, %v3718_v7  ;;  %v3836_v44 = vperm.slane %v3832_v48, %v5812_v6  ;;  %v3843_v39 = vsel %vm1427_vm2, %v3666_v46, %v6797_v4 }
0x1302   :  { %v3802_v32 = vrot.slane %v3782_v25, 4  ;;  %v3842_v19 = vperm.slane %v3838_v1, %v5812_v6  ;;  %v3815_v8 = vsel %vm1427_vm2, %v3799_v60, %v3814_v10  ;;  %v3849_v57 = vsel %vm1427_vm2, %v3848_v27, %v3665_v50 }
0x1303   :  { %v3800_v11 = vrot.slane %v3788_v22, 4  ;;  %v3823_v18 = vperm.slane %v3815_v8, %v5821_v35  ;;  %v3853_v54 = vperm.slane %v3849_v57, %v5812_v6  ;;  %v3902_v52 = vrot.slane %v3723_v49, 4 }
0x1304   :  { %v3803_v20 = vsel %vm1427_vm2, %v3788_v22, %v3802_v32  ;;  %v3854_v0 = vrot.slane %v3842_v19, 4  ;;  %v3812_v59 = vrot.slane %v3799_v60, 4  ;;  %v3856_v34 = vrot.slane %v3836_v44, 4 }
0x1305   :  { %v3811_v58 = vperm.slane %v3803_v20, %v5821_v35  ;;  %v3828_v13 = vrot.slane %v3823_v18, 4  ;;  %v3847_v15 = vperm.slane %v3843_v39, %v5812_v6  ;;  %v3866_v46 = vrot.slane %v3853_v54, 4 }
0x1306   :  { %v3855_v4 = vsel %vm1427_vm2, %v3854_v0, %v3836_v44  ;;  %v3891_v24 = vrot.slane %v3719_v3, 4  ;;  %v3801_v29 = vsel %vm1427_vm2, %v3800_v11, %v3782_v25  ;;  %v3813_v63 = vsel %vm1427_vm2, %v3812_v59, %v6804_v21 }
0x1307   :  { %v3861_v33 = vperm.slane %v3855_v4, %v5821_v35  ;;  %v3829_v30 = vsel %vm1427_vm2, %v3828_v13, %v3811_v58  ;;  %v3867_v9 = vsel %vm1427_vm2, %v3866_v46, %v3847_v15  ;;  %v3819_v55 = vperm.slane %v3813_v63, %v5821_v35  ;;  %v4004_v46 = vld [vmem:[#allocation5 + $0x38] sm:$0xff] }
0x1308   :  { %v3857_v53 = vsel %vm1427_vm2, %v3842_v19, %v3856_v34  ;;  %v3721_v14 = vsel %vm1427_vm2, 0.0, %v3720_v37  ;;  %v3901_v17 = vperm.slane %v3897_v36, %v5812_v6  ;;  %3962 = vrot.lane.b32.xlu2 %v3829_v30, %s5182_s6  ;;  %v3873_v5 = vperm.slane %v3867_v9, %v5821_v35  ;;  %4029 = vmatpush.msrb.mxu3 %v4004_v46 }
0x1309   :  { %v3880_v51 = vrot.slane %v3861_v33, 4  ;;  %v3807_v43 = vperm.slane %v3801_v29, %v5821_v35  ;;  %v3824_v21 = vrot.slane %v3819_v55, 4  ;;  %v3868_v42 = vrot.slane %v3847_v15, 4  ;;  %v4001_v29 = vld [vmem:[#allocation5 + $0x20] sm:$0xff] }
0x130a   :  { %v3717_v50 = vsel %vm1427_vm2, 0.0, %v3716_v62  ;;  %v3878_v27 = vrot.slane %v3873_v5, 4  ;;  %v3865_v49 = vperm.slane %v3857_v53, %v5821_v35  ;;  %v3886_v37 = vsel %vm1427_vm2, %v3718_v7, %v6836_v47 }
0x130b   :  { %v3881_v12 = vsel %vm1427_vm2, %v3873_v5, %v3880_v51  ;;  %v3830_v36 = vrot.slane %v3811_v58, 4  ;;  %v3890_v40 = vperm.slane %v3886_v37, %v5812_v6  ;;  %v3892_v2 = vsel %vm1427_vm2, %v3891_v24, %v3717_v50  ;;  %v4003_v24 = vld [vmem:[#allocation5 + $0x30] sm:$0xff] }
0x130c   :  { %3948 = vrot.lane.b32.xlu1 %v3881_v12, %s5176_s26  ;;  %v3903_v25 = vsel %vm1427_vm2, %v3902_v52, %v3721_v14  ;;  %v3896_v56 = vperm.slane %v3892_v2, %v5812_v6  ;;  %v3922_v38 = vrot.slane %v3901_v17, 4  ;;  %v3869_v10 = vsel %vm1427_vm2, %v3853_v54, %v3868_v42  ;;  %4030 = vmatpush.msrb.mxu3 %v4003_v24 }
0x130d   :  { %v3907_v62 = vperm.slane %v3903_v25, %v5812_v6  ;;  %v3771_v47 = vsel %vm1427_vm2, %v3770_v23, %v6824_v45  ;;  %v3825_v7 = vsel %vm1427_vm2, %v3824_v21, %v3807_v43  ;;  %v3879_v22 = vsel %vm1427_vm2, %v3878_v27, %v3861_v33  ;;  %v4002_v33 = vld [vmem:[#allocation5 + $0x28] sm:$0xff] }
0x130e   :  { %v3884_v60 = vrot.slane %v3865_v49, 4  ;;  %v3908_v48 = vrot.slane %v3896_v56, 4  ;;  %v3831_v1 = vsel %vm1427_vm2, %v3823_v18, %v3830_v36  ;;  %v3910_v3 = vrot.slane %v3890_v40, 4  ;;  %4031 = vmatpush.msrb.mxu3 %v4002_v33 }
0x130f   :  { %v3923_v32 = vsel %vm1427_vm2, %v3907_v62, %v3922_v38  ;;  %v3920_v6 = vrot.slane %v3907_v62, 4  ;;  %v3877_v44 = vperm.slane %v3869_v10, %v5821_v35  ;;  %v3826_v57 = vrot.slane %v3807_v43, 4 }
0x1310   :  { %3978 = vrot.lane.b32.xlu2 %v3831_v1, %s5191_s10  ;;  %v3909_v28 = vsel %vm1427_vm2, %v3908_v48, %v3890_v40  ;;  %v3931_v19 = vperm.slane %v3923_v32, %v5821_v35  ;;  %v3911_v11 = vsel %vm1427_vm2, %v3896_v56, %v3910_v3  ;;  %4032 = vmatpush.msrb.mxu3 %v4001_v29 }
0x1311   :  { %v3921_v45 = vsel %vm1427_vm2, %v3920_v6, %v3901_v17  ;;  %v3885_v23 = vsel %vm1427_vm2, %v3877_v44, %v3884_v60  ;;  %v3915_v8 = vperm.slane %v3909_v28, %v5821_v35  ;;  %v3919_v18 = vperm.slane %v3911_v11, %v5821_v35  ;;  %v4125_v11 = vld [vmem:[#allocation7 + $0x20] sm:$0xff] }
0x1312   :  { %v3927_v39 = vperm.slane %v3921_v45, %v5821_v35  ;;  %v3936_v54 = vrot.slane %v3931_v19, 4  ;;  %v3827_v52 = vsel %vm1427_vm2, %v3819_v55, %v3826_v57  ;;  %v3882_v59 = vrot.slane %v3877_v44, 4 }
0x1313   :  { %v3934_v13 = vrot.slane %v3915_v8, 4  ;;  %v3938_v35 = vrot.slane %v3919_v18, 4 }
0x1314   :  { %3980 = vrot.lane.b32.xlu1 %v3885_v23, %s5191_s10  ;;  %v3932_v20 = vrot.slane %v3927_v39, 4  ;;  %v3937_v58 = vsel %vm1427_vm2, %v3936_v54, %v3919_v18  ;;  %v3883_v34 = vsel %vm1427_vm2, %v3882_v59, %v3865_v49 }
0x1315   :  { %v3935_v15 = vsel %vm1427_vm2, %v3927_v39, %v3934_v13  ;;  %v3939_v4 = vsel %vm1427_vm2, %v3931_v19, %v3938_v35  ;;  %v4128_v19 = vld [vmem:[#allocation7 + $0x38] sm:$0xff]  ;;  %v4126_v39 = vld [vmem:[#allocation7 + $0x28] sm:$0xff] }
0x1316   :  { %v3933_v0 = vsel %vm1427_vm2, %v3932_v20, %v3915_v8  ;;  %v4127_v8 = vld [vmem:[#allocation7 + $0x30] sm:$0xff]  ;;  %4153 = vmatpush.msrb.mxu1 %v4128_v19  ;;  %v4798_v35 = vld [vmem:[#allocation2 + $0x3] ss:$0 sm:$0xff]  ;;  %v4632_v19 = vld [vmem:[%s7081_s7 + $0x68] sm:$0xff] }
0x1318   :  { %3946 = vrot.lane.b32.xlu2 %v3827_v52, %s5176_s26  ;;  %4154 = vmatpush.msrb.mxu1 %v4127_v8  ;;  %v4631_v8 = vld [vmem:[%s7081_s7 + $0x60] sm:$0xff] }
0x131a   :  { %4155 = vmatpush.msrb.mxu1 %v4126_v39 }
0x131c   :  { %3966 = vrot.lane.b32.xlu1 %v3937_v58, %s5182_s6  ;;  %4156 = vmatpush.msrb.mxu1 %v4125_v11  ;;  %v4628_v11 = vld [vmem:[%s7081_s7 + $0x48] sm:$0xff] }
0x1320   :  { %3964 = vrot.lane.b32.xlu2 %v3883_v34, %s5182_s6 }
0x1328   :  { %3950 = vrot.lane.b32.xlu2 %v3935_v15, %s5176_s26 }
0x1330   :  { %3982 = vrot.lane.b32.xlu2 %v3939_v4, %s5191_s10 }
0x1359   :  { %v3945_v63 = vpop.permute.xlu2 %3944 }
0x135a   :  { %v3988_v55 = vsel %vm657_vm1, %v3771_v47, %v3945_v63 }
0x1362   :  { %v3963_v30 = vpop.permute.xlu2 %3962 }
0x1367   :  { %v3977_v9 = vpop.permute.xlu0 %3976 }
0x1369   :  { %v3961_v53 = vpop.permute.xlu1 %3960 }
0x136a   :  { %v3979_v14 = vpop.permute.xlu2 %3978  ;;  %v3992_v17 = vsel %vm288_vm14, %v3988_v55, %v3961_v53 }
0x136b   :  { %v3996_v5 = vsel %vm1923_vm3, %v3992_v17, %v3977_v9 }
0x136c   :  { %4615 = vmatmul.msk.f32.vlgmr.msrb.gmra.mxu3 %vm140_vm0, %v3996_v5 }
0x1372   :  { %v3947_v51 = vpop.permute.xlu2 %3946 }
0x1373   :  { %v3989_v43 = vsel %vm657_vm1, %v3825_v7, %v3947_v51 }
0x1374   :  { %v3993_v21 = vsel %vm288_vm14, %v3989_v43, %v3963_v30 }
0x1375   :  { %v3997_v42 = vsel %vm1923_vm3, %v3993_v21, %v3979_v14 }
0x1376   :  { %4616 = vmatmul.msk.f32.gmra.mxu3 %vm140_vm0, %v3997_v42 }
0x137a   :  { %v3965_v50 = vpop.permute.xlu2 %3964 }
0x137e   :  { %v3949_v27 = vpop.permute.xlu1 %3948 }
0x137f   :  { %v3990_v12 = vsel %vm657_vm1, %v3879_v22, %v3949_v27 }
0x1380   :  { %v3994_v36 = vsel %vm288_vm14, %v3990_v12, %v3965_v50 }
0x1382   :  { %v3951_v49 = vpop.permute.xlu2 %3950 }
0x1383   :  { %v3991_v2 = vsel %vm657_vm1, %v3933_v0, %v3951_v49 }
0x1386   :  { %v3981_v37 = vpop.permute.xlu1 %3980 }
0x1387   :  { %v3998_v40 = vsel %vm1923_vm3, %v3994_v36, %v3981_v37 }
0x1388   :  { %4617 = vmatmul.msk.f32.gmra.mxu3 %vm140_vm0, %v3998_v40 }
0x138a   :  { %v3983_v56 = vpop.permute.xlu2 %3982 }
0x138e   :  { %v3967_v25 = vpop.permute.xlu1 %3966 }
0x138f   :  { %v3995_v62 = vsel %vm288_vm14, %v3991_v2, %v3967_v25 }
0x1390   :  { %v3999_v38 = vsel %vm1923_vm3, %v3995_v62, %v3983_v56 }
0x1391   :  { %4618 = vmatmul.msk.f32.gmra.mxu3 %vm140_vm0, %v3999_v38 }
0x13ef   :  { %v4034_v10 = vpop.f32.mrf.mxu3 }
0x13f0   :  { %v6945_v47 = vadd.f32 %v4034_v10, %v6178_v31 }
0x13f2   :  { %v4051_v7 = vmul.f32 %v6945_v47, %v6945_v47 }
0x13f4   :  { %v4055_v22 = vsel %vm140_vm0, %v4051_v7, 0.0 }
0x13f5   :  { %4056 = vadd.xlane.f32.xlu1 %v4055_v22 }
0x13f9   :  { %v4037_v60 = vpop.f32.mrf.mxu3 }
0x13fa   :  { %v6951_v48 = vadd.f32 %v4037_v60, %v6184_v61 }
0x13fc   :  { %v4052_v1 = vmul.f32 %v6951_v48, %v6951_v48 }
0x13fe   :  { %v4058_v3 = vsel %vm140_vm0, %v4052_v1, 0.0 }
0x13ff   :  { %4059 = vadd.xlane.f32.xlu2 %v4058_v3 }
0x140b   :  { %v4040_v32 = vpop.f32.mrf.mxu3 }
0x140c   :  { %v6957_v31 = vadd.f32 %v4040_v32, %v6190_v41 }
0x140e   :  { %v4053_v6 = vmul.f32 %v6957_v31, %v6957_v31 }
0x1410   :  { %v4061_v44 = vsel %vm140_vm0, %v4053_v6, 0.0 }
0x1411   :  { %4062 = vadd.xlane.f32.xlu0 %v4061_v44 }
0x1414   :  { %v4043_v28 = vpop.f32.mrf.mxu3 }
0x1415   :  { %v6963_v61 = vadd.f32 %v4043_v28, %v6196_v16  ;;  %v4634_v28 = vld [vmem:[%s7081_s7 + $0x78] sm:$0xff] }
0x1416   :  { %4299 = vmatpush.msra.mxu2 %v4634_v28 }
0x1417   :  { %v4054_v45 = vmul.f32 %v6963_v61, %v6963_v61 }
0x1419   :  { %v4064_v23 = vsel %vm140_vm0, %v4054_v45, 0.0  ;;  %v4633_v45 = vld [vmem:[%s7081_s7 + $0x70] sm:$0xff] }
0x141a   :  { %4065 = vadd.xlane.f32.xlu1 %v4064_v23  ;;  %4300 = vmatpush.msra.mxu2 %v4633_v45 }
0x141c   :  { %4301 = vmatpush.msra.mxu2 %v4632_v19 }
0x141e   :  { %4302 = vmatpush.msra.mxu2 %v4631_v8 }
0x1468   :  { %v4057_v41 = vpop.xlane.xlu1 %4056 }
0x1469   :  { %v4067_v57 = vmul.f32 %v4057_v41, %v5330_v26  ;;  %v4630_v41 = vld [vmem:[%s7081_s7 + $0x58] sm:$0xff] }
0x146a   :  { %4303 = vmatpush.msra.mxu2 %v4630_v41 }
0x146b   :  { %v4071_v20 = vadd.f32 1e-05, %v4067_v57  ;;  %v4629_v57 = vld [vmem:[%s7081_s7 + $0x50] sm:$0xff] }
0x146c   :  { %4304 = vmatpush.msra.mxu2 %v4629_v57 }
0x146d   :  { %4970 = vrsqrt.f32 %v4071_v20  ;;  %vm4081_vm1 = vweird.f32 %v4071_v20 }
0x146e   :  { %4305 = vmatpush.msra.mxu2 %v4628_v11 }
0x1472   :  { %v4060_v16 = vpop.xlane.xlu2 %4059 }
0x1473   :  { %v4971_v18 = vpop.eup %4970  ;;  %v4068_v54 = vmul.f32 %v4060_v16, %v5330_v26 }
0x1474   :  { %v4076_v0 = vmul.f32 %v4971_v18, %v4071_v20  ;;  %vm4082_vm14 = vweird.f32 %v4971_v18 }
0x1475   :  { %v4072_v52 = vadd.f32 1e-05, %v4068_v54  ;;  %vm4083_vm2 = vmor %vm4081_vm1, %vm4082_vm14 }
0x1476   :  { %v4077_v58 = vmul.f32 %v4971_v18, %v4076_v0 }
0x1477   :  { %4972 = vrsqrt.f32 %v4072_v52  ;;  %vm4091_vm4 = vweird.f32 %v4072_v52 }
0x1478   :  { %v4078_v59 = vmul.f32 0.5, %v4077_v58 }
0x147a   :  { %v4079_v34 = vsub.f32 1.5, %v4078_v59 }
0x147c   :  { %v4080_v13 = vmul.f32 %v4971_v18, %v4079_v34 }
0x147d   :  { %v4973_v15 = vpop.eup %4972 }
0x147e   :  { %v4084_v4 = vsel %vm4083_vm2, %v4971_v18, %v4080_v13  ;;  %v4086_v46 = vmul.f32 %v4973_v15, %v4072_v52  ;;  %vm4092_vm3 = vweird.f32 %v4973_v15  ;;  %v4627_v18 = vld [vmem:[%s7081_s7 + $0x40] sm:$0xff]  ;;  %s5192_s7 = smov [#allocation11]  }
0x147f   :  { %v4115_v24 = vmul.f32 %v4084_v4, %v6945_v47  ;;  %vm4093_vm5 = vmor %vm4091_vm4, %vm4092_vm3  ;;  %4306 = vmatpush.msra.mxu2 %v4627_v18  ;;  %s4470_s13 = sshll.u32 %s5192_s7, 4  ;;  %s4471_s13 = int_to_ptr.vmem [resolvable:$true] %s4470_s13 }
0x1480   :  { %v4087_v33 = vmul.f32 %v4973_v15, %v4086_v46 }
0x1481   :  { %v4120_v29 = vmul.f32 %v4798_v35, %v4115_v24 }
0x1482   :  { %v4088_v63 = vmul.f32 0.5, %v4087_v33 }
0x1483   :  { %4619 = vmatmul.msk.f32.vlgmr.msrb.gmra.mxu1 %vm140_vm0, %v4120_v29 }
0x1484   :  { %v4063_v30 = vpop.xlane.xlu0 %4062  ;;  %v4089_v9 = vsub.f32 1.5, %v4088_v63 }
0x1485   :  { %v4069_v55 = vmul.f32 %v4063_v30, %v5330_v26 }
0x1486   :  { %v4090_v53 = vmul.f32 %v4973_v15, %v4089_v9 }
0x1487   :  { %v4073_v14 = vadd.f32 1e-05, %v4069_v55 }
0x1488   :  { %v4094_v17 = vsel %vm4093_vm5, %v4973_v15, %v4090_v53 }
0x1489   :  { %4974 = vrsqrt.f32 %v4073_v14  ;;  %v4116_v5 = vmul.f32 %v4094_v17, %v6951_v48  ;;  %vm4101_vm7 = vweird.f32 %v4073_v14 }
0x148b   :  { %v4121_v51 = vmul.f32 %v4798_v35, %v4116_v5 }
0x148d   :  { %v4066_v43 = vpop.xlane.xlu1 %4065  ;;  %4620 = vmatmul.msk.f32.gmra.mxu1 %vm140_vm0, %v4121_v51 }
0x148e   :  { %v4070_v21 = vmul.f32 %v4066_v43, %v5330_v26 }
0x148f   :  { %v4975_v42 = vpop.eup %4974 }
0x1490   :  { %v4096_v50 = vmul.f32 %v4975_v42, %v4073_v14  ;;  %v4074_v27 = vadd.f32 1e-05, %v4070_v21  ;;  %vm4102_vm6 = vweird.f32 %v4975_v42 }
0x1491   :  { %vm4103_vm8 = vmor %vm4101_vm7, %vm4102_vm6 }
0x1492   :  { %v4097_v12 = vmul.f32 %v4975_v42, %v4096_v50  ;;  %4976 = vrsqrt.f32 %v4074_v27  ;;  %vm4111_vm10 = vweird.f32 %v4074_v27 }
0x1494   :  { %v4098_v49 = vmul.f32 0.5, %v4097_v12 }
0x1496   :  { %v4099_v37 = vsub.f32 1.5, %v4098_v49 }
0x1498   :  { %v4977_v36 = vpop.eup %4976  ;;  %v4100_v40 = vmul.f32 %v4975_v42, %v4099_v37 }
0x1499   :  { %v4106_v2 = vmul.f32 %v4977_v36, %v4074_v27  ;;  %vm4112_vm9 = vweird.f32 %v4977_v36 }
0x149a   :  { %v4104_v25 = vsel %vm4103_vm8, %v4975_v42, %v4100_v40  ;;  %vm4113_vm11 = vmor %vm4111_vm10, %vm4112_vm9 }
0x149b   :  { %v4107_v56 = vmul.f32 %v4977_v36, %v4106_v2  ;;  %v4117_v62 = vmul.f32 %v4104_v25, %v6957_v31 }
0x149d   :  { %v4108_v38 = vmul.f32 0.5, %v4107_v56  ;;  %v4122_v10 = vmul.f32 %v4798_v35, %v4117_v62 }
0x149f   :  { %v4109_v7 = vsub.f32 1.5, %v4108_v38  ;;  %4621 = vmatmul.msk.f32.gmra.mxu1 %vm140_vm0, %v4122_v10 }
0x14a1   :  { %v4110_v22 = vmul.f32 %v4977_v36, %v4109_v7 }
0x14a3   :  { %v4114_v60 = vsel %vm4113_vm11, %v4977_v36, %v4110_v22 }
0x14a4   :  { %v4118_v1 = vmul.f32 %v4114_v60, %v6963_v61 }
0x14a6   :  { %v4123_v3 = vmul.f32 %v4798_v35, %v4118_v1 }
0x14a8   :  { %4622 = vmatmul.msk.f32.gmra.mxu1 %vm140_vm0, %v4123_v3 }
0x1500   :  { %v4158_v32 = vpop.f32.mrf.mxu1 }
0x1501   :  { %4254 = vrot.lane.b32.xlu2 %v4158_v32, %s5185_s20  ;;  %v4623_v39 = vmul.f32 -1.442695, %v4158_v32 }
0x1503   :  { %4978 = vpow2.f32 %v4623_v39 }
0x1509   :  { %v4979_v20 = vpop.eup %4978 }
0x150a   :  { %v6981_v6 = vpop.f32.mrf.mxu1  ;;  %v4182_v16 = vadd.f32 1.0, %v4979_v20 }
0x150b   :  { %4256 = vrot.lane.b32.xlu0 %v6981_v6, %s5185_s20  ;;  %v4624_v58 = vmul.f32 -1.442695, %v6981_v6 }
0x150c   :  { %4980 = vrcp.f32 %v4182_v16  ;;  %v4197_v13 = vand.u32 2147483648, %v4182_v16  ;;  %vm4191_vm13 = vweird.f32 %v4182_v16  ;;  %v4195_v15 = vand.u32 2147483647, %v4182_v16 }
0x150d   :  { %4982 = vpow2.f32 %v4624_v58 }
0x150e   :  { %v4198_v4 = vor.u32 1.1754944e-38, %v4197_v13  ;;  %vm4196_vm1 = vcmp.eq.f32.partialorder %v4195_v15, 8.507059e+37 }
0x1512   :  { %v4981_v54 = vpop.eup %4980 }
0x1513   :  { %v4187_v0 = vmul.f32 %v4981_v54, %v4182_v16  ;;  %vm4192_vm12 = vweird.f32 %v4981_v54  ;;  %v4983_v46 = vpop.eup %4982 }
0x1514   :  { %vm4193_vm14 = vmor %vm4191_vm13, %vm4192_vm12  ;;  %v4183_v33 = vadd.f32 1.0, %v4983_v46 }
0x1515   :  { %v4188_v52 = vsub.f32 1.0, %v4187_v0 }
0x1516   :  { %4984 = vrcp.f32 %v4183_v33  ;;  %v4212_v27 = vand.u32 2147483648, %v4183_v33  ;;  %vm4206_vm3 = vweird.f32 %v4183_v33  ;;  %v4210_v49 = vand.u32 2147483647, %v4183_v33 }
0x1517   :  { %v4189_v59 = vmul.f32 %v4981_v54, %v4188_v52 }
0x1518   :  { %v4213_v36 = vor.u32 1.1754944e-38, %v4212_v27  ;;  %vm4211_vm5 = vcmp.eq.f32.partialorder %v4210_v49, 8.507059e+37  ;;  %v4402_v49 = vld [vmem:[#allocation10] sm:$0xff] }
0x1519   :  { %v4190_v34 = vadd.f32 %v4981_v54, %v4189_v59 }
0x151b   :  { %v4194_v35 = vsel %vm4193_vm14, %v4981_v54, %v4190_v34 }
0x151c   :  { %v6985_v44 = vpop.f32.mrf.mxu1  ;;  %v4199_v24 = vsel %vm4196_vm1, %v4198_v4, %v4194_v35  ;;  %v4985_v55 = vpop.eup %4984 }
0x151d   :  { %4258 = vrot.lane.b32.xlu1 %v6985_v44, %s5185_s20  ;;  %v4246_v29 = vmul.f32 %v4199_v24, %v4158_v32  ;;  %v4625_v9 = vmul.f32 -1.442695, %v6985_v44  ;;  %v4202_v14 = vmul.f32 %v4985_v55, %v4183_v33  ;;  %vm4207_vm2 = vweird.f32 %v4985_v55 }
0x151e   :  { %vm4208_vm4 = vmor %vm4206_vm3, %vm4207_vm2 }
0x151f   :  { %4986 = vpow2.f32 %v4625_v9  ;;  %v4203_v51 = vsub.f32 1.0, %v4202_v14 }
0x1521   :  { %v4204_v43 = vmul.f32 %v4985_v55, %v4203_v51 }
0x1523   :  { %v4205_v42 = vadd.f32 %v4985_v55, %v4204_v43  ;;  %v4406_v43 = vld [vmem:[#allocation10 + $0x20] sm:$0xff] }
0x1525   :  { %v6995_v23 = vpop.f32.mrf.mxu1  ;;  %v4987_v17 = vpop.eup %4986  ;;  %v4209_v37 = vsel %vm4208_vm4, %v4985_v55, %v4205_v42 }
0x1526   :  { %4260 = vrot.lane.b32.xlu0 %v6995_v23, %s5185_s20  ;;  %v4626_v53 = vmul.f32 -1.442695, %v6995_v23  ;;  %v4184_v5 = vadd.f32 1.0, %v4987_v17  ;;  %v4214_v2 = vsel %vm4211_vm5, %v4213_v36, %v4209_v37 }
0x1527   :  { %v4247_v56 = vmul.f32 %v4214_v2, %v6981_v6  ;;  %v4409_v2 = vld [vmem:[#allocation10 + $0x38] sm:$0xff] }
0x1528   :  { %4988 = vpow2.f32 %v4626_v53  ;;  %v4227_v3 = vand.u32 2147483648, %v4184_v5  ;;  %vm4221_vm7 = vweird.f32 %v4184_v5  ;;  %v4225_v32 = vand.u32 2147483647, %v4184_v5 }
0x1529   :  { %4990 = vrcp.f32 %v4184_v5 }
0x152a   :  { %v4228_v19 = vor.u32 1.1754944e-38, %v4227_v3  ;;  %vm4226_vm9 = vcmp.eq.f32.partialorder %v4225_v32, 8.507059e+37  ;;  %v4403_v3 = vld [vmem:[#allocation10 + $0x8] sm:$0xff] }
0x152e   :  { %v4989_v21 = vpop.eup %4988 }
0x152f   :  { %v4185_v50 = vadd.f32 1.0, %v4989_v21  ;;  %v4991_v12 = vpop.eup %4990 }
0x1530   :  { %v4217_v40 = vmul.f32 %v4991_v12, %v4184_v5  ;;  %vm4222_vm6 = vweird.f32 %v4991_v12 }
0x1531   :  { %4992 = vrcp.f32 %v4185_v50  ;;  %vm4223_vm8 = vmor %vm4221_vm7, %vm4222_vm6  ;;  %v4242_v41 = vand.u32 2147483648, %v4185_v50  ;;  %vm4236_vm11 = vweird.f32 %v4185_v50  ;;  %v4240_v57 = vand.u32 2147483647, %v4185_v50 }
0x1532   :  { %v4218_v25 = vsub.f32 1.0, %v4217_v40 }
0x1533   :  { %v4243_v18 = vor.u32 1.1754944e-38, %v4242_v41  ;;  %vm4241_vm13 = vcmp.eq.f32.partialorder %v4240_v57, 8.507059e+37  ;;  %v4799_v57 = vld [vmem:[#allocation2 + $0x4] ss:$0 sm:$0xff] }
0x1534   :  { %v4219_v7 = vmul.f32 %v4991_v12, %v4218_v25  ;;  %v4407_v25 = vld [vmem:[#allocation10 + $0x28] sm:$0xff] }
0x1536   :  { %v4220_v60 = vadd.f32 %v4991_v12, %v4219_v7 }
0x1537   :  { %v4993_v62 = vpop.eup %4992 }
0x1538   :  { %v4232_v22 = vmul.f32 %v4993_v62, %v4185_v50  ;;  %v4224_v28 = vsel %vm4223_vm8, %v4991_v12, %v4220_v60  ;;  %vm4237_vm10 = vweird.f32 %v4993_v62  ;;  %v4404_v50 = vld [vmem:[#allocation10 + $0x10] sm:$0xff] }
0x1539   :  { %v4229_v8 = vsel %vm4226_vm9, %v4228_v19, %v4224_v28  ;;  %vm4238_vm12 = vmor %vm4236_vm11, %vm4237_vm10 }
0x153a   :  { %v4233_v1 = vsub.f32 1.0, %v4232_v22  ;;  %v4248_v39 = vmul.f32 %v4229_v8, %v6985_v44 }
0x153c   :  { %v4234_v45 = vmul.f32 %v4993_v62, %v4233_v1 }
0x153e   :  { %v4235_v6 = vadd.f32 %v4993_v62, %v4234_v45 }
0x1540   :  { %v4239_v16 = vsel %vm4238_vm12, %v4993_v62, %v4235_v6 }
0x1541   :  { %v4244_v54 = vsel %vm4241_vm13, %v4243_v18, %v4239_v16 }
0x1542   :  { %v4249_v0 = vmul.f32 %v4244_v54, %v6995_v23 }
0x155b   :  { %v4255_v63 = vpop.permute.xlu2 %4254 }
0x155c   :  { %v4266_v30 = vmul.f32 %v4255_v63, %v4246_v29 }
0x155e   :  { %4635 = vmatmul.msk.f32.vlgmr.msra.gmra.mxu2 %vm363_vm15, %v4266_v30 }
0x157d   :  { %v4257_v38 = vpop.permute.xlu0 %4256 }
0x157e   :  { %v4267_v10 = vmul.f32 %v4257_v38, %v4247_v56 }
0x1580   :  { %4636 = vmatmul.msk.f32.gmra.mxu2 %vm363_vm15, %v4267_v10  ;;  %v4405_v10 = vld [vmem:[#allocation10 + $0x18] sm:$0xff] }
0x158f   :  { %v4259_v11 = vpop.permute.xlu1 %4258 }
0x1590   :  { %v4268_v20 = vmul.f32 %v4259_v11, %v4248_v39 }
0x1592   :  { %4637 = vmatmul.msk.f32.gmra.mxu2 %vm363_vm15, %v4268_v20 }
0x1598   :  { %v4261_v52 = vpop.permute.xlu0 %4260 }
0x1599   :  { %v4269_v58 = vmul.f32 %v4261_v52, %v4249_v0 }
0x159b   :  { %4638 = vmatmul.msk.f32.gmra.mxu2 %vm363_vm15, %v4269_v58 }
0x15e1   :  { %v4308_v59 = vpop.f32.mrf.mxu2 }
0x15e2   :  { %v7028_v44 = vadd.f32 %v4308_v59, %v6945_v47 }
0x15e4   :  { %v4325_v34 = vmul.f32 %v7028_v44, %v7028_v44 }
0x15e6   :  { %v4329_v13 = vsel %vm140_vm0, %v4325_v34, 0.0 }
0x15e7   :  { %4330 = vadd.xlane.f32.xlu2 %v4329_v13 }
0x1603   :  { %v4311_v15 = vpop.f32.mrf.mxu2 }
0x1604   :  { %v7034_v35 = vadd.f32 %v4311_v15, %v6951_v48 }
0x1606   :  { %v4326_v23 = vmul.f32 %v7034_v35, %v7034_v35 }
0x1608   :  { %v4332_v4 = vsel %vm140_vm0, %v4326_v23, 0.0 }
0x1609   :  { %4333 = vadd.xlane.f32.xlu1 %v4332_v4 }
0x1615   :  { %v4314_v46 = vpop.f32.mrf.mxu2 }
0x1616   :  { %v7040_v47 = vadd.f32 %v4314_v46, %v6957_v31 }
0x1618   :  { %v4327_v24 = vmul.f32 %v7040_v47, %v7040_v47 }
0x161a   :  { %v4335_v33 = vsel %vm140_vm0, %v4327_v24, 0.0 }
0x161b   :  { %4336 = vadd.xlane.f32.xlu0 %v4335_v33 }
0x161e   :  { %v4317_v29 = vpop.f32.mrf.mxu2 }
0x161f   :  { %v7046_v48 = vadd.f32 %v4317_v29, %v6963_v61  ;;  %v4408_v61 = vld [vmem:[#allocation10 + $0x30] sm:$0xff] }
0x1620   :  { %4428 = vmatpush.msrb.mxu0 %v4408_v61 }
0x1621   :  { %v4328_v63 = vmul.f32 %v7046_v48, %v7046_v48 }
0x1622   :  { %4429 = vmatpush.msrb.mxu0 %v4406_v43 }
0x1623   :  { %v4338_v30 = vsel %vm140_vm0, %v4328_v63, 0.0 }
0x1624   :  { %4339 = vadd.xlane.f32.xlu2 %v4338_v30  ;;  %4430 = vmatpush.msrb.mxu0 %v4404_v50 }
0x1626   :  { %4431 = vmatpush.msrb.mxu0 %v4402_v49 }
0x1628   :  { %4451 = vmatpush.msra.mxu0 %v4409_v2 }
0x162a   :  { %4452 = vmatpush.msra.mxu0 %v4407_v25 }
0x162c   :  { %4453 = vmatpush.msra.mxu0 %v4405_v10 }
0x162e   :  { %4454 = vmatpush.msra.mxu0 %v4403_v3 }
0x165a   :  { %v4331_v9 = vpop.xlane.xlu2 %4330 }
0x165b   :  { %v4341_v31 = vmul.f32 %v4331_v9, %v5330_v26 }
0x165d   :  { %v4345_v55 = vadd.f32 1e-05, %v4341_v31 }
0x165f   :  { %4994 = vrsqrt.f32 %v4345_v55  ;;  %vm4355_vm14 = vweird.f32 %v4345_v55 }
0x1665   :  { %v4995_v5 = vpop.eup %4994 }
0x1666   :  { %v4350_v51 = vmul.f32 %v4995_v5, %v4345_v55  ;;  %vm4356_vm15 = vweird.f32 %v4995_v5 }
0x1667   :  { %vm4357_vm1 = vmor %vm4355_vm14, %vm4356_vm15 }
0x1668   :  { %v4351_v27 = vmul.f32 %v4995_v5, %v4350_v51 }
0x166a   :  { %v4352_v36 = vmul.f32 0.5, %v4351_v27 }
0x166c   :  { %v4353_v62 = vsub.f32 1.5, %v4352_v36 }
0x166e   :  { %v4354_v32 = vmul.f32 %v4995_v5, %v4353_v62 }
0x1670   :  { %v4358_v8 = vsel %vm4357_vm1, %v4995_v5, %v4354_v32 }
0x1671   :  { %v4389_v11 = vmul.f32 %v4358_v8, %v7028_v44 }
0x1673   :  { %v4394_v52 = vmul.f32 %v4799_v57, %v4389_v11 }
0x167c   :  { %v4334_v53 = vpop.xlane.xlu1 %4333 }
0x167d   :  { %v4342_v14 = vmul.f32 %v4334_v53, %v5330_v26 }
0x167f   :  { %v7053_v17 = vadd.f32 1e-05, %v4342_v14 }
0x1681   :  { %4996 = vrsqrt.f32 %v7053_v17  ;;  %vm4365_vm6 = vweird.f32 %v7053_v17 }
0x1687   :  { %v4997_v37 = vpop.eup %4996 }
0x1688   :  { %v4360_v40 = vmul.f32 %v4997_v37, %v7053_v17  ;;  %vm4366_vm5 = vweird.f32 %v4997_v37 }
0x1689   :  { %vm4367_vm7 = vmor %vm4365_vm6, %vm4366_vm5 }
0x168a   :  { %v4361_v22 = vmul.f32 %v4997_v37, %v4360_v40 }
0x168c   :  { %v4362_v45 = vmul.f32 0.5, %v4361_v22 }
0x168e   :  { %v4337_v21 = vpop.xlane.xlu0 %4336 }
0x168f   :  { %v4343_v42 = vmul.f32 %v4337_v21, %v5330_v26 }
0x1691   :  { %v4347_v12 = vadd.f32 1e-05, %v4343_v42 }
0x1693   :  { %4998 = vrsqrt.f32 %v4347_v12  ;;  %vm4375_vm3 = vweird.f32 %v4347_v12 }
0x1697   :  { %v4340_v56 = vpop.xlane.xlu2 %4339 }
0x1698   :  { %v4344_v38 = vmul.f32 %v4340_v56, %v5330_v26  ;;  %v4363_v26 = vsub.f32 1.5, %v4362_v45 }
0x1699   :  { %v4999_v7 = vpop.eup %4998 }
0x169a   :  { %v4370_v60 = vmul.f32 %v4999_v7, %v4347_v12  ;;  %v4348_v1 = vadd.f32 1e-05, %v4344_v38  ;;  %vm4376_vm2 = vweird.f32 %v4999_v7  ;;  %v4364_v18 = vmul.f32 %v4997_v37, %v4363_v26 }
0x169b   :  { %vm4377_vm4 = vmor %vm4375_vm3, %vm4376_vm2 }
0x169c   :  { %v4371_v28 = vmul.f32 %v4999_v7, %v4370_v60  ;;  %5000 = vrsqrt.f32 %v4348_v1  ;;  %v4368_v34 = vsel %vm4367_vm7, %v4997_v37, %v4364_v18  ;;  %vm4385_vm9 = vweird.f32 %v4348_v1 }
0x169d   :  { %v4390_v4 = vmul.f32 %v4368_v34, %v7034_v35 }
0x169e   :  { %v4372_v19 = vmul.f32 0.5, %v4371_v28 }
0x169f   :  { %v4395_v24 = vmul.f32 %v4799_v57, %v4390_v4 }
0x16a0   :  { %v4373_v6 = vsub.f32 1.5, %v4372_v19 }
0x16a2   :  { %v5001_v41 = vpop.eup %5000  ;;  %v4374_v39 = vmul.f32 %v4999_v7, %v4373_v6 }
0x16a3   :  { %v4380_v20 = vmul.f32 %v5001_v41, %v4348_v1  ;;  %vm4386_vm8 = vweird.f32 %v5001_v41 }
0x16a4   :  { %v4378_v16 = vsel %vm4377_vm4, %v4999_v7, %v4374_v39  ;;  %vm4387_vm10 = vmor %vm4385_vm9, %vm4386_vm8 }
0x16a5   :  { %v4391_v54 = vmul.f32 %v4378_v16, %v7040_v47  ;;  %v4381_v0 = vmul.f32 %v5001_v41, %v4380_v20 }
0x16a7   :  { %v4396_v58 = vmul.f32 %v4799_v57, %v4391_v54  ;;  %v4382_v59 = vmul.f32 0.5, %v4381_v0 }
0x16a9   :  { %v4383_v13 = vsub.f32 1.5, %v4382_v59  ;;  %v4398_v15 = vadd.f32 %v4396_v58, %v4394_v52 }
0x16ab   :  { %v4384_v23 = vmul.f32 %v5001_v41, %v4383_v13  ;;  %v4400_v44 = vmul.f32 0.5, %v4398_v15 }
0x16ad   :  { %v4388_v46 = vsel %vm4387_vm10, %v5001_v41, %v4384_v23  ;;  %4639 = vmatmul.msk.f32.vlgmr.msrb.gmra.mxu0 %vm140_vm0, %v4400_v44 }
0x16ae   :  { %v4392_v47 = vmul.f32 %v4388_v46, %v7046_v48 }
0x16b0   :  { %v4397_v33 = vmul.f32 %v4799_v57, %v4392_v47 }
0x16b2   :  { %v4399_v29 = vadd.f32 %v4397_v33, %v4395_v24 }
0x16b4   :  { %v4401_v63 = vmul.f32 0.5, %v4399_v29 }
0x16b6   :  { %4640 = vmatmul.msk.f32.gmra.mxu0 %vm140_vm0, %v4401_v63 }
0x16be   :  { %4641 = vmatmul.msk.f32.vlgmr.msra.gmra.mxu0 %vm140_vm0, %v4400_v44 }
0x16c6   :  { %4642 = vmatmul.msk.f32.gmra.mxu0 %vm140_vm0, %v4401_v63 }
0x172a   :  { %v4433_v30 = vpop.f32.mrf.mxu0 }
0x172b   :  { %4462 = vst [vmem:[#allocation11] sm:$0xff] %v4433_v30 }
0x1733   :  { %v4436_v9 = vpop.f32.mrf.mxu0 }
0x1734   :  { %4464 = vst [vmem:[#allocation11 + $0x10] sm:$0xff] %v4436_v9 }
0x173b   :  { %v4456_v35 = vpop.f32.mrf.mxu0 }
0x173c   :  { %4463 = vst [vmem:[#allocation11 + $0x8] sm:$0xff] %v4456_v35 }
0x1743   :  { %v4459_v48 = vpop.f32.mrf.mxu0 }
0x1744   :  { %4465 = vst [vmem:[#allocation11 + $0x18] sm:$0xff] %v4459_v48 }
0x1745   :  { %4478 = dma.vmem_to_hbm [thread:$0]  %s4471_s13, 512, %s4473_s12, [#allocation4], %s5181_s22, %s5181_s22, %s5182_s6  }
0x1746   :  { %5172 = dma.done.wait [#allocation4], 512  }
0x1747   :  { %5173 = vsyncadd [#allocation4], 4294966784 }
0x1748   :  { %4483 = vsyncpa [#allocation3], 1 }
0x1749   :  { %4484 = vsyncpa [#allocation6], 1 }
0x174a   :  { %4485 = vsyncpa [#allocation9], 1 }
0x174b   :  { %4486 = vsyncpa [#allocation4], 1 }

</bundles_post_ra>
